<compile_context>
chip_gen: v5e
topology: v5e:2x2
jax: 0.10.0
libtpu: 0.0.40
codegen_flags: <defaults>
</compile_context>

<pallas_src>
import functools

import jax
import jax.numpy as jnp
from jax.experimental import pallas as pl
from jax.experimental.pallas import tpu as pltpu


def _upsample_conv_kernel(x_ref, w_ref, b_ref, o_ref, acc0_ref, acc1_ref, *,
                          tile_h, width, ch):
    # x_ref : (Hp, Wp, Cin)           padded original-res slab for one (n, d)
    # w_ref : (16, Cin, Cout)         folded phase weights, flat ((a*2+b)*2+dh)*2+dw
    # b_ref : (1, 2*Cout)             bias tiled twice (lanes pack (col_phase, cout))
    # o_ref : (tile_h, 2, W, 2*Cout)  (i, a, j, b*Cout+co) == out[2i+a, 2j+b, co]
    # acc{0,1}_ref : (tile_h, W, 2*Cout) f32 accumulators for row phase a = 0 / 1
    r = pl.program_id(1)
    i0 = pl.multiple_of(r * tile_h, tile_h)        # first original row of this tile

    for a in range(2):                             # output row phase
        acc_ref = acc0_ref if a == 0 else acc1_ref
        for b in range(2):                         # output column phase
            out_lanes = pl.ds(b * ch, ch)
            for dh in range(2):                    # folded row tap
                for dw in range(2):                # folded column tap
                    patch = x_ref[pl.ds(i0 + a + dh, tile_h),
                                  pl.ds(b + dw, width), :]
                    patch = patch.reshape(tile_h * width, ch)
                    wmat = w_ref[((a * 2 + b) * 2 + dh) * 2 + dw]
                    tap = jnp.dot(patch, wmat,
                                  preferred_element_type=jnp.float32)
                    tap = tap.reshape(tile_h, width, ch)
                    if dh == 0 and dw == 0:
                        acc_ref[:, :, out_lanes] = tap       # init, no zero pass
                    else:
                        acc_ref[:, :, out_lanes] += tap

    out = jnp.stack([acc0_ref[...], acc1_ref[...]], axis=1)  # (tile_h, 2, W, 2C)
    o_ref[...] = (out + b_ref[...]).astype(o_ref.dtype)


def upsample_forward(x, w, b, *, tile_h=None, vmem_budget_bytes=20 * 1024 * 1024):
    """Pallas-TPU forward of:
         y = F.interpolate(x, scale_factor=[1, 2, 2], mode='nearest')
         return Conv3d(C, C, kernel_size=(1, 3, 3), padding=(0, 1, 1))(y)
    x: (N, C, D, H, W); w: (C, C, 1, 3, 3); b: (C,).  Returns (N, C, D, 2H, 2W).
    """
    N, C, D, H, W = x.shape
    assert w.shape == (C, C, 1, 3, 3) and b.shape == (C,)
    Ho, Wo = 2 * H, 2 * W
    B = N * D
    Hp, Wp = H + 2, W + 2

    # Host-side prep is ORIGINAL resolution only: one channels-last transpose
    # and a 1-px zero pad (the upsampled tensor is never materialized).
    xl = jnp.transpose(x, (0, 2, 3, 4, 1)).reshape(B, H, W, C)
    xp = jnp.pad(xl, ((0, 0), (1, 1), (1, 1), (0, 0)))         # (B, H+2, W+2, C)

    # Fold the 3x3 taps into per-phase 2x2 taps (sub-pixel conv identity).
    # R[a, dh, kh] = 1 iff original row tap kh of phase a lands on folded tap dh.
    R = jnp.array([[[1., 0., 0.], [0., 1., 1.]],
                   [[1., 1., 0.], [0., 0., 1.]]], jnp.float32)
    w3 = w[:, :, 0].astype(jnp.float32)                        # (Cout, Cin, 3, 3)
    wf = jnp.einsum('adh,bew,oihw->abdeio', R, R, w3)          # (2,2,2,2,Cin,Cout)
    wf = wf.reshape(16, C, C).astype(x.dtype)
    bias2 = jnp.concatenate([b, b]).reshape(1, 2 * C).astype(jnp.float32)

    # Row-tile size: biggest divisor of H whose double-buffered blocks fit VMEM.
    if tile_h is None:
        lane = lambda c: ((c + 127) // 128) * 128
        itemsize = jnp.dtype(x.dtype).itemsize

        def vmem_est(th):
            in_b = 2 * Hp * Wp * lane(C) * itemsize            # input slab, 2 bufs
            out_b = 2 * th * 2 * W * lane(2 * C) * itemsize    # output tile, 2 bufs
            acc_b = 2 * th * W * lane(2 * C) * 4               # f32 accumulators
            w_b = 16 * C * lane(C) * itemsize + 8 * lane(2 * C)
            return in_b + out_b + acc_b + w_b

        tile_h = 1
        for th in range(H, 0, -1):
            if H % th == 0 and vmem_est(th) <= vmem_budget_bytes:
                tile_h = th
                break
    assert H % tile_h == 0, "tile_h must divide H"
    n_row_tiles = H // tile_h
    # TODO(synk): for very large H*W*C also row-tile the input slab (2-row halo)
    # instead of keeping the full padded slab resident per (n, d).

    kernel = functools.partial(_upsample_conv_kernel,
                               tile_h=tile_h, width=W, ch=C)

    # Output written as (B, H, 2, W, 2C): row-major identical to (B, 2H, 2W, C),
    # so the reshape after the call is free (no HBM pass).
    out5 = pl.pallas_call(
        kernel,
        out_shape=jax.ShapeDtypeStruct((B, H, 2, W, 2 * C), x.dtype),
        grid=(B, n_row_tiles),
        in_specs=[
            # Full padded slab per (n, d); block index is constant along the
            # row-tile axis so it is DMA'd once and reused across row tiles.
            pl.BlockSpec((None, Hp, Wp, C), lambda bi, r: (bi, 0, 0, 0)),
            pl.BlockSpec((16, C, C), lambda bi, r: (0, 0, 0)),
            pl.BlockSpec((1, 2 * C), lambda bi, r: (0, 0)),
        ],
        out_specs=pl.BlockSpec((None, tile_h, 2, W, 2 * C),
                               lambda bi, r: (bi, r, 0, 0, 0)),
        scratch_shapes=[pltpu.VMEM((tile_h, W, 2 * C), jnp.float32),
                        pltpu.VMEM((tile_h, W, 2 * C), jnp.float32)],
        compiler_params=pltpu.CompilerParams(
            dimension_semantics=("parallel", "parallel"),
            vmem_limit_bytes=64 * 1024 * 1024),
    )(xp, wf, bias2)

    out_cl = out5.reshape(B, Ho, Wo, C)            # free: same HBM layout
    # TODO(synk): if the consumer accepts channels-last, return out_cl and skip
    # this final (only remaining) full-output-size transpose back to NCDHW.
    return out_cl.reshape(N, D, Ho, Wo, C).transpose(0, 4, 1, 2, 3)


if __name__ == "__main__":
    key = jax.random.PRNGKey(0)
    kx, kw, kb = jax.random.split(key, 3)

    N, C, D, H, W = 2, 4, 3, 16, 16
    x = jax.random.normal(kx, (N, C, D, H, W), jnp.float32)

    # Deterministic synthetic params (PyTorch-default-like uniform bounds).
    fan_in = C * 1 * 3 * 3
    bound = 1.0 / (fan_in ** 0.5)
    w = jax.random.uniform(kw, (C, C, 1, 3, 3), jnp.float32, -bound, bound)
    b = jax.random.uniform(kb, (C,), jnp.float32, -bound, bound)

    # tile_h=8 -> 2 row tiles, so the tiled path is exercised at this small size.
    out = jax.block_until_ready(upsample_forward(x, w, b, tile_h=8))
    assert out.shape == (N, C, D, 2 * H, 2 * W)

    # Pure-JAX reference: explicit nearest-2x upsample + lax 3x3 conv.
    xu = jnp.repeat(jnp.repeat(x, 2, axis=3), 2, axis=4)
    xu2 = xu.transpose(0, 2, 1, 3, 4).reshape(N * D, C, 2 * H, 2 * W)
    ref = jax.lax.conv_general_dilated(
        xu2, w[:, :, 0], window_strides=(1, 1), padding=((1, 1), (1, 1)),
        dimension_numbers=("NCHW", "OIHW", "NCHW"),
        precision=jax.lax.Precision.HIGHEST)
    ref = ref + b[None, :, None, None]
    ref = ref.reshape(N, D, C, 2 * H, 2 * W).transpose(0, 2, 1, 3, 4)

    assert jnp.allclose(out, ref, atol=1e-3, rtol=1e-3), "mismatch vs reference"
    print("KERNEL_OK")
</pallas_src>

<mosaic_0001>
module attributes {stable_mosaic.version = 11 : i64} {
  func.func @_upsample_conv_kernel(%arg0: i32, %arg1: i32, %arg2: memref<1x18x18x4xf32, #tpu.memory_space<vmem>>, %arg3: memref<16x4x4xf32, #tpu.memory_space<vmem>>, %arg4: memref<1x8xf32, #tpu.memory_space<vmem>>, %arg5: memref<1x8x2x16x8xf32, #tpu.memory_space<vmem>>, %arg6: memref<8x16x8xf32, #tpu.memory_space<vmem>>, %arg7: memref<8x16x8xf32, #tpu.memory_space<vmem>>) attributes {dimension_semantics = [#tpu.dimension_semantics<parallel>, #tpu.dimension_semantics<parallel>], iteration_bounds = array<i64: 6, 2>, scalar_prefetch = 0 : i64, scratch_operands = 2 : i64, tpu.core_type = #tpu.core_type<tc>, window_params = [{transform_indices = @transform_0, window_bounds = array<i64: 1, 18, 18, 4>}, {pipeline_mode = #tpu.pipeline_mode<synchronous>, transform_indices = @transform_1, window_bounds = array<i64: 16, 4, 4>}, {pipeline_mode = #tpu.pipeline_mode<synchronous>, transform_indices = @transform_2, window_bounds = array<i64: 1, 8>}, {transform_indices = @transform_3, window_bounds = array<i64: 1, 8, 2, 16, 8>}]} {
    %c8_i32 = arith.constant 8 : i32
    %0 = arith.muli %arg1, %c8_i32 : i32
    %1 = tpu.assume_multiple %0, 8 : i32
    %c0_i32 = arith.constant 0 : i32
    %2 = arith.addi %1, %c0_i32 : i32
    %c0_i32_0 = arith.constant 0 : i32
    %3 = arith.addi %2, %c0_i32_0 : i32
    %c0 = arith.constant 0 : index
    %4 = arith.index_cast %3 : i32 to index
    %c0_1 = arith.constant 0 : index
    %c0_2 = arith.constant 0 : index
    %5 = vector.load %arg2[%c0, %4, %c0_1, %c0_2] : memref<1x18x18x4xf32, #tpu.memory_space<vmem>>, vector<1x8x16x4xf32>
    %6 = vector.shape_cast %5 : vector<1x8x16x4xf32> to vector<8x16x4xf32>
    %7 = vector.shape_cast %6 : vector<8x16x4xf32> to vector<128x4xf32>
    %c0_3 = arith.constant 0 : index
    %c0_4 = arith.constant 0 : index
    %c0_5 = arith.constant 0 : index
    %8 = vector.load %arg3[%c0_3, %c0_4, %c0_5] : memref<16x4x4xf32, #tpu.memory_space<vmem>>, vector<1x4x4xf32>
    %9 = vector.shape_cast %8 : vector<1x4x4xf32> to vector<4x4xf32>
    %cst = arith.constant dense<0.000000e+00> : vector<128x4xf32>
    %10 = tpu.matmul %7, %9, %cst {dimension_numbers = #tpu.dot_dimension_numbers<[1], [0], [0], [1], [0, 0, 1, 1], [], []>} : vector<128x4xf32>, vector<4x4xf32>, vector<128x4xf32> -> vector<128x4xf32>
    %11 = vector.shape_cast %10 : vector<128x4xf32> to vector<8x16x4xf32>
    %c0_6 = arith.constant 0 : index
    %c0_7 = arith.constant 0 : index
    %c0_8 = arith.constant 0 : index
    %12 = vector.load %arg6[%c0_6, %c0_7, %c0_8] : memref<8x16x8xf32, #tpu.memory_space<vmem>>, vector<8x16x4xf32>
    tpu.vector_store %arg6[%c0_6, %c0_7, %c0_8], %11 {strides = array<i32>} : memref<8x16x8xf32, #tpu.memory_space<vmem>>, vector<8x16x4xf32>,
    %c0_i32_9 = arith.constant 0 : i32
    %13 = arith.addi %1, %c0_i32_9 : i32
    %c0_i32_10 = arith.constant 0 : i32
    %14 = arith.addi %13, %c0_i32_10 : i32
    %c0_11 = arith.constant 0 : index
    %15 = arith.index_cast %14 : i32 to index
    %c1 = arith.constant 1 : index
    %c0_12 = arith.constant 0 : index
    %16 = vector.load %arg2[%c0_11, %15, %c1, %c0_12] : memref<1x18x18x4xf32, #tpu.memory_space<vmem>>, vector<1x8x16x4xf32>
    %17 = vector.shape_cast %16 : vector<1x8x16x4xf32> to vector<8x16x4xf32>
    %18 = vector.shape_cast %17 : vector<8x16x4xf32> to vector<128x4xf32>
    %c1_13 = arith.constant 1 : index
    %c0_14 = arith.constant 0 : index
    %c0_15 = arith.constant 0 : index
    %19 = vector.load %arg3[%c1_13, %c0_14, %c0_15] : memref<16x4x4xf32, #tpu.memory_space<vmem>>, vector<1x4x4xf32>
    %20 = vector.shape_cast %19 : vector<1x4x4xf32> to vector<4x4xf32>
    %cst_16 = arith.constant dense<0.000000e+00> : vector<128x4xf32>
    %21 = tpu.matmul %18, %20, %cst_16 {dimension_numbers = #tpu.dot_dimension_numbers<[1], [0], [0], [1], [0, 0, 1, 1], [], []>} : vector<128x4xf32>, vector<4x4xf32>, vector<128x4xf32> -> vector<128x4xf32>
    %22 = vector.shape_cast %21 : vector<128x4xf32> to vector<8x16x4xf32>
    %c0_17 = arith.constant 0 : index
    %c0_18 = arith.constant 0 : index
    %c0_19 = arith.constant 0 : index
    %23 = vector.load %arg6[%c0_17, %c0_18, %c0_19] : memref<8x16x8xf32, #tpu.memory_space<vmem>>, vector<8x16x4xf32>
    %24 = arith.addf %23, %22 : vector<8x16x4xf32>
    %c0_20 = arith.constant 0 : index
    %c0_21 = arith.constant 0 : index
    %c0_22 = arith.constant 0 : index
    %25 = vector.load %arg6[%c0_20, %c0_21, %c0_22] : memref<8x16x8xf32, #tpu.memory_space<vmem>>, vector<8x16x4xf32>
    tpu.vector_store %arg6[%c0_20, %c0_21, %c0_22], %24 {strides = array<i32>} : memref<8x16x8xf32, #tpu.memory_space<vmem>>, vector<8x16x4xf32>,
    %c0_i32_23 = arith.constant 0 : i32
    %26 = arith.addi %1, %c0_i32_23 : i32
    %c1_i32 = arith.constant 1 : i32
    %27 = arith.addi %26, %c1_i32 : i32
    %c0_24 = arith.constant 0 : index
    %28 = arith.index_cast %27 : i32 to index
    %c0_25 = arith.constant 0 : index
    %c0_26 = arith.constant 0 : index
    %29 = vector.load %arg2[%c0_24, %28, %c0_25, %c0_26] : memref<1x18x18x4xf32, #tpu.memory_space<vmem>>, vector<1x8x16x4xf32>
    %30 = vector.shape_cast %29 : vector<1x8x16x4xf32> to vector<8x16x4xf32>
    %31 = vector.shape_cast %30 : vector<8x16x4xf32> to vector<128x4xf32>
    %c2 = arith.constant 2 : index
    %c0_27 = arith.constant 0 : index
    %c0_28 = arith.constant 0 : index
    %32 = vector.load %arg3[%c2, %c0_27, %c0_28] : memref<16x4x4xf32, #tpu.memory_space<vmem>>, vector<1x4x4xf32>
    %33 = vector.shape_cast %32 : vector<1x4x4xf32> to vector<4x4xf32>
    %cst_29 = arith.constant dense<0.000000e+00> : vector<128x4xf32>
    %34 = tpu.matmul %31, %33, %cst_29 {dimension_numbers = #tpu.dot_dimension_numbers<[1], [0], [0], [1], [0, 0, 1, 1], [], []>} : vector<128x4xf32>, vector<4x4xf32>, vector<128x4xf32> -> vector<128x4xf32>
    %35 = vector.shape_cast %34 : vector<128x4xf32> to vector<8x16x4xf32>
    %c0_30 = arith.constant 0 : index
    %c0_31 = arith.constant 0 : index
    %c0_32 = arith.constant 0 : index
    %36 = vector.load %arg6[%c0_30, %c0_31, %c0_32] : memref<8x16x8xf32, #tpu.memory_space<vmem>>, vector<8x16x4xf32>
    %37 = arith.addf %36, %35 : vector<8x16x4xf32>
    %c0_33 = arith.constant 0 : index
    %c0_34 = arith.constant 0 : index
    %c0_35 = arith.constant 0 : index
    %38 = vector.load %arg6[%c0_33, %c0_34, %c0_35] : memref<8x16x8xf32, #tpu.memory_space<vmem>>, vector<8x16x4xf32>
    tpu.vector_store %arg6[%c0_33, %c0_34, %c0_35], %37 {strides = array<i32>} : memref<8x16x8xf32, #tpu.memory_space<vmem>>, vector<8x16x4xf32>,
    %c0_i32_36 = arith.constant 0 : i32
    %39 = arith.addi %1, %c0_i32_36 : i32
    %c1_i32_37 = arith.constant 1 : i32
    %40 = arith.addi %39, %c1_i32_37 : i32
    %c0_38 = arith.constant 0 : index
    %41 = arith.index_cast %40 : i32 to index
    %c1_39 = arith.constant 1 : index
    %c0_40 = arith.constant 0 : index
    %42 = vector.load %arg2[%c0_38, %41, %c1_39, %c0_40] : memref<1x18x18x4xf32, #tpu.memory_space<vmem>>, vector<1x8x16x4xf32>
    %43 = vector.shape_cast %42 : vector<1x8x16x4xf32> to vector<8x16x4xf32>
    %44 = vector.shape_cast %43 : vector<8x16x4xf32> to vector<128x4xf32>
    %c3 = arith.constant 3 : index
    %c0_41 = arith.constant 0 : index
    %c0_42 = arith.constant 0 : index
    %45 = vector.load %arg3[%c3, %c0_41, %c0_42] : memref<16x4x4xf32, #tpu.memory_space<vmem>>, vector<1x4x4xf32>
    %46 = vector.shape_cast %45 : vector<1x4x4xf32> to vector<4x4xf32>
    %cst_43 = arith.constant dense<0.000000e+00> : vector<128x4xf32>
    %47 = tpu.matmul %44, %46, %cst_43 {dimension_numbers = #tpu.dot_dimension_numbers<[1], [0], [0], [1], [0, 0, 1, 1], [], []>} : vector<128x4xf32>, vector<4x4xf32>, vector<128x4xf32> -> vector<128x4xf32>
    %48 = vector.shape_cast %47 : vector<128x4xf32> to vector<8x16x4xf32>
    %c0_44 = arith.constant 0 : index
    %c0_45 = arith.constant 0 : index
    %c0_46 = arith.constant 0 : index
    %49 = vector.load %arg6[%c0_44, %c0_45, %c0_46] : memref<8x16x8xf32, #tpu.memory_space<vmem>>, vector<8x16x4xf32>
    %50 = arith.addf %49, %48 : vector<8x16x4xf32>
    %c0_47 = arith.constant 0 : index
    %c0_48 = arith.constant 0 : index
    %c0_49 = arith.constant 0 : index
    %51 = vector.load %arg6[%c0_47, %c0_48, %c0_49] : memref<8x16x8xf32, #tpu.memory_space<vmem>>, vector<8x16x4xf32>
    tpu.vector_store %arg6[%c0_47, %c0_48, %c0_49], %50 {strides = array<i32>} : memref<8x16x8xf32, #tpu.memory_space<vmem>>, vector<8x16x4xf32>,
    %c0_i32_50 = arith.constant 0 : i32
    %52 = arith.addi %1, %c0_i32_50 : i32
    %c0_i32_51 = arith.constant 0 : i32
    %53 = arith.addi %52, %c0_i32_51 : i32
    %c0_52 = arith.constant 0 : index
    %54 = arith.index_cast %53 : i32 to index
    %c1_53 = arith.constant 1 : index
    %c0_54 = arith.constant 0 : index
    %55 = vector.load %arg2[%c0_52, %54, %c1_53, %c0_54] : memref<1x18x18x4xf32, #tpu.memory_space<vmem>>, vector<1x8x16x4xf32>
    %56 = vector.shape_cast %55 : vector<1x8x16x4xf32> to vector<8x16x4xf32>
    %57 = vector.shape_cast %56 : vector<8x16x4xf32> to vector<128x4xf32>
    %c4 = arith.constant 4 : index
    %c0_55 = arith.constant 0 : index
    %c0_56 = arith.constant 0 : index
    %58 = vector.load %arg3[%c4, %c0_55, %c0_56] : memref<16x4x4xf32, #tpu.memory_space<vmem>>, vector<1x4x4xf32>
    %59 = vector.shape_cast %58 : vector<1x4x4xf32> to vector<4x4xf32>
    %cst_57 = arith.constant dense<0.000000e+00> : vector<128x4xf32>
    %60 = tpu.matmul %57, %59, %cst_57 {dimension_numbers = #tpu.dot_dimension_numbers<[1], [0], [0], [1], [0, 0, 1, 1], [], []>} : vector<128x4xf32>, vector<4x4xf32>, vector<128x4xf32> -> vector<128x4xf32>
    %61 = vector.shape_cast %60 : vector<128x4xf32> to vector<8x16x4xf32>
    %c0_58 = arith.constant 0 : index
    %c0_59 = arith.constant 0 : index
    %c4_60 = arith.constant 4 : index
    %62 = vector.load %arg6[%c0_58, %c0_59, %c4_60] : memref<8x16x8xf32, #tpu.memory_space<vmem>>, vector<8x16x4xf32>
    tpu.vector_store %arg6[%c0_58, %c0_59, %c4_60], %61 {strides = array<i32>} : memref<8x16x8xf32, #tpu.memory_space<vmem>>, vector<8x16x4xf32>,
    %c0_i32_61 = arith.constant 0 : i32
    %63 = arith.addi %1, %c0_i32_61 : i32
    %c0_i32_62 = arith.constant 0 : i32
    %64 = arith.addi %63, %c0_i32_62 : i32
    %c0_63 = arith.constant 0 : index
    %65 = arith.index_cast %64 : i32 to index
    %c2_64 = arith.constant 2 : index
    %c0_65 = arith.constant 0 : index
    %66 = vector.load %arg2[%c0_63, %65, %c2_64, %c0_65] : memref<1x18x18x4xf32, #tpu.memory_space<vmem>>, vector<1x8x16x4xf32>
    %67 = vector.shape_cast %66 : vector<1x8x16x4xf32> to vector<8x16x4xf32>
    %68 = vector.shape_cast %67 : vector<8x16x4xf32> to vector<128x4xf32>
    %c5 = arith.constant 5 : index
    %c0_66 = arith.constant 0 : index
    %c0_67 = arith.constant 0 : index
    %69 = vector.load %arg3[%c5, %c0_66, %c0_67] : memref<16x4x4xf32, #tpu.memory_space<vmem>>, vector<1x4x4xf32>
    %70 = vector.shape_cast %69 : vector<1x4x4xf32> to vector<4x4xf32>
    %cst_68 = arith.constant dense<0.000000e+00> : vector<128x4xf32>
    %71 = tpu.matmul %68, %70, %cst_68 {dimension_numbers = #tpu.dot_dimension_numbers<[1], [0], [0], [1], [0, 0, 1, 1], [], []>} : vector<128x4xf32>, vector<4x4xf32>, vector<128x4xf32> -> vector<128x4xf32>
    %72 = vector.shape_cast %71 : vector<128x4xf32> to vector<8x16x4xf32>
    %c0_69 = arith.constant 0 : index
    %c0_70 = arith.constant 0 : index
    %c4_71 = arith.constant 4 : index
    %73 = vector.load %arg6[%c0_69, %c0_70, %c4_71] : memref<8x16x8xf32, #tpu.memory_space<vmem>>, vector<8x16x4xf32>
    %74 = arith.addf %73, %72 : vector<8x16x4xf32>
    %c0_72 = arith.constant 0 : index
    %c0_73 = arith.constant 0 : index
    %c4_74 = arith.constant 4 : index
    %75 = vector.load %arg6[%c0_72, %c0_73, %c4_74] : memref<8x16x8xf32, #tpu.memory_space<vmem>>, vector<8x16x4xf32>
    tpu.vector_store %arg6[%c0_72, %c0_73, %c4_74], %74 {strides = array<i32>} : memref<8x16x8xf32, #tpu.memory_space<vmem>>, vector<8x16x4xf32>,
    %c0_i32_75 = arith.constant 0 : i32
    %76 = arith.addi %1, %c0_i32_75 : i32
    %c1_i32_76 = arith.constant 1 : i32
    %77 = arith.addi %76, %c1_i32_76 : i32
    %c0_77 = arith.constant 0 : index
    %78 = arith.index_cast %77 : i32 to index
    %c1_78 = arith.constant 1 : index
    %c0_79 = arith.constant 0 : index
    %79 = vector.load %arg2[%c0_77, %78, %c1_78, %c0_79] : memref<1x18x18x4xf32, #tpu.memory_space<vmem>>, vector<1x8x16x4xf32>
    %80 = vector.shape_cast %79 : vector<1x8x16x4xf32> to vector<8x16x4xf32>
    %81 = vector.shape_cast %80 : vector<8x16x4xf32> to vector<128x4xf32>
    %c6 = arith.constant 6 : index
    %c0_80 = arith.constant 0 : index
    %c0_81 = arith.constant 0 : index
    %82 = vector.load %arg3[%c6, %c0_80, %c0_81] : memref<16x4x4xf32, #tpu.memory_space<vmem>>, vector<1x4x4xf32>
    %83 = vector.shape_cast %82 : vector<1x4x4xf32> to vector<4x4xf32>
    %cst_82 = arith.constant dense<0.000000e+00> : vector<128x4xf32>
    %84 = tpu.matmul %81, %83, %cst_82 {dimension_numbers = #tpu.dot_dimension_numbers<[1], [0], [0], [1], [0, 0, 1, 1], [], []>} : vector<128x4xf32>, vector<4x4xf32>, vector<128x4xf32> -> vector<128x4xf32>
    %85 = vector.shape_cast %84 : vector<128x4xf32> to vector<8x16x4xf32>
    %c0_83 = arith.constant 0 : index
    %c0_84 = arith.constant 0 : index
    %c4_85 = arith.constant 4 : index
    %86 = vector.load %arg6[%c0_83, %c0_84, %c4_85] : memref<8x16x8xf32, #tpu.memory_space<vmem>>, vector<8x16x4xf32>
    %87 = arith.addf %86, %85 : vector<8x16x4xf32>
    %c0_86 = arith.constant 0 : index
    %c0_87 = arith.constant 0 : index
    %c4_88 = arith.constant 4 : index
    %88 = vector.load %arg6[%c0_86, %c0_87, %c4_88] : memref<8x16x8xf32, #tpu.memory_space<vmem>>, vector<8x16x4xf32>
    tpu.vector_store %arg6[%c0_86, %c0_87, %c4_88], %87 {strides = array<i32>} : memref<8x16x8xf32, #tpu.memory_space<vmem>>, vector<8x16x4xf32>,
    %c0_i32_89 = arith.constant 0 : i32
    %89 = arith.addi %1, %c0_i32_89 : i32
    %c1_i32_90 = arith.constant 1 : i32
    %90 = arith.addi %89, %c1_i32_90 : i32
    %c0_91 = arith.constant 0 : index
    %91 = arith.index_cast %90 : i32 to index
    %c2_92 = arith.constant 2 : index
    %c0_93 = arith.constant 0 : index
    %92 = vector.load %arg2[%c0_91, %91, %c2_92, %c0_93] : memref<1x18x18x4xf32, #tpu.memory_space<vmem>>, vector<1x8x16x4xf32>
    %93 = vector.shape_cast %92 : vector<1x8x16x4xf32> to vector<8x16x4xf32>
    %94 = vector.shape_cast %93 : vector<8x16x4xf32> to vector<128x4xf32>
    %c7 = arith.constant 7 : index
    %c0_94 = arith.constant 0 : index
    %c0_95 = arith.constant 0 : index
    %95 = vector.load %arg3[%c7, %c0_94, %c0_95] : memref<16x4x4xf32, #tpu.memory_space<vmem>>, vector<1x4x4xf32>
    %96 = vector.shape_cast %95 : vector<1x4x4xf32> to vector<4x4xf32>
    %cst_96 = arith.constant dense<0.000000e+00> : vector<128x4xf32>
    %97 = tpu.matmul %94, %96, %cst_96 {dimension_numbers = #tpu.dot_dimension_numbers<[1], [0], [0], [1], [0, 0, 1, 1], [], []>} : vector<128x4xf32>, vector<4x4xf32>, vector<128x4xf32> -> vector<128x4xf32>
    %98 = vector.shape_cast %97 : vector<128x4xf32> to vector<8x16x4xf32>
    %c0_97 = arith.constant 0 : index
    %c0_98 = arith.constant 0 : index
    %c4_99 = arith.constant 4 : index
    %99 = vector.load %arg6[%c0_97, %c0_98, %c4_99] : memref<8x16x8xf32, #tpu.memory_space<vmem>>, vector<8x16x4xf32>
    %100 = arith.addf %99, %98 : vector<8x16x4xf32>
    %c0_100 = arith.constant 0 : index
    %c0_101 = arith.constant 0 : index
    %c4_102 = arith.constant 4 : index
    %101 = vector.load %arg6[%c0_100, %c0_101, %c4_102] : memref<8x16x8xf32, #tpu.memory_space<vmem>>, vector<8x16x4xf32>
    tpu.vector_store %arg6[%c0_100, %c0_101, %c4_102], %100 {strides = array<i32>} : memref<8x16x8xf32, #tpu.memory_space<vmem>>, vector<8x16x4xf32>,
    %c1_i32_103 = arith.constant 1 : i32
    %102 = arith.addi %1, %c1_i32_103 : i32
    %c0_i32_104 = arith.constant 0 : i32
    %103 = arith.addi %102, %c0_i32_104 : i32
    %c0_105 = arith.constant 0 : index
    %104 = arith.index_cast %103 : i32 to index
    %c0_106 = arith.constant 0 : index
    %c0_107 = arith.constant 0 : index
    %105 = vector.load %arg2[%c0_105, %104, %c0_106, %c0_107] : memref<1x18x18x4xf32, #tpu.memory_space<vmem>>, vector<1x8x16x4xf32>
    %106 = vector.shape_cast %105 : vector<1x8x16x4xf32> to vector<8x16x4xf32>
    %107 = vector.shape_cast %106 : vector<8x16x4xf32> to vector<128x4xf32>
    %c8 = arith.constant 8 : index
    %c0_108 = arith.constant 0 : index
    %c0_109 = arith.constant 0 : index
    %108 = vector.load %arg3[%c8, %c0_108, %c0_109] : memref<16x4x4xf32, #tpu.memory_space<vmem>>, vector<1x4x4xf32>
    %109 = vector.shape_cast %108 : vector<1x4x4xf32> to vector<4x4xf32>
    %cst_110 = arith.constant dense<0.000000e+00> : vector<128x4xf32>
    %110 = tpu.matmul %107, %109, %cst_110 {dimension_numbers = #tpu.dot_dimension_numbers<[1], [0], [0], [1], [0, 0, 1, 1], [], []>} : vector<128x4xf32>, vector<4x4xf32>, vector<128x4xf32> -> vector<128x4xf32>
    %111 = vector.shape_cast %110 : vector<128x4xf32> to vector<8x16x4xf32>
    %c0_111 = arith.constant 0 : index
    %c0_112 = arith.constant 0 : index
    %c0_113 = arith.constant 0 : index
    %112 = vector.load %arg7[%c0_111, %c0_112, %c0_113] : memref<8x16x8xf32, #tpu.memory_space<vmem>>, vector<8x16x4xf32>
    tpu.vector_store %arg7[%c0_111, %c0_112, %c0_113], %111 {strides = array<i32>} : memref<8x16x8xf32, #tpu.memory_space<vmem>>, vector<8x16x4xf32>,
    %c1_i32_114 = arith.constant 1 : i32
    %113 = arith.addi %1, %c1_i32_114 : i32
    %c0_i32_115 = arith.constant 0 : i32
    %114 = arith.addi %113, %c0_i32_115 : i32
    %c0_116 = arith.constant 0 : index
    %115 = arith.index_cast %114 : i32 to index
    %c1_117 = arith.constant 1 : index
    %c0_118 = arith.constant 0 : index
    %116 = vector.load %arg2[%c0_116, %115, %c1_117, %c0_118] : memref<1x18x18x4xf32, #tpu.memory_space<vmem>>, vector<1x8x16x4xf32>
    %117 = vector.shape_cast %116 : vector<1x8x16x4xf32> to vector<8x16x4xf32>
    %118 = vector.shape_cast %117 : vector<8x16x4xf32> to vector<128x4xf32>
    %c9 = arith.constant 9 : index
    %c0_119 = arith.constant 0 : index
    %c0_120 = arith.constant 0 : index
    %119 = vector.load %arg3[%c9, %c0_119, %c0_120] : memref<16x4x4xf32, #tpu.memory_space<vmem>>, vector<1x4x4xf32>
    %120 = vector.shape_cast %119 : vector<1x4x4xf32> to vector<4x4xf32>
    %cst_121 = arith.constant dense<0.000000e+00> : vector<128x4xf32>
    %121 = tpu.matmul %118, %120, %cst_121 {dimension_numbers = #tpu.dot_dimension_numbers<[1], [0], [0], [1], [0, 0, 1, 1], [], []>} : vector<128x4xf32>, vector<4x4xf32>, vector<128x4xf32> -> vector<128x4xf32>
    %122 = vector.shape_cast %121 : vector<128x4xf32> to vector<8x16x4xf32>
    %c0_122 = arith.constant 0 : index
    %c0_123 = arith.constant 0 : index
    %c0_124 = arith.constant 0 : index
    %123 = vector.load %arg7[%c0_122, %c0_123, %c0_124] : memref<8x16x8xf32, #tpu.memory_space<vmem>>, vector<8x16x4xf32>
    %124 = arith.addf %123, %122 : vector<8x16x4xf32>
    %c0_125 = arith.constant 0 : index
    %c0_126 = arith.constant 0 : index
    %c0_127 = arith.constant 0 : index
    %125 = vector.load %arg7[%c0_125, %c0_126, %c0_127] : memref<8x16x8xf32, #tpu.memory_space<vmem>>, vector<8x16x4xf32>
    tpu.vector_store %arg7[%c0_125, %c0_126, %c0_127], %124 {strides = array<i32>} : memref<8x16x8xf32, #tpu.memory_space<vmem>>, vector<8x16x4xf32>,
    %c1_i32_128 = arith.constant 1 : i32
    %126 = arith.addi %1, %c1_i32_128 : i32
    %c1_i32_129 = arith.constant 1 : i32
    %127 = arith.addi %126, %c1_i32_129 : i32
    %c0_130 = arith.constant 0 : index
    %128 = arith.index_cast %127 : i32 to index
    %c0_131 = arith.constant 0 : index
    %c0_132 = arith.constant 0 : index
    %129 = vector.load %arg2[%c0_130, %128, %c0_131, %c0_132] : memref<1x18x18x4xf32, #tpu.memory_space<vmem>>, vector<1x8x16x4xf32>
    %130 = vector.shape_cast %129 : vector<1x8x16x4xf32> to vector<8x16x4xf32>
    %131 = vector.shape_cast %130 : vector<8x16x4xf32> to vector<128x4xf32>
    %c10 = arith.constant 10 : index
    %c0_133 = arith.constant 0 : index
    %c0_134 = arith.constant 0 : index
    %132 = vector.load %arg3[%c10, %c0_133, %c0_134] : memref<16x4x4xf32, #tpu.memory_space<vmem>>, vector<1x4x4xf32>
    %133 = vector.shape_cast %132 : vector<1x4x4xf32> to vector<4x4xf32>
    %cst_135 = arith.constant dense<0.000000e+00> : vector<128x4xf32>
    %134 = tpu.matmul %131, %133, %cst_135 {dimension_numbers = #tpu.dot_dimension_numbers<[1], [0], [0], [1], [0, 0, 1, 1], [], []>} : vector<128x4xf32>, vector<4x4xf32>, vector<128x4xf32> -> vector<128x4xf32>
    %135 = vector.shape_cast %134 : vector<128x4xf32> to vector<8x16x4xf32>
    %c0_136 = arith.constant 0 : index
    %c0_137 = arith.constant 0 : index
    %c0_138 = arith.constant 0 : index
    %136 = vector.load %arg7[%c0_136, %c0_137, %c0_138] : memref<8x16x8xf32, #tpu.memory_space<vmem>>, vector<8x16x4xf32>
    %137 = arith.addf %136, %135 : vector<8x16x4xf32>
    %c0_139 = arith.constant 0 : index
    %c0_140 = arith.constant 0 : index
    %c0_141 = arith.constant 0 : index
    %138 = vector.load %arg7[%c0_139, %c0_140, %c0_141] : memref<8x16x8xf32, #tpu.memory_space<vmem>>, vector<8x16x4xf32>
    tpu.vector_store %arg7[%c0_139, %c0_140, %c0_141], %137 {strides = array<i32>} : memref<8x16x8xf32, #tpu.memory_space<vmem>>, vector<8x16x4xf32>,
    %c1_i32_142 = arith.constant 1 : i32
    %139 = arith.addi %1, %c1_i32_142 : i32
    %c1_i32_143 = arith.constant 1 : i32
    %140 = arith.addi %139, %c1_i32_143 : i32
    %c0_144 = arith.constant 0 : index
    %141 = arith.index_cast %140 : i32 to index
    %c1_145 = arith.constant 1 : index
    %c0_146 = arith.constant 0 : index
    %142 = vector.load %arg2[%c0_144, %141, %c1_145, %c0_146] : memref<1x18x18x4xf32, #tpu.memory_space<vmem>>, vector<1x8x16x4xf32>
    %143 = vector.shape_cast %142 : vector<1x8x16x4xf32> to vector<8x16x4xf32>
    %144 = vector.shape_cast %143 : vector<8x16x4xf32> to vector<128x4xf32>
    %c11 = arith.constant 11 : index
    %c0_147 = arith.constant 0 : index
    %c0_148 = arith.constant 0 : index
    %145 = vector.load %arg3[%c11, %c0_147, %c0_148] : memref<16x4x4xf32, #tpu.memory_space<vmem>>, vector<1x4x4xf32>
    %146 = vector.shape_cast %145 : vector<1x4x4xf32> to vector<4x4xf32>
    %cst_149 = arith.constant dense<0.000000e+00> : vector<128x4xf32>
    %147 = tpu.matmul %144, %146, %cst_149 {dimension_numbers = #tpu.dot_dimension_numbers<[1], [0], [0], [1], [0, 0, 1, 1], [], []>} : vector<128x4xf32>, vector<4x4xf32>, vector<128x4xf32> -> vector<128x4xf32>
    %148 = vector.shape_cast %147 : vector<128x4xf32> to vector<8x16x4xf32>
    %c0_150 = arith.constant 0 : index
    %c0_151 = arith.constant 0 : index
    %c0_152 = arith.constant 0 : index
    %149 = vector.load %arg7[%c0_150, %c0_151, %c0_152] : memref<8x16x8xf32, #tpu.memory_space<vmem>>, vector<8x16x4xf32>
    %150 = arith.addf %149, %148 : vector<8x16x4xf32>
    %c0_153 = arith.constant 0 : index
    %c0_154 = arith.constant 0 : index
    %c0_155 = arith.constant 0 : index
    %151 = vector.load %arg7[%c0_153, %c0_154, %c0_155] : memref<8x16x8xf32, #tpu.memory_space<vmem>>, vector<8x16x4xf32>
    tpu.vector_store %arg7[%c0_153, %c0_154, %c0_155], %150 {strides = array<i32>} : memref<8x16x8xf32, #tpu.memory_space<vmem>>, vector<8x16x4xf32>,
    %c1_i32_156 = arith.constant 1 : i32
    %152 = arith.addi %1, %c1_i32_156 : i32
    %c0_i32_157 = arith.constant 0 : i32
    %153 = arith.addi %152, %c0_i32_157 : i32
    %c0_158 = arith.constant 0 : index
    %154 = arith.index_cast %153 : i32 to index
    %c1_159 = arith.constant 1 : index
    %c0_160 = arith.constant 0 : index
    %155 = vector.load %arg2[%c0_158, %154, %c1_159, %c0_160] : memref<1x18x18x4xf32, #tpu.memory_space<vmem>>, vector<1x8x16x4xf32>
    %156 = vector.shape_cast %155 : vector<1x8x16x4xf32> to vector<8x16x4xf32>
    %157 = vector.shape_cast %156 : vector<8x16x4xf32> to vector<128x4xf32>
    %c12 = arith.constant 12 : index
    %c0_161 = arith.constant 0 : index
    %c0_162 = arith.constant 0 : index
    %158 = vector.load %arg3[%c12, %c0_161, %c0_162] : memref<16x4x4xf32, #tpu.memory_space<vmem>>, vector<1x4x4xf32>
    %159 = vector.shape_cast %158 : vector<1x4x4xf32> to vector<4x4xf32>
    %cst_163 = arith.constant dense<0.000000e+00> : vector<128x4xf32>
    %160 = tpu.matmul %157, %159, %cst_163 {dimension_numbers = #tpu.dot_dimension_numbers<[1], [0], [0], [1], [0, 0, 1, 1], [], []>} : vector<128x4xf32>, vector<4x4xf32>, vector<128x4xf32> -> vector<128x4xf32>
    %161 = vector.shape_cast %160 : vector<128x4xf32> to vector<8x16x4xf32>
    %c0_164 = arith.constant 0 : index
    %c0_165 = arith.constant 0 : index
    %c4_166 = arith.constant 4 : index
    %162 = vector.load %arg7[%c0_164, %c0_165, %c4_166] : memref<8x16x8xf32, #tpu.memory_space<vmem>>, vector<8x16x4xf32>
    tpu.vector_store %arg7[%c0_164, %c0_165, %c4_166], %161 {strides = array<i32>} : memref<8x16x8xf32, #tpu.memory_space<vmem>>, vector<8x16x4xf32>,
    %c1_i32_167 = arith.constant 1 : i32
    %163 = arith.addi %1, %c1_i32_167 : i32
    %c0_i32_168 = arith.constant 0 : i32
    %164 = arith.addi %163, %c0_i32_168 : i32
    %c0_169 = arith.constant 0 : index
    %165 = arith.index_cast %164 : i32 to index
    %c2_170 = arith.constant 2 : index
    %c0_171 = arith.constant 0 : index
    %166 = vector.load %arg2[%c0_169, %165, %c2_170, %c0_171] : memref<1x18x18x4xf32, #tpu.memory_space<vmem>>, vector<1x8x16x4xf32>
    %167 = vector.shape_cast %166 : vector<1x8x16x4xf32> to vector<8x16x4xf32>
    %168 = vector.shape_cast %167 : vector<8x16x4xf32> to vector<128x4xf32>
    %c13 = arith.constant 13 : index
    %c0_172 = arith.constant 0 : index
    %c0_173 = arith.constant 0 : index
    %169 = vector.load %arg3[%c13, %c0_172, %c0_173] : memref<16x4x4xf32, #tpu.memory_space<vmem>>, vector<1x4x4xf32>
    %170 = vector.shape_cast %169 : vector<1x4x4xf32> to vector<4x4xf32>
    %cst_174 = arith.constant dense<0.000000e+00> : vector<128x4xf32>
    %171 = tpu.matmul %168, %170, %cst_174 {dimension_numbers = #tpu.dot_dimension_numbers<[1], [0], [0], [1], [0, 0, 1, 1], [], []>} : vector<128x4xf32>, vector<4x4xf32>, vector<128x4xf32> -> vector<128x4xf32>
    %172 = vector.shape_cast %171 : vector<128x4xf32> to vector<8x16x4xf32>
    %c0_175 = arith.constant 0 : index
    %c0_176 = arith.constant 0 : index
    %c4_177 = arith.constant 4 : index
    %173 = vector.load %arg7[%c0_175, %c0_176, %c4_177] : memref<8x16x8xf32, #tpu.memory_space<vmem>>, vector<8x16x4xf32>
    %174 = arith.addf %173, %172 : vector<8x16x4xf32>
    %c0_178 = arith.constant 0 : index
    %c0_179 = arith.constant 0 : index
    %c4_180 = arith.constant 4 : index
    %175 = vector.load %arg7[%c0_178, %c0_179, %c4_180] : memref<8x16x8xf32, #tpu.memory_space<vmem>>, vector<8x16x4xf32>
    tpu.vector_store %arg7[%c0_178, %c0_179, %c4_180], %174 {strides = array<i32>} : memref<8x16x8xf32, #tpu.memory_space<vmem>>, vector<8x16x4xf32>,
    %c1_i32_181 = arith.constant 1 : i32
    %176 = arith.addi %1, %c1_i32_181 : i32
    %c1_i32_182 = arith.constant 1 : i32
    %177 = arith.addi %176, %c1_i32_182 : i32
    %c0_183 = arith.constant 0 : index
    %178 = arith.index_cast %177 : i32 to index
    %c1_184 = arith.constant 1 : index
    %c0_185 = arith.constant 0 : index
    %179 = vector.load %arg2[%c0_183, %178, %c1_184, %c0_185] : memref<1x18x18x4xf32, #tpu.memory_space<vmem>>, vector<1x8x16x4xf32>
    %180 = vector.shape_cast %179 : vector<1x8x16x4xf32> to vector<8x16x4xf32>
    %181 = vector.shape_cast %180 : vector<8x16x4xf32> to vector<128x4xf32>
    %c14 = arith.constant 14 : index
    %c0_186 = arith.constant 0 : index
    %c0_187 = arith.constant 0 : index
    %182 = vector.load %arg3[%c14, %c0_186, %c0_187] : memref<16x4x4xf32, #tpu.memory_space<vmem>>, vector<1x4x4xf32>
    %183 = vector.shape_cast %182 : vector<1x4x4xf32> to vector<4x4xf32>
    %cst_188 = arith.constant dense<0.000000e+00> : vector<128x4xf32>
    %184 = tpu.matmul %181, %183, %cst_188 {dimension_numbers = #tpu.dot_dimension_numbers<[1], [0], [0], [1], [0, 0, 1, 1], [], []>} : vector<128x4xf32>, vector<4x4xf32>, vector<128x4xf32> -> vector<128x4xf32>
    %185 = vector.shape_cast %184 : vector<128x4xf32> to vector<8x16x4xf32>
    %c0_189 = arith.constant 0 : index
    %c0_190 = arith.constant 0 : index
    %c4_191 = arith.constant 4 : index
    %186 = vector.load %arg7[%c0_189, %c0_190, %c4_191] : memref<8x16x8xf32, #tpu.memory_space<vmem>>, vector<8x16x4xf32>
    %187 = arith.addf %186, %185 : vector<8x16x4xf32>
    %c0_192 = arith.constant 0 : index
    %c0_193 = arith.constant 0 : index
    %c4_194 = arith.constant 4 : index
    %188 = vector.load %arg7[%c0_192, %c0_193, %c4_194] : memref<8x16x8xf32, #tpu.memory_space<vmem>>, vector<8x16x4xf32>
    tpu.vector_store %arg7[%c0_192, %c0_193, %c4_194], %187 {strides = array<i32>} : memref<8x16x8xf32, #tpu.memory_space<vmem>>, vector<8x16x4xf32>,
    %c1_i32_195 = arith.constant 1 : i32
    %189 = arith.addi %1, %c1_i32_195 : i32
    %c1_i32_196 = arith.constant 1 : i32
    %190 = arith.addi %189, %c1_i32_196 : i32
    %c0_197 = arith.constant 0 : index
    %191 = arith.index_cast %190 : i32 to index
    %c2_198 = arith.constant 2 : index
    %c0_199 = arith.constant 0 : index
    %192 = vector.load %arg2[%c0_197, %191, %c2_198, %c0_199] : memref<1x18x18x4xf32, #tpu.memory_space<vmem>>, vector<1x8x16x4xf32>
    %193 = vector.shape_cast %192 : vector<1x8x16x4xf32> to vector<8x16x4xf32>
    %194 = vector.shape_cast %193 : vector<8x16x4xf32> to vector<128x4xf32>
    %c15 = arith.constant 15 : index
    %c0_200 = arith.constant 0 : index
    %c0_201 = arith.constant 0 : index
    %195 = vector.load %arg3[%c15, %c0_200, %c0_201] : memref<16x4x4xf32, #tpu.memory_space<vmem>>, vector<1x4x4xf32>
    %196 = vector.shape_cast %195 : vector<1x4x4xf32> to vector<4x4xf32>
    %cst_202 = arith.constant dense<0.000000e+00> : vector<128x4xf32>
    %197 = tpu.matmul %194, %196, %cst_202 {dimension_numbers = #tpu.dot_dimension_numbers<[1], [0], [0], [1], [0, 0, 1, 1], [], []>} : vector<128x4xf32>, vector<4x4xf32>, vector<128x4xf32> -> vector<128x4xf32>
    %198 = vector.shape_cast %197 : vector<128x4xf32> to vector<8x16x4xf32>
    %c0_203 = arith.constant 0 : index
    %c0_204 = arith.constant 0 : index
    %c4_205 = arith.constant 4 : index
    %199 = vector.load %arg7[%c0_203, %c0_204, %c4_205] : memref<8x16x8xf32, #tpu.memory_space<vmem>>, vector<8x16x4xf32>
    %200 = arith.addf %199, %198 : vector<8x16x4xf32>
    %c0_206 = arith.constant 0 : index
    %c0_207 = arith.constant 0 : index
    %c4_208 = arith.constant 4 : index
    %201 = vector.load %arg7[%c0_206, %c0_207, %c4_208] : memref<8x16x8xf32, #tpu.memory_space<vmem>>, vector<8x16x4xf32>
    tpu.vector_store %arg7[%c0_206, %c0_207, %c4_208], %200 {strides = array<i32>} : memref<8x16x8xf32, #tpu.memory_space<vmem>>, vector<8x16x4xf32>,
    %c0_209 = arith.constant 0 : index
    %c0_210 = arith.constant 0 : index
    %c0_211 = arith.constant 0 : index
    %202 = vector.load %arg6[%c0_209, %c0_210, %c0_211] : memref<8x16x8xf32, #tpu.memory_space<vmem>>, vector<8x16x8xf32>
    %c0_212 = arith.constant 0 : index
    %c0_213 = arith.constant 0 : index
    %c0_214 = arith.constant 0 : index
    %203 = vector.load %arg7[%c0_212, %c0_213, %c0_214] : memref<8x16x8xf32, #tpu.memory_space<vmem>>, vector<8x16x8xf32>
    %204 = vector.shape_cast %202 : vector<8x16x8xf32> to vector<8x1x16x8xf32>
    %205 = vector.shape_cast %203 : vector<8x16x8xf32> to vector<8x1x16x8xf32>
    %206 = tpu.concatenate %204, %205 in 1 : vector<8x1x16x8xf32>, vector<8x1x16x8xf32> -> vector<8x2x16x8xf32>
    %c0_215 = arith.constant 0 : index
    %c0_216 = arith.constant 0 : index
    %207 = vector.load %arg4[%c0_215, %c0_216] : memref<1x8xf32, #tpu.memory_space<vmem>>, vector<1x8xf32>
    %208 = vector.shape_cast %207 : vector<1x8xf32> to vector<1x1x1x8xf32>
    %209 = vector.broadcast %208 : vector<1x1x1x8xf32> to vector<8x2x16x8xf32>
    %210 = arith.addf %206, %209 : vector<8x2x16x8xf32>
    %c0_217 = arith.constant 0 : index
    %c0_218 = arith.constant 0 : index
    %c0_219 = arith.constant 0 : index
    %c0_220 = arith.constant 0 : index
    %c0_221 = arith.constant 0 : index
    %211 = vector.load %arg5[%c0_217, %c0_218, %c0_219, %c0_220, %c0_221] : memref<1x8x2x16x8xf32, #tpu.memory_space<vmem>>, vector<1x8x2x16x8xf32>
    %212 = vector.shape_cast %211 : vector<1x8x2x16x8xf32> to vector<8x2x16x8xf32>
    %213 = vector.shape_cast %210 : vector<8x2x16x8xf32> to vector<1x8x2x16x8xf32>
    tpu.vector_store %arg5[%c0_217, %c0_218, %c0_219, %c0_220, %c0_221], %213 {strides = array<i32>} : memref<1x8x2x16x8xf32, #tpu.memory_space<vmem>>, vector<1x8x2x16x8xf32>,
    return
  }
  func.func @transform_0(%arg0: i32, %arg1: i32) -> (i32, i32, i32, i32) {
    %c0_i32 = arith.constant 0 : i32
    %c0_i32_0 = arith.constant 0 : i32
    %c0_i32_1 = arith.constant 0 : i32
    %c0_i32_2 = arith.constant 0 : i32
    return %arg0, %c0_i32, %c0_i32_0, %c0_i32_1 : i32, i32, i32, i32
  }
  func.func @transform_1(%arg0: i32, %arg1: i32) -> (i32, i32, i32) {
    %c0_i32 = arith.constant 0 : i32
    %c0_i32_0 = arith.constant 0 : i32
    %c0_i32_1 = arith.constant 0 : i32
    %c0_i32_2 = arith.constant 0 : i32
    return %c0_i32, %c0_i32_0, %c0_i32_1 : i32, i32, i32
  }
  func.func @transform_2(%arg0: i32, %arg1: i32) -> (i32, i32) {
    %c0_i32 = arith.constant 0 : i32
    %c0_i32_0 = arith.constant 0 : i32
    %c0_i32_1 = arith.constant 0 : i32
    return %c0_i32, %c0_i32_0 : i32, i32
  }
  func.func @transform_3(%arg0: i32, %arg1: i32) -> (i32, i32, i32, i32, i32) {
    %c0_i32 = arith.constant 0 : i32
    %c0_i32_0 = arith.constant 0 : i32
    %c0_i32_1 = arith.constant 0 : i32
    %c0_i32_2 = arith.constant 0 : i32
    return %arg0, %arg1, %c0_i32, %c0_i32_0, %c0_i32_1 : i32, i32, i32, i32, i32
  }
}

</mosaic_0001>

<bundles_post_ra>
// kernel: tpu_custom_call.1
= control target key start
LH: loop header
LB: loop body
LE: loop exit
PB: predicated region body
PF: predicated region fallthrough
CT: control target
= control target key end

     0   :  { %s4306_s12 = smov 0   ;;  %s4308_s13 = smov 0   ;;  %s5750_s0 = inlined_call_operand.vmem [shape: f32[6,18,18,4], index: 0, kind: input, shape index: {}]   ;;  %s5751_s1 = inlined_call_operand.vmem [shape: f32[16,4,4], index: 1, kind: input, shape index: {}]   ;;  %s5752_s2 = inlined_call_operand.vmem [shape: f32[1,8], index: 2, kind: input, shape index: {}]   ;;  %s5753_s3 = inlined_call_operand.vmem [shape: f32[6,16,2,16,8], index: 3, kind: output, shape index: {}]  }
   0x1   :  { %s4310_s14 = smov 0   ;;  %s4312_s15 = smov 0  }
   0x2   :  { %s4314_s16 = smov 0  }
   0x3 LB: > { %s22_s17 = sadd.s32 1, %s4275_s14  ;;  %s25_s18 = sadd.s32 1, %s4279_s15  ;;  %s4283_s16 = sphi %s4314_s16, %s13_s16   ;;  %s4279_s15 = sphi %s4312_s15, %s5758_s15   ;;  %s4275_s14 = sphi %s4310_s14, %s5757_s14   ;;  %s4271_s13 = sphi %s4308_s13, %s5756_s13   ;;  %s4267_s12 = sphi %s4306_s12, %s5755_s12  }
   0x4   : > { %p23_p0 = scmp.ge.s32.totalorder %s22_s17, 2  ;;  %p3708_p1 = scmp.ge.s32.totalorder %s4283_s16, 1 }
   0x5   : > { %p151_p2 = scmp.lt.s32.totalorder %s4283_s16, 13 }
   0x6   : > { %s5760_s17 = smov (%p23_p0, %s22_s17), 0  ;;  %s5762_s18 = smov (!%p23_p0, %s25_s18), %s4279_s15 }
   0x7   : > { %p152_p3 = pnand %p3708_p1, %p151_p2  ;;  %p27_p4 = scmp.ge.s32.totalorder %s5762_s18, 6 }
   0x8   : > { %p180_p5 = scmp.lt.s32.totalorder (!%p152_p3), %s4271_s13, 5  ;;  %s3715_s27 = smul.u32 (!%p152_p3), 192, %s4267_s12 }
   0x9   : > { %s5764_s18 = smov (%p27_p4, %s5762_s18), 0  ;;  %155 = sbr.rel (%p152_p3) target bundleno = 828 (0x33c), region = 32 }
   0xa   : > { %s4285_s10 = smov (!%p152_p3), 4   ;;  %s3710_s11 = sshll.u32 (!%p152_p3), %s4267_s12, 3 }
   0xb   : > { %p5050_p6 = scmp.lt.s32.totalorder (!%p152_p3), %s3710_s11, 15 }
   0xe   : > { %v215_v0 = vld [vmem:[%s5751_s1] sm:$0xf]  ;;  %vm265_vm0 = vcmask 1043456   ;;  %v3733_v1 = vld [vmem:[%s5751_s1 + $0x4] sm:$0xf]  ;;  %s5766_s13 = smov (!%p180_p5, %s4271_s13), 5 }
   0xf   : > { %3716 = vmatpush.msk.msra.mxu0 %vm265_vm0, %v215_v0  ;;  %3734 = vmatpush.msk.msra.mxu1 %vm265_vm0, %v3733_v1  ;;  %v3769_v2 = vld [vmem:[%s5751_s1 + $0x8] sm:$0xf]  ;;  %v3803_v3 = vld [vmem:[%s5751_s1 + $0xc] sm:$0xf]  ;;  %v3821_v4 = vld [vmem:[%s5751_s1 + $0x10] sm:$0xf] }
  0x10   : > { %3770 = vmatpush.msk.msra.mxu2 %vm265_vm0, %v3769_v2  ;;  %3804 = vmatpush.msk.msra.mxu3 %vm265_vm0, %v3803_v3  ;;  %v3873_v5 = vld [vmem:[%s5751_s1 + $0x18] sm:$0xf]  ;;  %v3907_v6 = vld [vmem:[%s5751_s1 + $0x1c] sm:$0xf]  ;;  %v3839_v7 = vld [vmem:[%s5751_s1 + $0x14] sm:$0xf] }
  0x11   : > { %3822 = vmatpush.msk.msrb.mxu0 %vm265_vm0, %v3821_v4  ;;  %s4201_s9 = smul.u32 432, %s5766_s13  ;;  %3840 = vmatpush.msk.msrb.mxu1 %vm265_vm0, %v3839_v7  ;;  %vm216_vm1 = vcmask 31744   ;;  %v3941_v40 = vld [vmem:[%s5751_s1 + $0x20] sm:$0xf]  ;;  %v4011_v41 = vld [vmem:[%s5751_s1 + $0x28] sm:$0xf] }
  0x12   : > { %3874 = vmatpush.msk.msrb.mxu2 %vm265_vm0, %v3873_v5  ;;  %3908 = vmatpush.msk.msrb.mxu3 %vm265_vm0, %v3907_v6  ;;  %v4045_v42 = vld [vmem:[%s5751_s1 + $0x2c] sm:$0xf]  ;;  %v3975_v47 = vld [vmem:[%s5751_s1 + $0x24] sm:$0xf]  ;;  %vm1097_vm2 = vcmask 64544   ;;  %s5768_s11 = smov (!%p5050_p6, %s3710_s11), 15 }
  0x13   : > { %s184_s19 = scalar_lea.vmem %s5750_s0, %s4201_s9  ;;  %s3711_s12 = sshll.u32 %s5768_s11, 2  ;;  %vm3571_vm3 = vcmask 64512  }
  0x14   : > { %s4377_s20 = scalar_lea.vmem %s184_s19, %s3715_s27  ;;  %s3712_s21 = sshll.u32 %s5766_s13, 6 }
  0x15   : > { %v199_v8 = vld [vmem:[%s4377_s20] sm:$0xff]  ;;  %v4384_v10 = vld [vmem:[%s4377_s20 + $0x18] sm:$0xff]  ;;  %v200_v12 = vld [vmem:[%s4377_s20 + $0x8] sm:$0xff]  ;;  %s192_s13 = sadd.s32 %s3712_s21, %s3711_s12 }
  0x16   : > { %v4381_v9 = vld [vmem:[%s4377_s20 + $0x1] sm:$0xff]  ;;  %3717 = vmatmul.msk.f32.vlgmr.msra.gmra.mxu0 %vm216_vm1, %v199_v8  ;;  %v4390_v11 = vld [vmem:[%s4377_s20 + $0x19] sm:$0xff]  ;;  %3771 = vmatmul.msk.f32.vlgmr.msra.gmra.mxu2 %vm216_vm1, %v4384_v10  ;;  %v4398_v13 = vld [vmem:[%s4377_s20 + $0x9] sm:$0xff]  ;;  %s3713_s22 = sshll.u32 %s192_s13, 3 }
  0x17   : > { %3735 = vmatmul.msk.f32.vlgmr.msra.gmra.mxu1 %vm216_vm1, %v4381_v9  ;;  %3805 = vmatmul.msk.f32.vlgmr.msra.gmra.mxu3 %vm216_vm1, %v4390_v11  ;;  %v4401_v14 = vld [vmem:[%s4377_s20 + $0x20] sm:$0xff]  ;;  %v4414_v16 = vld [vmem:[%s4377_s20 + $0x30] sm:$0xff]  ;;  %v4428_v18 = vld [vmem:[%s4377_s20 + $0x38] sm:$0xff]  ;;  %s5122_s27 = scalar_lea.vmem %s5753_s3, %s3713_s22 }
  0x18   : > { %v4404_v15 = vld [vmem:[%s4377_s20 + $0x21] sm:$0xff]  ;;  %v4417_v17 = vld [vmem:[%s4377_s20 + $0x31] sm:$0xff]  ;;  %v4431_v19 = vld [vmem:[%s4377_s20 + $0x39] sm:$0xff]  ;;  %3942 = vmatpush.msk.msra.mxu0 %vm265_vm0, %v3941_v40  ;;  %4012 = vmatpush.msk.msra.mxu2 %vm265_vm0, %v4011_v41 }
  0x19   : > { %v4442_v20 = vld [vmem:[%s4377_s20 + $0x48] sm:$0xff]  ;;  %v4456_v22 = vld [vmem:[%s4377_s20 + $0x50] sm:$0xff]  ;;  %v4470_v24 = vld [vmem:[%s4377_s20 + $0x60] sm:$0xff]  ;;  %4046 = vmatpush.msk.msra.mxu3 %vm265_vm0, %v4045_v42  ;;  %3976 = vmatpush.msk.msra.mxu1 %vm265_vm0, %v3975_v47 }
  0x1a   : > { %v4445_v21 = vld [vmem:[%s4377_s20 + $0x49] sm:$0xff]  ;;  %v4459_v23 = vld [vmem:[%s4377_s20 + $0x51] sm:$0xff]  ;;  %v4473_v25 = vld [vmem:[%s4377_s20 + $0x61] sm:$0xff] }
  0x1b   : > { %v3760_v26 = vld [vmem:[%s4377_s20 + $0x68] sm:$0xff]  ;;  %v3761_v28 = vld [vmem:[%s4377_s20 + $0x78] sm:$0xff]  ;;  %v3762_v30 = vld [vmem:[%s4377_s20 + $0x80] sm:$0xff] }
  0x1c   : > { %v4485_v27 = vld [vmem:[%s4377_s20 + $0x69] sm:$0xff]  ;;  %v4496_v29 = vld [vmem:[%s4377_s20 + $0x79] sm:$0xff]  ;;  %v4507_v31 = vld [vmem:[%s4377_s20 + $0x81] sm:$0xff] }
  0x1d   : > { %v3763_v32 = vld [vmem:[%s4377_s20 + $0x90] sm:$0xff]  ;;  %v3764_v34 = vld [vmem:[%s4377_s20 + $0x98] sm:$0xff]  ;;  %v3765_v36 = vld [vmem:[%s4377_s20 + $0xa8] sm:$0xff] }
  0x1e   : > { %3718 = vmatmul.msk.f32.gmra.mxu0 %vm216_vm1, %v200_v12  ;;  %3772 = vmatmul.msk.f32.gmra.mxu2 %vm216_vm1, %v4401_v14  ;;  %v4517_v33 = vld [vmem:[%s4377_s20 + $0x91] sm:$0xff]  ;;  %v4527_v35 = vld [vmem:[%s4377_s20 + $0x99] sm:$0xff]  ;;  %v4537_v37 = vld [vmem:[%s4377_s20 + $0xa9] sm:$0xff] }
  0x1f   : > { %3736 = vmatmul.msk.f32.gmra.mxu1 %vm216_vm1, %v4398_v13  ;;  %3806 = vmatmul.msk.f32.gmra.mxu3 %vm216_vm1, %v4404_v15  ;;  %v3766_v38 = vld [vmem:[%s4377_s20 + $0xb0] sm:$0xff]  ;;  %v3767_v43 = vld [vmem:[%s4377_s20 + $0xc0] sm:$0xff]  ;;  %v3768_v45 = vld [vmem:[%s4377_s20 + $0xc8] sm:$0xff] }
  0x20   : > { %v4547_v39 = vld [vmem:[%s4377_s20 + $0xb1] sm:$0xff]  ;;  %v4569_v44 = vld [vmem:[%s4377_s20 + $0xc1] sm:$0xff]  ;;  %v4579_v46 = vld [vmem:[%s4377_s20 + $0xc9] sm:$0xff] }
  0x21   : > { %v1114_v50 = vld [vmem:[%s4377_s20 + $0x2] sm:$0xff]  ;;  %v3891_v51 = vld [vmem:[%s4377_s20 + $0x1a] sm:$0xff]  ;;  %v1115_v57 = vld [vmem:[%s4377_s20 + $0xa] sm:$0xff] }
  0x22   : > { %v3892_v59 = vld [vmem:[%s4377_s20 + $0x22] sm:$0xff]  ;;  %v3893_v2 = vld [vmem:[%s4377_s20 + $0x32] sm:$0xff] }
  0x26   : > { %3719 = vmatmul.msk.f32.gmra.mxu0 %vm216_vm1, %v4384_v10  ;;  %3773 = vmatmul.msk.f32.gmra.mxu2 %vm216_vm1, %v4414_v16 }
  0x27   : > { %3737 = vmatmul.msk.f32.gmra.mxu1 %vm216_vm1, %v4390_v11  ;;  %3807 = vmatmul.msk.f32.gmra.mxu3 %vm216_vm1, %v4417_v17 }
  0x2e   : > { %3720 = vmatmul.msk.f32.gmra.mxu0 %vm216_vm1, %v4401_v14  ;;  %3774 = vmatmul.msk.f32.gmra.mxu2 %vm216_vm1, %v4428_v18 }
  0x2f   : > { %3738 = vmatmul.msk.f32.gmra.mxu1 %vm216_vm1, %v4404_v15  ;;  %3808 = vmatmul.msk.f32.gmra.mxu3 %vm216_vm1, %v4431_v19 }
  0x36   : > { %3721 = vmatmul.msk.f32.gmra.mxu0 %vm216_vm1, %v4414_v16  ;;  %3775 = vmatmul.msk.f32.gmra.mxu2 %vm216_vm1, %v4442_v20 }
  0x37   : > { %3739 = vmatmul.msk.f32.gmra.mxu1 %vm216_vm1, %v4417_v17  ;;  %3809 = vmatmul.msk.f32.gmra.mxu3 %vm216_vm1, %v4445_v21 }
  0x3e   : > { %3722 = vmatmul.msk.f32.gmra.mxu0 %vm216_vm1, %v4428_v18  ;;  %3776 = vmatmul.msk.f32.gmra.mxu2 %vm216_vm1, %v4456_v22 }
  0x3f   : > { %3740 = vmatmul.msk.f32.gmra.mxu1 %vm216_vm1, %v4431_v19  ;;  %3810 = vmatmul.msk.f32.gmra.mxu3 %vm216_vm1, %v4459_v23 }
  0x46   : > { %3723 = vmatmul.msk.f32.gmra.mxu0 %vm216_vm1, %v4442_v20  ;;  %3777 = vmatmul.msk.f32.gmra.mxu2 %vm216_vm1, %v4470_v24 }
  0x47   : > { %3741 = vmatmul.msk.f32.gmra.mxu1 %vm216_vm1, %v4445_v21  ;;  %3811 = vmatmul.msk.f32.gmra.mxu3 %vm216_vm1, %v4473_v25 }
  0x4e   : > { %3724 = vmatmul.msk.f32.gmra.mxu0 %vm216_vm1, %v4456_v22  ;;  %3778 = vmatmul.msk.f32.gmra.mxu2 %vm216_vm1, %v3760_v26 }
  0x4f   : > { %3742 = vmatmul.msk.f32.gmra.mxu1 %vm216_vm1, %v4459_v23  ;;  %3812 = vmatmul.msk.f32.gmra.mxu3 %vm216_vm1, %v4485_v27 }
  0x56   : > { %3725 = vmatmul.msk.f32.gmra.mxu0 %vm216_vm1, %v4470_v24  ;;  %3779 = vmatmul.msk.f32.gmra.mxu2 %vm216_vm1, %v3761_v28 }
  0x57   : > { %3743 = vmatmul.msk.f32.gmra.mxu1 %vm216_vm1, %v4473_v25  ;;  %3813 = vmatmul.msk.f32.gmra.mxu3 %vm216_vm1, %v4496_v29 }
  0x5e   : > { %3726 = vmatmul.msk.f32.gmra.mxu0 %vm216_vm1, %v3760_v26  ;;  %3780 = vmatmul.msk.f32.gmra.mxu2 %vm216_vm1, %v3762_v30 }
  0x5f   : > { %3744 = vmatmul.msk.f32.gmra.mxu1 %vm216_vm1, %v4485_v27  ;;  %3814 = vmatmul.msk.f32.gmra.mxu3 %vm216_vm1, %v4507_v31 }
  0x66   : > { %3727 = vmatmul.msk.f32.gmra.mxu0 %vm216_vm1, %v3761_v28  ;;  %3781 = vmatmul.msk.f32.gmra.mxu2 %vm216_vm1, %v3763_v32 }
  0x67   : > { %3745 = vmatmul.msk.f32.gmra.mxu1 %vm216_vm1, %v4496_v29  ;;  %3815 = vmatmul.msk.f32.gmra.mxu3 %vm216_vm1, %v4517_v33 }
  0x6e   : > { %3728 = vmatmul.msk.f32.gmra.mxu0 %vm216_vm1, %v3762_v30  ;;  %3782 = vmatmul.msk.f32.gmra.mxu2 %vm216_vm1, %v3764_v34 }
  0x6f   : > { %3746 = vmatmul.msk.f32.gmra.mxu1 %vm216_vm1, %v4507_v31  ;;  %3816 = vmatmul.msk.f32.gmra.mxu3 %vm216_vm1, %v4527_v35 }
  0x76   : > { %3729 = vmatmul.msk.f32.gmra.mxu0 %vm216_vm1, %v3763_v32  ;;  %3783 = vmatmul.msk.f32.gmra.mxu2 %vm216_vm1, %v3765_v36 }
  0x77   : > { %3747 = vmatmul.msk.f32.gmra.mxu1 %vm216_vm1, %v4517_v33  ;;  %3817 = vmatmul.msk.f32.gmra.mxu3 %vm216_vm1, %v4537_v37 }
  0x7e   : > { %3730 = vmatmul.msk.f32.gmra.mxu0 %vm216_vm1, %v3764_v34  ;;  %3784 = vmatmul.msk.f32.gmra.mxu2 %vm216_vm1, %v3766_v38 }
  0x7f   : > { %3748 = vmatmul.msk.f32.gmra.mxu1 %vm216_vm1, %v4527_v35  ;;  %3818 = vmatmul.msk.f32.gmra.mxu3 %vm216_vm1, %v4547_v39 }
  0x86   : > { %3731 = vmatmul.msk.f32.gmra.mxu0 %vm216_vm1, %v3765_v36  ;;  %3785 = vmatmul.msk.f32.gmra.mxu2 %vm216_vm1, %v3767_v43  ;;  %v3895_v43 = vld [vmem:[%s4377_s20 + $0x4a] sm:$0xff] }
  0x87   : > { %3749 = vmatmul.msk.f32.gmra.mxu1 %vm216_vm1, %v4537_v37  ;;  %3819 = vmatmul.msk.f32.gmra.mxu3 %vm216_vm1, %v4569_v44 }
  0x8e   : > { %3732 = vmatmul.msk.f32.gmra.mxu0 %vm216_vm1, %v3766_v38  ;;  %3786 = vmatmul.msk.f32.gmra.mxu2 %vm216_vm1, %v3768_v45 }
  0x8f   : > { %3750 = vmatmul.msk.f32.gmra.mxu1 %vm216_vm1, %v4547_v39  ;;  %3820 = vmatmul.msk.f32.gmra.mxu3 %vm216_vm1, %v4579_v46 }
  0x93   : > { %v286_v48 = vpop.f32.mrf.mxu0 }
  0x94   : > { %v436_v49 = vpop.f32.mrf.mxu1  ;;  %334 = vst.msk [vmem:[#allocation2] sm:$0xff] %vm216_vm1, %v286_v48 }
  0x96   : > { %3823 = vmatmul.msk.f32.vlgmr.msrb.gmra.mxu0 %vm216_vm1, %v4381_v9  ;;  %3875 = vmatmul.msk.f32.vlgmr.msrb.gmra.mxu2 %vm216_vm1, %v4390_v11 }
  0x97   : > { %3841 = vmatmul.msk.f32.vlgmr.msrb.gmra.mxu1 %vm216_vm1, %v1114_v50  ;;  %3909 = vmatmul.msk.f32.vlgmr.msrb.gmra.mxu3 %vm216_vm1, %v3891_v51 }
  0x99   : > { %v621_v52 = vpop.f32.mrf.mxu2 }
  0x9a   : > { %v803_v53 = vpop.f32.mrf.mxu3 }
  0x9b   : > { %v484_v54 = vld [vmem:[#allocation2] sm:$0xff]  ;;  %v289_v55 = vpop.f32.mrf.mxu0 }
  0x9c   : > { %v439_v56 = vpop.f32.mrf.mxu1  ;;  %v500_v58 = vadd.f32 %v484_v54, %v436_v49  ;;  %335 = vst.msk [vmem:[#allocation2 + $0x8] sm:$0xff] %vm216_vm1, %v289_v55 }
  0x9e   : > { %516 = vst.msk [vmem:[#allocation2] sm:$0xff] %vm216_vm1, %v500_v58  ;;  %3824 = vmatmul.msk.f32.gmra.mxu0 %vm216_vm1, %v4398_v13  ;;  %3876 = vmatmul.msk.f32.gmra.mxu2 %vm216_vm1, %v4404_v15  ;;  %v3894_v13 = vld [vmem:[%s4377_s20 + $0x3a] sm:$0xff] }
  0x9f   : > { %3842 = vmatmul.msk.f32.gmra.mxu1 %vm216_vm1, %v1115_v57  ;;  %3910 = vmatmul.msk.f32.gmra.mxu3 %vm216_vm1, %v3892_v59 }
  0xa1   : > { %v624_v60 = vpop.f32.mrf.mxu2 }
  0xa2   : > { %v806_v61 = vpop.f32.mrf.mxu3 }
  0xa3   : > { %v485_v62 = vld [vmem:[#allocation2 + $0x8] sm:$0xff]  ;;  %v292_v63 = vpop.f32.mrf.mxu0 }
  0xa4   : > { %v442_v0 = vpop.f32.mrf.mxu1  ;;  %v501_v1 = vadd.f32 %v485_v62, %v439_v56  ;;  %336 = vst.msk [vmem:[#allocation2 + $0x10] sm:$0xff] %vm216_vm1, %v292_v63  ;;  %v3896_v56 = vld [vmem:[%s4377_s20 + $0x52] sm:$0xff] }
  0xa5   : > { %v669_v3 = vld [vmem:[#allocation2] sm:$0xff] }
  0xa6   : > { %v685_v4 = vadd.f32 %v669_v3, %v621_v52  ;;  %517 = vst.msk [vmem:[#allocation2 + $0x8] sm:$0xff] %vm216_vm1, %v501_v1  ;;  %3825 = vmatmul.msk.f32.gmra.mxu0 %vm216_vm1, %v4390_v11  ;;  %3877 = vmatmul.msk.f32.gmra.mxu2 %vm216_vm1, %v4417_v17  ;;  %v3897_v3 = vld [vmem:[%s4377_s20 + $0x62] sm:$0xff] }
  0xa7   : > { %3843 = vmatmul.msk.f32.gmra.mxu1 %vm216_vm1, %v3891_v51  ;;  %3911 = vmatmul.msk.f32.gmra.mxu3 %vm216_vm1, %v3893_v2 }
  0xa8   : > { %701 = vst.msk [vmem:[#allocation2] sm:$0xff] %vm216_vm1, %v685_v4 }
  0xa9   : > { %v627_v5 = vpop.f32.mrf.mxu2 }
  0xaa   : > { %v809_v6 = vpop.f32.mrf.mxu3 }
  0xab   : > { %v486_v7 = vld [vmem:[#allocation2 + $0x10] sm:$0xff]  ;;  %v295_v8 = vpop.f32.mrf.mxu0 }
  0xac   : > { %v445_v9 = vpop.f32.mrf.mxu1  ;;  %v502_v12 = vadd.f32 %v486_v7, %v442_v0  ;;  %337 = vst.msk [vmem:[#allocation2 + $0x18] sm:$0xff] %vm216_vm1, %v295_v8 }
  0xad   : > { %v670_v26 = vld [vmem:[#allocation2 + $0x8] sm:$0xff] }
  0xae   : > { %v686_v28 = vadd.f32 %v670_v26, %v624_v60  ;;  %518 = vst.msk [vmem:[#allocation2 + $0x10] sm:$0xff] %vm216_vm1, %v502_v12  ;;  %3826 = vmatmul.msk.f32.gmra.mxu0 %vm216_vm1, %v4404_v15  ;;  %3878 = vmatmul.msk.f32.gmra.mxu2 %vm216_vm1, %v4431_v19 }
  0xaf   : > { %3844 = vmatmul.msk.f32.gmra.mxu1 %vm216_vm1, %v3892_v59  ;;  %v851_v30 = vld [vmem:[#allocation2] sm:$0xff]  ;;  %3912 = vmatmul.msk.f32.gmra.mxu3 %vm216_vm1, %v3894_v13 }
  0xb0   : > { %v867_v32 = vadd.f32 %v851_v30, %v803_v53  ;;  %702 = vst.msk [vmem:[#allocation2 + $0x8] sm:$0xff] %vm216_vm1, %v686_v28  ;;  %v3898_v30 = vld [vmem:[%s4377_s20 + $0x6a] sm:$0xff] }
  0xb1   : > { %v630_v34 = vpop.f32.mrf.mxu2 }
  0xb2   : > { %883 = vst.msk [vmem:[#allocation2] sm:$0xff] %vm216_vm1, %v867_v32  ;;  %v812_v36 = vpop.f32.mrf.mxu3 }
  0xb3   : > { %v487_v38 = vld [vmem:[#allocation2 + $0x18] sm:$0xff]  ;;  %v298_v40 = vpop.f32.mrf.mxu0 }
  0xb4   : > { %v448_v41 = vpop.f32.mrf.mxu1  ;;  %v503_v42 = vadd.f32 %v487_v38, %v445_v9  ;;  %338 = vst.msk [vmem:[#allocation2 + $0x20] sm:$0xff] %vm216_vm1, %v298_v40 }
  0xb5   : > { %v671_v45 = vld [vmem:[#allocation2 + $0x10] sm:$0xff] }
  0xb6   : > { %v687_v47 = vadd.f32 %v671_v45, %v627_v5  ;;  %519 = vst.msk [vmem:[#allocation2 + $0x18] sm:$0xff] %vm216_vm1, %v503_v42  ;;  %3827 = vmatmul.msk.f32.gmra.mxu0 %vm216_vm1, %v4417_v17  ;;  %3879 = vmatmul.msk.f32.gmra.mxu2 %vm216_vm1, %v4445_v21 }
  0xb7   : > { %3845 = vmatmul.msk.f32.gmra.mxu1 %vm216_vm1, %v3893_v2  ;;  %v852_v48 = vld [vmem:[#allocation2 + $0x8] sm:$0xff]  ;;  %3913 = vmatmul.msk.f32.gmra.mxu3 %vm216_vm1, %v3895_v43 }
  0xb8   : > { %v868_v49 = vadd.f32 %v852_v48, %v806_v61  ;;  %703 = vst.msk [vmem:[#allocation2 + $0x10] sm:$0xff] %vm216_vm1, %v687_v47  ;;  %v3899_v48 = vld [vmem:[%s4377_s20 + $0x7a] sm:$0xff] }
  0xb9   : > { %v633_v50 = vpop.f32.mrf.mxu2 }
  0xba   : > { %884 = vst.msk [vmem:[#allocation2 + $0x8] sm:$0xff] %vm216_vm1, %v868_v49  ;;  %v815_v51 = vpop.f32.mrf.mxu3 }
  0xbb   : > { %v488_v52 = vld [vmem:[#allocation2 + $0x20] sm:$0xff]  ;;  %v301_v53 = vpop.f32.mrf.mxu0 }
  0xbc   : > { %v451_v54 = vpop.f32.mrf.mxu1  ;;  %v504_v55 = vadd.f32 %v488_v52, %v448_v41  ;;  %339 = vst.msk [vmem:[#allocation2 + $0x28] sm:$0xff] %vm216_vm1, %v301_v53 }
  0xbd   : > { %v672_v57 = vld [vmem:[#allocation2 + $0x18] sm:$0xff] }
  0xbe   : > { %v688_v58 = vadd.f32 %v672_v57, %v630_v34  ;;  %520 = vst.msk [vmem:[#allocation2 + $0x20] sm:$0xff] %vm216_vm1, %v504_v55  ;;  %3828 = vmatmul.msk.f32.gmra.mxu0 %vm216_vm1, %v4431_v19  ;;  %3880 = vmatmul.msk.f32.gmra.mxu2 %vm216_vm1, %v4459_v23 }
  0xbf   : > { %3846 = vmatmul.msk.f32.gmra.mxu1 %vm216_vm1, %v3894_v13  ;;  %v853_v59 = vld [vmem:[#allocation2 + $0x10] sm:$0xff]  ;;  %3914 = vmatmul.msk.f32.gmra.mxu3 %vm216_vm1, %v3896_v56 }
  0xc0   : > { %v869_v60 = vadd.f32 %v853_v59, %v809_v6  ;;  %704 = vst.msk [vmem:[#allocation2 + $0x18] sm:$0xff] %vm216_vm1, %v688_v58  ;;  %v3900_v59 = vld [vmem:[%s4377_s20 + $0x82] sm:$0xff] }
  0xc1   : > { %v636_v61 = vpop.f32.mrf.mxu2 }
  0xc2   : > { %885 = vst.msk [vmem:[#allocation2 + $0x10] sm:$0xff] %vm216_vm1, %v869_v60  ;;  %v818_v62 = vpop.f32.mrf.mxu3 }
  0xc3   : > { %v489_v63 = vld [vmem:[#allocation2 + $0x28] sm:$0xff]  ;;  %v304_v0 = vpop.f32.mrf.mxu0 }
  0xc4   : > { %v454_v1 = vpop.f32.mrf.mxu1  ;;  %v505_v2 = vadd.f32 %v489_v63, %v451_v54  ;;  %340 = vst.msk [vmem:[#allocation2 + $0x30] sm:$0xff] %vm216_vm1, %v304_v0 }
  0xc5   : > { %v673_v4 = vld [vmem:[#allocation2 + $0x20] sm:$0xff] }
  0xc6   : > { %v689_v5 = vadd.f32 %v673_v4, %v633_v50  ;;  %521 = vst.msk [vmem:[#allocation2 + $0x28] sm:$0xff] %vm216_vm1, %v505_v2  ;;  %3829 = vmatmul.msk.f32.gmra.mxu0 %vm216_vm1, %v4445_v21  ;;  %3881 = vmatmul.msk.f32.gmra.mxu2 %vm216_vm1, %v4473_v25 }
  0xc7   : > { %3847 = vmatmul.msk.f32.gmra.mxu1 %vm216_vm1, %v3895_v43  ;;  %v854_v6 = vld [vmem:[#allocation2 + $0x18] sm:$0xff]  ;;  %3915 = vmatmul.msk.f32.gmra.mxu3 %vm216_vm1, %v3897_v3 }
  0xc8   : > { %v870_v7 = vadd.f32 %v854_v6, %v812_v36  ;;  %705 = vst.msk [vmem:[#allocation2 + $0x20] sm:$0xff] %vm216_vm1, %v689_v5 }
  0xc9   : > { %v639_v8 = vpop.f32.mrf.mxu2 }
  0xca   : > { %886 = vst.msk [vmem:[#allocation2 + $0x18] sm:$0xff] %vm216_vm1, %v870_v7  ;;  %v821_v9 = vpop.f32.mrf.mxu3 }
  0xcb   : > { %v490_v12 = vld [vmem:[#allocation2 + $0x30] sm:$0xff]  ;;  %v307_v13 = vpop.f32.mrf.mxu0 }
  0xcc   : > { %v457_v26 = vpop.f32.mrf.mxu1  ;;  %v506_v28 = vadd.f32 %v490_v12, %v454_v1  ;;  %341 = vst.msk [vmem:[#allocation2 + $0x38] sm:$0xff] %vm216_vm1, %v307_v13 }
  0xcd   : > { %v674_v32 = vld [vmem:[#allocation2 + $0x28] sm:$0xff] }
  0xce   : > { %v690_v34 = vadd.f32 %v674_v32, %v636_v61  ;;  %522 = vst.msk [vmem:[#allocation2 + $0x30] sm:$0xff] %vm216_vm1, %v506_v28  ;;  %3830 = vmatmul.msk.f32.gmra.mxu0 %vm216_vm1, %v4459_v23  ;;  %3882 = vmatmul.msk.f32.gmra.mxu2 %vm216_vm1, %v4485_v27 }
  0xcf   : > { %3848 = vmatmul.msk.f32.gmra.mxu1 %vm216_vm1, %v3896_v56  ;;  %v855_v36 = vld [vmem:[#allocation2 + $0x20] sm:$0xff]  ;;  %3916 = vmatmul.msk.f32.gmra.mxu3 %vm216_vm1, %v3898_v30 }
  0xd0   : > { %v871_v38 = vadd.f32 %v855_v36, %v815_v51  ;;  %706 = vst.msk [vmem:[#allocation2 + $0x28] sm:$0xff] %vm216_vm1, %v690_v34 }
  0xd1   : > { %v642_v40 = vpop.f32.mrf.mxu2 }
  0xd2   : > { %887 = vst.msk [vmem:[#allocation2 + $0x20] sm:$0xff] %vm216_vm1, %v871_v38  ;;  %v824_v41 = vpop.f32.mrf.mxu3 }
  0xd3   : > { %v491_v42 = vld [vmem:[#allocation2 + $0x38] sm:$0xff]  ;;  %v310_v43 = vpop.f32.mrf.mxu0 }
  0xd4   : > { %v460_v45 = vpop.f32.mrf.mxu1  ;;  %v507_v47 = vadd.f32 %v491_v42, %v457_v26  ;;  %342 = vst.msk [vmem:[#allocation2 + $0x40] sm:$0xff] %vm216_vm1, %v310_v43 }
  0xd5   : > { %v675_v49 = vld [vmem:[#allocation2 + $0x30] sm:$0xff] }
  0xd6   : > { %v691_v50 = vadd.f32 %v675_v49, %v639_v8  ;;  %523 = vst.msk [vmem:[#allocation2 + $0x38] sm:$0xff] %vm216_vm1, %v507_v47  ;;  %3831 = vmatmul.msk.f32.gmra.mxu0 %vm216_vm1, %v4473_v25  ;;  %3883 = vmatmul.msk.f32.gmra.mxu2 %vm216_vm1, %v4496_v29 }
  0xd7   : > { %3849 = vmatmul.msk.f32.gmra.mxu1 %vm216_vm1, %v3897_v3  ;;  %v856_v51 = vld [vmem:[#allocation2 + $0x28] sm:$0xff]  ;;  %3917 = vmatmul.msk.f32.gmra.mxu3 %vm216_vm1, %v3899_v48 }
  0xd8   : > { %v872_v52 = vadd.f32 %v856_v51, %v818_v62  ;;  %707 = vst.msk [vmem:[#allocation2 + $0x30] sm:$0xff] %vm216_vm1, %v691_v50 }
  0xd9   : > { %v645_v53 = vpop.f32.mrf.mxu2 }
  0xda   : > { %888 = vst.msk [vmem:[#allocation2 + $0x28] sm:$0xff] %vm216_vm1, %v872_v52  ;;  %v827_v54 = vpop.f32.mrf.mxu3 }
  0xdb   : > { %v492_v55 = vld [vmem:[#allocation2 + $0x40] sm:$0xff]  ;;  %v313_v56 = vpop.f32.mrf.mxu0 }
  0xdc   : > { %v463_v57 = vpop.f32.mrf.mxu1  ;;  %v508_v58 = vadd.f32 %v492_v55, %v460_v45  ;;  %343 = vst.msk [vmem:[#allocation2 + $0x48] sm:$0xff] %vm216_vm1, %v313_v56 }
  0xdd   : > { %v676_v60 = vld [vmem:[#allocation2 + $0x38] sm:$0xff] }
  0xde   : > { %v692_v61 = vadd.f32 %v676_v60, %v642_v40  ;;  %524 = vst.msk [vmem:[#allocation2 + $0x40] sm:$0xff] %vm216_vm1, %v508_v58  ;;  %3832 = vmatmul.msk.f32.gmra.mxu0 %vm216_vm1, %v4485_v27  ;;  %3884 = vmatmul.msk.f32.gmra.mxu2 %vm216_vm1, %v4507_v31  ;;  %v3901_v27 = vld [vmem:[%s4377_s20 + $0x92] sm:$0xff] }
  0xdf   : > { %3850 = vmatmul.msk.f32.gmra.mxu1 %vm216_vm1, %v3898_v30  ;;  %v857_v62 = vld [vmem:[#allocation2 + $0x30] sm:$0xff]  ;;  %3918 = vmatmul.msk.f32.gmra.mxu3 %vm216_vm1, %v3900_v59 }
  0xe0   : > { %v873_v63 = vadd.f32 %v857_v62, %v821_v9  ;;  %708 = vst.msk [vmem:[#allocation2 + $0x38] sm:$0xff] %vm216_vm1, %v692_v61 }
  0xe1   : > { %v648_v0 = vpop.f32.mrf.mxu2 }
  0xe2   : > { %889 = vst.msk [vmem:[#allocation2 + $0x30] sm:$0xff] %vm216_vm1, %v873_v63  ;;  %v830_v1 = vpop.f32.mrf.mxu3 }
  0xe3   : > { %v493_v2 = vld [vmem:[#allocation2 + $0x48] sm:$0xff]  ;;  %v316_v3 = vpop.f32.mrf.mxu0 }
  0xe4   : > { %v466_v4 = vpop.f32.mrf.mxu1  ;;  %v509_v5 = vadd.f32 %v493_v2, %v463_v57  ;;  %344 = vst.msk [vmem:[#allocation2 + $0x50] sm:$0xff] %vm216_vm1, %v316_v3 }
  0xe5   : > { %v677_v6 = vld [vmem:[#allocation2 + $0x40] sm:$0xff] }
  0xe6   : > { %v693_v7 = vadd.f32 %v677_v6, %v645_v53  ;;  %525 = vst.msk [vmem:[#allocation2 + $0x48] sm:$0xff] %vm216_vm1, %v509_v5  ;;  %3833 = vmatmul.msk.f32.gmra.mxu0 %vm216_vm1, %v4496_v29  ;;  %3885 = vmatmul.msk.f32.gmra.mxu2 %vm216_vm1, %v4517_v33  ;;  %v3902_v29 = vld [vmem:[%s4377_s20 + $0x9a] sm:$0xff] }
  0xe7   : > { %3851 = vmatmul.msk.f32.gmra.mxu1 %vm216_vm1, %v3899_v48  ;;  %v858_v8 = vld [vmem:[#allocation2 + $0x38] sm:$0xff]  ;;  %3919 = vmatmul.msk.f32.gmra.mxu3 %vm216_vm1, %v3901_v27 }
  0xe8   : > { %v874_v9 = vadd.f32 %v858_v8, %v824_v41  ;;  %709 = vst.msk [vmem:[#allocation2 + $0x40] sm:$0xff] %vm216_vm1, %v693_v7 }
  0xe9   : > { %v651_v12 = vpop.f32.mrf.mxu2 }
  0xea   : > { %890 = vst.msk [vmem:[#allocation2 + $0x38] sm:$0xff] %vm216_vm1, %v874_v9  ;;  %v833_v13 = vpop.f32.mrf.mxu3 }
  0xeb   : > { %v494_v26 = vld [vmem:[#allocation2 + $0x50] sm:$0xff]  ;;  %v319_v28 = vpop.f32.mrf.mxu0 }
  0xec   : > { %v469_v30 = vpop.f32.mrf.mxu1  ;;  %v510_v32 = vadd.f32 %v494_v26, %v466_v4  ;;  %345 = vst.msk [vmem:[#allocation2 + $0x58] sm:$0xff] %vm216_vm1, %v319_v28  ;;  %v4181_v28 = vld [vmem:[%s5751_s1 + $0x3c] sm:$0xf] }
  0xed   : > { %v678_v34 = vld [vmem:[#allocation2 + $0x48] sm:$0xff]  ;;  %4182 = vmatpush.msk.msrb.mxu3 %vm265_vm0, %v4181_v28  ;;  %v4002_v28 = vld [vmem:[%s4377_s20 + $0x80] sm:$0xff] }
  0xee   : > { %v694_v36 = vadd.f32 %v678_v34, %v648_v0  ;;  %526 = vst.msk [vmem:[#allocation2 + $0x50] sm:$0xff] %vm216_vm1, %v510_v32  ;;  %3834 = vmatmul.msk.f32.gmra.mxu0 %vm216_vm1, %v4507_v31  ;;  %3886 = vmatmul.msk.f32.gmra.mxu2 %vm216_vm1, %v4527_v35  ;;  %v3903_v31 = vld [vmem:[%s4377_s20 + $0xaa] sm:$0xff] }
  0xef   : > { %3852 = vmatmul.msk.f32.gmra.mxu1 %vm216_vm1, %v3900_v59  ;;  %v859_v38 = vld [vmem:[#allocation2 + $0x40] sm:$0xff]  ;;  %3920 = vmatmul.msk.f32.gmra.mxu3 %vm216_vm1, %v3902_v29 }
  0xf0   : > { %v875_v40 = vadd.f32 %v859_v38, %v827_v54  ;;  %710 = vst.msk [vmem:[#allocation2 + $0x48] sm:$0xff] %vm216_vm1, %v694_v36 }
  0xf1   : > { %v654_v41 = vpop.f32.mrf.mxu2 }
  0xf2   : > { %891 = vst.msk [vmem:[#allocation2 + $0x40] sm:$0xff] %vm216_vm1, %v875_v40  ;;  %v836_v42 = vpop.f32.mrf.mxu3 }
  0xf3   : > { %v495_v43 = vld [vmem:[#allocation2 + $0x58] sm:$0xff]  ;;  %v322_v45 = vpop.f32.mrf.mxu0 }
  0xf4   : > { %v472_v47 = vpop.f32.mrf.mxu1  ;;  %v511_v48 = vadd.f32 %v495_v43, %v469_v30  ;;  %346 = vst.msk [vmem:[#allocation2 + $0x60] sm:$0xff] %vm216_vm1, %v322_v45  ;;  %v4113_v30 = vld [vmem:[%s5751_s1 + $0x34] sm:$0xf] }
  0xf5   : > { %v679_v49 = vld [vmem:[#allocation2 + $0x50] sm:$0xff]  ;;  %4114 = vmatpush.msk.msrb.mxu1 %vm265_vm0, %v4113_v30  ;;  %v4883_v30 = vld [vmem:[%s4377_s20 + $0x81] sm:$0xff] }
  0xf6   : > { %v695_v50 = vadd.f32 %v679_v49, %v651_v12  ;;  %527 = vst.msk [vmem:[#allocation2 + $0x58] sm:$0xff] %vm216_vm1, %v511_v48  ;;  %3835 = vmatmul.msk.f32.gmra.mxu0 %vm216_vm1, %v4517_v33  ;;  %3887 = vmatmul.msk.f32.gmra.mxu2 %vm216_vm1, %v4537_v37  ;;  %v3904_v33 = vld [vmem:[%s4377_s20 + $0xb2] sm:$0xff] }
  0xf7   : > { %3853 = vmatmul.msk.f32.gmra.mxu1 %vm216_vm1, %v3901_v27  ;;  %v860_v51 = vld [vmem:[#allocation2 + $0x48] sm:$0xff]  ;;  %3921 = vmatmul.msk.f32.gmra.mxu3 %vm216_vm1, %v3903_v31  ;;  %v4147_v12 = vld [vmem:[%s5751_s1 + $0x38] sm:$0xf] }
  0xf8   : > { %v876_v52 = vadd.f32 %v860_v51, %v830_v1  ;;  %711 = vst.msk [vmem:[#allocation2 + $0x50] sm:$0xff] %vm216_vm1, %v695_v50  ;;  %4148 = vmatpush.msk.msrb.mxu2 %vm265_vm0, %v4147_v12 }
  0xf9   : > { %v657_v53 = vpop.f32.mrf.mxu2 }
  0xfa   : > { %892 = vst.msk [vmem:[#allocation2 + $0x48] sm:$0xff] %vm216_vm1, %v876_v52  ;;  %v839_v54 = vpop.f32.mrf.mxu3 }
  0xfb   : > { %v496_v55 = vld [vmem:[#allocation2 + $0x60] sm:$0xff]  ;;  %v325_v56 = vpop.f32.mrf.mxu0 }
  0xfc   : > { %v475_v57 = vpop.f32.mrf.mxu1  ;;  %v512_v58 = vadd.f32 %v496_v55, %v472_v47  ;;  %347 = vst.msk [vmem:[#allocation2 + $0x68] sm:$0xff] %vm216_vm1, %v325_v56 }
  0xfd   : > { %v680_v59 = vld [vmem:[#allocation2 + $0x58] sm:$0xff] }
  0xfe   : > { %v696_v60 = vadd.f32 %v680_v59, %v654_v41  ;;  %528 = vst.msk [vmem:[#allocation2 + $0x60] sm:$0xff] %vm216_vm1, %v512_v58  ;;  %3836 = vmatmul.msk.f32.gmra.mxu0 %vm216_vm1, %v4527_v35  ;;  %3888 = vmatmul.msk.f32.gmra.mxu2 %vm216_vm1, %v4547_v39  ;;  %v3905_v35 = vld [vmem:[%s4377_s20 + $0xc2] sm:$0xff]  ;;  %v3928_v59 = vld [vmem:[%s4377_s20 + $0x38] sm:$0xff] }
  0xff   : > { %3854 = vmatmul.msk.f32.gmra.mxu1 %vm216_vm1, %v3902_v29  ;;  %v861_v61 = vld [vmem:[#allocation2 + $0x50] sm:$0xff]  ;;  %3922 = vmatmul.msk.f32.gmra.mxu3 %vm216_vm1, %v3904_v33 }
 0x100   : > { %v877_v62 = vadd.f32 %v861_v61, %v833_v13  ;;  %712 = vst.msk [vmem:[#allocation2 + $0x58] sm:$0xff] %vm216_vm1, %v696_v60  ;;  %v3906_v29 = vld [vmem:[%s4377_s20 + $0xca] sm:$0xff]  ;;  %v4820_v60 = vld [vmem:[%s4377_s20 + $0x39] sm:$0xff] }
 0x101   : > { %v660_v63 = vpop.f32.mrf.mxu2 }
 0x102   : > { %893 = vst.msk [vmem:[#allocation2 + $0x50] sm:$0xff] %vm216_vm1, %v877_v62  ;;  %v842_v0 = vpop.f32.mrf.mxu3 }
 0x103   : > { %v497_v1 = vld [vmem:[#allocation2 + $0x68] sm:$0xff]  ;;  %v328_v2 = vpop.f32.mrf.mxu0 }
 0x104   : > { %v478_v3 = vpop.f32.mrf.mxu1  ;;  %v513_v4 = vadd.f32 %v497_v1, %v475_v57  ;;  %348 = vst.msk [vmem:[#allocation2 + $0x70] sm:$0xff] %vm216_vm1, %v328_v2 }
 0x105   : > { %v681_v5 = vld [vmem:[#allocation2 + $0x60] sm:$0xff] }
 0x106   : > { %v697_v27 = vadd.f32 %v681_v5, %v657_v53  ;;  %529 = vst.msk [vmem:[#allocation2 + $0x68] sm:$0xff] %vm216_vm1, %v513_v4  ;;  %3837 = vmatmul.msk.f32.gmra.mxu0 %vm216_vm1, %v4537_v37  ;;  %3889 = vmatmul.msk.f32.gmra.mxu2 %vm216_vm1, %v4569_v44  ;;  %v4079_v37 = vld [vmem:[%s5751_s1 + $0x30] sm:$0xf] }
 0x107   : > { %3855 = vmatmul.msk.f32.gmra.mxu1 %vm216_vm1, %v3903_v31  ;;  %v862_v6 = vld [vmem:[#allocation2 + $0x58] sm:$0xff]  ;;  %3923 = vmatmul.msk.f32.gmra.mxu3 %vm216_vm1, %v3905_v35  ;;  %v4853_v35 = vld [vmem:[%s4377_s20 + $0x69] sm:$0xff] }
 0x108   : > { %v878_v7 = vadd.f32 %v862_v6, %v836_v42  ;;  %713 = vst.msk [vmem:[#allocation2 + $0x60] sm:$0xff] %vm216_vm1, %v697_v27  ;;  %4080 = vmatpush.msk.msrb.mxu0 %vm265_vm0, %v4079_v37  ;;  %v4848_v4 = vld [vmem:[%s4377_s20 + $0x51] sm:$0xff]  ;;  %v4870_v37 = vld [vmem:[%s4377_s20 + $0x79] sm:$0xff] }
 0x109   : > { %v663_v8 = vpop.f32.mrf.mxu2 }
 0x10a   : > { %894 = vst.msk [vmem:[#allocation2 + $0x58] sm:$0xff] %vm216_vm1, %v878_v7  ;;  %v845_v9 = vpop.f32.mrf.mxu3  ;;  %v3931_v7 = vld [vmem:[%s4377_s20 + $0x60] sm:$0xff] }
 0x10b   : > { %v498_v13 = vld [vmem:[#allocation2 + $0x70] sm:$0xff]  ;;  %v331_v44 = vpop.f32.mrf.mxu0 }
 0x10c   : > { %v481_v26 = vpop.f32.mrf.mxu1  ;;  %v514_v32 = vadd.f32 %v498_v13, %v478_v3  ;;  %349 = vst.msk [vmem:[#allocation2 + $0x78] sm:$0xff] %vm216_vm1, %v331_v44  ;;  %v3930_v3 = vld [vmem:[%s4377_s20 + $0x50] sm:$0xff] }
 0x10d   : > { %v682_v34 = vld [vmem:[#allocation2 + $0x68] sm:$0xff] }
 0x10e   : > { %v698_v36 = vadd.f32 %v682_v34, %v660_v63  ;;  %530 = vst.msk [vmem:[#allocation2 + $0x70] sm:$0xff] %vm216_vm1, %v514_v32  ;;  %3838 = vmatmul.msk.f32.gmra.mxu0 %vm216_vm1, %v4547_v39  ;;  %3890 = vmatmul.msk.f32.gmra.mxu2 %vm216_vm1, %v4579_v46  ;;  %v3929_v63 = vld [vmem:[%s4377_s20 + $0x48] sm:$0xff] }
 0x10f   : > { %3856 = vmatmul.msk.f32.gmra.mxu1 %vm216_vm1, %v3904_v33  ;;  %v863_v38 = vld [vmem:[#allocation2 + $0x60] sm:$0xff]  ;;  %3924 = vmatmul.msk.f32.gmra.mxu3 %vm216_vm1, %v3906_v29 }
 0x110   : > { %v879_v40 = vadd.f32 %v863_v38, %v839_v54  ;;  %714 = vst.msk [vmem:[#allocation2 + $0x68] sm:$0xff] %vm216_vm1, %v698_v36  ;;  %v4003_v38 = vld [vmem:[%s4377_s20 + $0x90] sm:$0xff] }
 0x111   : > { %v666_v41 = vpop.f32.mrf.mxu2 }
 0x112   : > { %895 = vst.msk [vmem:[#allocation2 + $0x60] sm:$0xff] %vm216_vm1, %v879_v40  ;;  %v848_v42 = vpop.f32.mrf.mxu3  ;;  %v4896_v40 = vld [vmem:[%s4377_s20 + $0x91] sm:$0xff] }
 0x113   : > { %v499_v43 = vld [vmem:[#allocation2 + $0x78] sm:$0xff]  ;;  %v985_v45 = vpop.f32.mrf.mxu0 }
 0x114   : > { %v1200_v47 = vpop.f32.mrf.mxu1  ;;  %v515_v48 = vadd.f32 %v499_v43, %v481_v26  ;;  %1049 = vrot.lane.b32.xlu0 %v985_v45, %s4285_s10 }
 0x115   : > { %1280 = vrot.lane.b32.xlu1 %v1200_v47, %s4285_s10  ;;  %v683_v39 = vld [vmem:[#allocation2 + $0x70] sm:$0xff]  ;;  %v4004_v47 = vld [vmem:[%s4377_s20 + $0x98] sm:$0xff] }
 0x116   : > { %v699_v46 = vadd.f32 %v683_v39, %v663_v8  ;;  %531 = vst.msk [vmem:[#allocation2 + $0x78] sm:$0xff] %vm216_vm1, %v515_v48  ;;  %3943 = vmatmul.msk.f32.vlgmr.msra.gmra.mxu0 %vm216_vm1, %v4384_v10  ;;  %4013 = vmatmul.msk.f32.vlgmr.msra.gmra.mxu2 %vm216_vm1, %v4414_v16  ;;  %v4865_v8 = vld [vmem:[%s4377_s20 + $0x61] sm:$0xff]  ;;  %v4909_v48 = vld [vmem:[%s4377_s20 + $0x99] sm:$0xff] }
 0x117   : > { %3977 = vmatmul.msk.f32.vlgmr.msra.gmra.mxu1 %vm216_vm1, %v4390_v11  ;;  %v864_v31 = vld [vmem:[#allocation2 + $0x68] sm:$0xff]  ;;  %4047 = vmatmul.msk.f32.vlgmr.msra.gmra.mxu3 %vm216_vm1, %v4417_v17 }
 0x118   : > { %v880_v49 = vadd.f32 %v864_v31, %v842_v0  ;;  %715 = vst.msk [vmem:[#allocation2 + $0x70] sm:$0xff] %vm216_vm1, %v699_v46  ;;  %v4834_v0 = vld [vmem:[%s4377_s20 + $0x49] sm:$0xff] }
 0x119   : > { %v1446_v50 = vpop.f32.mrf.mxu2 }
 0x11a   : > { %896 = vst.msk [vmem:[#allocation2 + $0x68] sm:$0xff] %vm216_vm1, %v880_v49  ;;  %v1692_v51 = vpop.f32.mrf.mxu3  ;;  %1526 = vrot.lane.b32.xlu2 %v1446_v50, %s4285_s10  ;;  %v4005_v50 = vld [vmem:[%s4377_s20 + $0xa8] sm:$0xff] }
 0x11b   : > { %v988_v10 = vpop.f32.mrf.mxu0 }
 0x11c   : > { %v1203_v52 = vpop.f32.mrf.mxu1  ;;  %1772 = vrot.lane.b32.xlu0 %v1692_v51, %s4285_s10  ;;  %v4039_v51 = vld [vmem:[%s4377_s20 + $0xa9] sm:$0xff] }
 0x11d   : > { %v684_v11 = vld [vmem:[#allocation2 + $0x78] sm:$0xff] }
 0x11e   : > { %v700_v53 = vadd.f32 %v684_v11, %v666_v41  ;;  %3944 = vmatmul.msk.f32.gmra.mxu0 %vm216_vm1, %v4401_v14  ;;  %4014 = vmatmul.msk.f32.gmra.mxu2 %vm216_vm1, %v4428_v18 }
 0x11f   : > { %3978 = vmatmul.msk.f32.gmra.mxu1 %vm216_vm1, %v4404_v15  ;;  %v865_v54 = vld [vmem:[#allocation2 + $0x70] sm:$0xff]  ;;  %4048 = vmatmul.msk.f32.gmra.mxu3 %vm216_vm1, %v4431_v19 }
 0x120   : > { %v881_v55 = vadd.f32 %v865_v54, %v845_v9  ;;  %716 = vst.msk [vmem:[#allocation2 + $0x78] sm:$0xff] %vm216_vm1, %v700_v53  ;;  %v4001_v9 = vld [vmem:[%s4377_s20 + $0x78] sm:$0xff]  ;;  %v4006_v54 = vld [vmem:[%s4377_s20 + $0xb0] sm:$0xff] }
 0x121   : > { %v1449_v56 = vpop.f32.mrf.mxu2 }
 0x122   : > { %897 = vst.msk [vmem:[#allocation2 + $0x70] sm:$0xff] %vm216_vm1, %v881_v55  ;;  %v1695_v57 = vpop.f32.mrf.mxu3  ;;  %1282 = vrot.lane.b32.xlu2 %v1203_v52, %s4285_s10  ;;  %v4040_v55 = vld [vmem:[%s4377_s20 + $0xb1] sm:$0xff] }
 0x123   : > { %1774 = vrot.lane.b32.xlu1 %v1695_v57, %s4285_s10  ;;  %v991_v14 = vpop.f32.mrf.mxu0 }
 0x124   : > { %v1206_v15 = vpop.f32.mrf.mxu1  ;;  %1051 = vrot.lane.b32.xlu0 %v988_v10, %s4285_s10 }
 0x126   : > { %3945 = vmatmul.msk.f32.gmra.mxu0 %vm216_vm1, %v4414_v16  ;;  %4015 = vmatmul.msk.f32.gmra.mxu2 %vm216_vm1, %v4442_v20 }
 0x127   : > { %3979 = vmatmul.msk.f32.gmra.mxu1 %vm216_vm1, %v4417_v17  ;;  %v866_v18 = vld [vmem:[#allocation2 + $0x78] sm:$0xff]  ;;  %4049 = vmatmul.msk.f32.gmra.mxu3 %vm216_vm1, %v4445_v21 }
 0x128   : > { %v882_v19 = vadd.f32 %v866_v18, %v848_v42  ;;  %v4007_v18 = vld [vmem:[%s4377_s20 + $0xc0] sm:$0xff] }
 0x129   : > { %v1452_v58 = vpop.f32.mrf.mxu2 }
 0x12a   : > { %898 = vst.msk [vmem:[#allocation2 + $0x78] sm:$0xff] %vm216_vm1, %v882_v19  ;;  %v1698_v33 = vpop.f32.mrf.mxu3  ;;  %v4041_v19 = vld [vmem:[%s4377_s20 + $0xc1] sm:$0xff] }
 0x12b   : > { %1776 = vrot.lane.b32.xlu2 %v1698_v33, %s4285_s10  ;;  %1053 = vrot.lane.b32.xlu1 %v991_v14, %s4285_s10  ;;  %v994_v16 = vpop.f32.mrf.mxu0 }
 0x12c   : > { %v1209_v17 = vpop.f32.mrf.mxu1  ;;  %1528 = vrot.lane.b32.xlu0 %v1449_v56, %s4285_s10 }
 0x12e   : > { %3946 = vmatmul.msk.f32.gmra.mxu0 %vm216_vm1, %v3928_v59  ;;  %4016 = vmatmul.msk.f32.gmra.mxu2 %vm216_vm1, %v4456_v22 }
 0x12f   : > { %3980 = vmatmul.msk.f32.gmra.mxu1 %vm216_vm1, %v4820_v60  ;;  %4050 = vmatmul.msk.f32.gmra.mxu3 %vm216_vm1, %v4459_v23 }
 0x131   : > { %v1455_v20 = vpop.f32.mrf.mxu2 }
 0x132   : > { %v1701_v21 = vpop.f32.mrf.mxu3 }
 0x133   : > { %1532 = vrot.lane.b32.xlu2 %v1455_v20, %s4285_s10  ;;  %1530 = vrot.lane.b32.xlu1 %v1452_v58, %s4285_s10  ;;  %v997_v61 = vpop.f32.mrf.mxu0  ;;  %v4008_v20 = vld [vmem:[%s4377_s20 + $0xc8] sm:$0xff] }
 0x134   : > { %v1212_v62 = vpop.f32.mrf.mxu1  ;;  %1284 = vrot.lane.b32.xlu0 %v1206_v15, %s4285_s10 }
 0x136   : > { %3947 = vmatmul.msk.f32.gmra.mxu0 %vm216_vm1, %v3929_v63  ;;  %4017 = vmatmul.msk.f32.gmra.mxu2 %vm216_vm1, %v4470_v24  ;;  %v4000_v24 = vld [vmem:[%s4377_s20 + $0x68] sm:$0xff] }
 0x137   : > { %3981 = vmatmul.msk.f32.gmra.mxu1 %vm216_vm1, %v4834_v0  ;;  %4051 = vmatmul.msk.f32.gmra.mxu3 %vm216_vm1, %v4473_v25 }
 0x139   : > { %v1458_v22 = vpop.f32.mrf.mxu2 }
 0x13a   : > { %v1704_v23 = vpop.f32.mrf.mxu3 }
 0x13b   : > { %1055 = vrot.lane.b32.xlu1 %v994_v16, %s4285_s10  ;;  %1057 = vrot.lane.b32.xlu2 %v997_v61, %s4285_s10  ;;  %v1000_v1 = vpop.f32.mrf.mxu0 }
 0x13c   : > { %v1215_v2 = vpop.f32.mrf.mxu1  ;;  %1778 = vrot.lane.b32.xlu0 %v1701_v21, %s4285_s10  ;;  %v4042_v21 = vld [vmem:[%s4377_s20 + $0xc9] sm:$0xff] }
 0x13e   : > { %3948 = vmatmul.msk.f32.gmra.mxu0 %vm216_vm1, %v3930_v3  ;;  %4018 = vmatmul.msk.f32.gmra.mxu2 %vm216_vm1, %v4000_v24 }
 0x13f   : > { %3982 = vmatmul.msk.f32.gmra.mxu1 %vm216_vm1, %v4848_v4  ;;  %4052 = vmatmul.msk.f32.gmra.mxu3 %vm216_vm1, %v4853_v35 }
 0x141   : > { %v1461_v25 = vpop.f32.mrf.mxu2 }
 0x142   : > { %v1707_v5 = vpop.f32.mrf.mxu3 }
 0x143   : > { %1286 = vrot.lane.b32.xlu1 %v1209_v17, %s4285_s10  ;;  %1288 = vrot.lane.b32.xlu2 %v1212_v62, %s4285_s10  ;;  %v1003_v27 = vpop.f32.mrf.mxu0 }
 0x144   : > { %v1218_v6 = vpop.f32.mrf.mxu1  ;;  %1534 = vrot.lane.b32.xlu0 %v1458_v22, %s4285_s10 }
 0x146   : > { %3949 = vmatmul.msk.f32.gmra.mxu0 %vm216_vm1, %v3931_v7  ;;  %4019 = vmatmul.msk.f32.gmra.mxu2 %vm216_vm1, %v4001_v9 }
 0x147   : > { %3983 = vmatmul.msk.f32.gmra.mxu1 %vm216_vm1, %v4865_v8  ;;  %4053 = vmatmul.msk.f32.gmra.mxu3 %vm216_vm1, %v4870_v37 }
 0x149   : > { %v1464_v12 = vpop.f32.mrf.mxu2 }
 0x14a   : > { %v1710_v13 = vpop.f32.mrf.mxu3 }
 0x14b   : > { %1780 = vrot.lane.b32.xlu1 %v1704_v23, %s4285_s10  ;;  %1059 = vrot.lane.b32.xlu2 %v1000_v1, %s4285_s10  ;;  %v1006_v44 = vpop.f32.mrf.mxu0  ;;  %v4009_v1 = vld [vmem:[%s4377_s20 + $0xd8] sm:$0xff] }
 0x14c   : > { %v1221_v26 = vpop.f32.mrf.mxu1  ;;  %1290 = vrot.lane.b32.xlu0 %v1215_v2, %s4285_s10  ;;  %v4043_v2 = vld [vmem:[%s4377_s20 + $0xd9] sm:$0xff] }
 0x14e   : > { %3950 = vmatmul.msk.f32.gmra.mxu0 %vm216_vm1, %v4000_v24  ;;  %4020 = vmatmul.msk.f32.gmra.mxu2 %vm216_vm1, %v4002_v28 }
 0x14f   : > { %3984 = vmatmul.msk.f32.gmra.mxu1 %vm216_vm1, %v4853_v35  ;;  %4054 = vmatmul.msk.f32.gmra.mxu3 %vm216_vm1, %v4883_v30 }
 0x151   : > { %v1467_v32 = vpop.f32.mrf.mxu2 }
 0x152   : > { %v1713_v29 = vpop.f32.mrf.mxu3 }
 0x153   : > { %1536 = vrot.lane.b32.xlu1 %v1461_v25, %s4285_s10  ;;  %1782 = vrot.lane.b32.xlu2 %v1707_v5, %s4285_s10  ;;  %v1009_v34 = vpop.f32.mrf.mxu0 }
 0x154   : > { %v1224_v36 = vpop.f32.mrf.mxu1  ;;  %1061 = vrot.lane.b32.xlu0 %v1003_v27, %s4285_s10 }
 0x156   : > { %3951 = vmatmul.msk.f32.gmra.mxu0 %vm216_vm1, %v4001_v9  ;;  %4021 = vmatmul.msk.f32.gmra.mxu2 %vm216_vm1, %v4003_v38  ;;  %v4010_v9 = vld [vmem:[%s4377_s20 + $0xe0] sm:$0xff] }
 0x157   : > { %3985 = vmatmul.msk.f32.gmra.mxu1 %vm216_vm1, %v4870_v37  ;;  %4055 = vmatmul.msk.f32.gmra.mxu3 %vm216_vm1, %v4896_v40 }
 0x159   : > { %v1470_v41 = vpop.f32.mrf.mxu2 }
 0x15a   : > { %v1716_v42 = vpop.f32.mrf.mxu3 }
 0x15b   : > { %1292 = vrot.lane.b32.xlu1 %v1218_v6, %s4285_s10  ;;  %1538 = vrot.lane.b32.xlu2 %v1464_v12, %s4285_s10  ;;  %v1012_v43 = vpop.f32.mrf.mxu0  ;;  %v4044_v12 = vld [vmem:[%s4377_s20 + $0xe1] sm:$0xff] }
 0x15c   : > { %v1227_v45 = vpop.f32.mrf.mxu1  ;;  %1784 = vrot.lane.b32.xlu0 %v1710_v13, %s4285_s10 }
 0x15e   : > { %3952 = vmatmul.msk.f32.gmra.mxu0 %vm216_vm1, %v4002_v28  ;;  %4022 = vmatmul.msk.f32.gmra.mxu2 %vm216_vm1, %v4004_v47 }
 0x15f   : > { %3986 = vmatmul.msk.f32.gmra.mxu1 %vm216_vm1, %v4883_v30  ;;  %4056 = vmatmul.msk.f32.gmra.mxu3 %vm216_vm1, %v4909_v48 }
 0x161   : > { %v1473_v39 = vpop.f32.mrf.mxu2 }
 0x162   : > { %v1719_v46 = vpop.f32.mrf.mxu3 }
 0x163   : > { %1294 = vrot.lane.b32.xlu2 %v1221_v26, %s4285_s10  ;;  %1063 = vrot.lane.b32.xlu1 %v1006_v44, %s4285_s10  ;;  %v1015_v31 = vpop.f32.mrf.mxu0 }
 0x164   : > { %v1230_v49 = vpop.f32.mrf.mxu1  ;;  %1540 = vrot.lane.b32.xlu0 %v1467_v32, %s4285_s10 }
 0x166   : > { %3953 = vmatmul.msk.f32.gmra.mxu0 %vm216_vm1, %v4003_v38  ;;  %4023 = vmatmul.msk.f32.gmra.mxu2 %vm216_vm1, %v4005_v50  ;;  %v4097_v38 = vld [vmem:[%s4377_s20 + $0x1a] sm:$0xff] }
 0x167   : > { %3987 = vmatmul.msk.f32.gmra.mxu1 %vm216_vm1, %v4896_v40  ;;  %4057 = vmatmul.msk.f32.gmra.mxu3 %vm216_vm1, %v4039_v51 }
 0x169   : > { %v1476_v10 = vpop.f32.mrf.mxu2 }
 0x16a   : > { %v1722_v52 = vpop.f32.mrf.mxu3 }
 0x16b   : > { %1786 = vrot.lane.b32.xlu1 %v1713_v29, %s4285_s10  ;;  %1065 = vrot.lane.b32.xlu2 %v1009_v34, %s4285_s10  ;;  %v1018_v11 = vpop.f32.mrf.mxu0 }
 0x16c   : > { %v1233_v53 = vpop.f32.mrf.mxu1  ;;  %1296 = vrot.lane.b32.xlu0 %v1224_v36, %s4285_s10 }
 0x16e   : > { %3954 = vmatmul.msk.f32.gmra.mxu0 %vm216_vm1, %v4004_v47  ;;  %4024 = vmatmul.msk.f32.gmra.mxu2 %vm216_vm1, %v4006_v54 }
 0x16f   : > { %3988 = vmatmul.msk.f32.gmra.mxu1 %vm216_vm1, %v4909_v48  ;;  %4058 = vmatmul.msk.f32.gmra.mxu3 %vm216_vm1, %v4040_v55 }
 0x171   : > { %v4937_v56 = vpop.f32.mrf.mxu2 }
 0x172   : > { %v4939_v57 = vpop.f32.mrf.mxu3 }
 0x173   : > { %1542 = vrot.lane.b32.xlu1 %v1470_v41, %s4285_s10  ;;  %1788 = vrot.lane.b32.xlu2 %v1716_v42, %s4285_s10  ;;  %v4943_v14 = vpop.f32.mrf.mxu0  ;;  %v4063_v41 = vld [vmem:[%s4377_s20 + $0x19] sm:$0xff]  ;;  %v5031_v42 = vld [vmem:[%s4377_s20 + $0x31] sm:$0xff] }
 0x174   : > { %v4945_v15 = vpop.f32.mrf.mxu1  ;;  %1067 = vrot.lane.b32.xlu0 %v1012_v43, %s4285_s10  ;;  %v4950_v58 = vpop.permute.xlu2 %1526  ;;  %v5034_v43 = vld [vmem:[%s4377_s20 + $0x32] sm:$0xff] }
 0x176   : > { %3955 = vmatmul.msk.f32.gmra.mxu0 %vm216_vm1, %v4005_v50  ;;  %4025 = vmatmul.msk.f32.gmra.mxu2 %vm216_vm1, %v4007_v18 }
 0x177   : > { %3989 = vmatmul.msk.f32.gmra.mxu1 %vm216_vm1, %v4039_v51  ;;  %4059 = vmatmul.msk.f32.gmra.mxu3 %vm216_vm1, %v4041_v19 }
 0x179   : > { %v4956_v33 = vpop.f32.mrf.mxu2 }
 0x17a   : > { %v4958_v16 = vpop.f32.mrf.mxu3 }
 0x17b   : > { %1298 = vrot.lane.b32.xlu1 %v1227_v45, %s4285_s10  ;;  %1544 = vrot.lane.b32.xlu2 %v1473_v39, %s4285_s10  ;;  %v4962_v17 = vpop.f32.mrf.mxu0 }
 0x17c   : > { %v4964_v59 = vpop.f32.mrf.mxu1  ;;  %1790 = vrot.lane.b32.xlu0 %v1719_v46, %s4285_s10  ;;  %v4969_v61 = vpop.permute.xlu2 %1282 }
 0x17e   : > { %3956 = vmatmul.msk.f32.gmra.mxu0 %vm216_vm1, %v4006_v54  ;;  %4026 = vmatmul.msk.f32.gmra.mxu2 %vm216_vm1, %v4008_v20 }
 0x17f   : > { %3990 = vmatmul.msk.f32.gmra.mxu1 %vm216_vm1, %v4040_v55  ;;  %4060 = vmatmul.msk.f32.gmra.mxu3 %vm216_vm1, %v4042_v21  ;;  %v5065_v55 = vld [vmem:[%s4377_s20 + $0x3a] sm:$0xff] }
 0x181   : > { %v4975_v62 = vpop.f32.mrf.mxu2 }
 0x182   : > { %v4977_v63 = vpop.f32.mrf.mxu3 }
 0x183   : > { %1300 = vrot.lane.b32.xlu2 %v1230_v49, %s4285_s10  ;;  %1069 = vrot.lane.b32.xlu1 %v1015_v31, %s4285_s10  ;;  %v4981_v22 = vpop.f32.mrf.mxu0 }
 0x184   : > { %v4983_v23 = vpop.f32.mrf.mxu1  ;;  %1546 = vrot.lane.b32.xlu0 %v1476_v10, %s4285_s10 }
 0x185   : > { %v4988_v3 = vpop.permute.xlu2 %1776 }
 0x186   : > { %v1050_v24 = vpop.permute.xlu0 %1049  ;;  %3957 = vmatmul.msk.f32.gmra.mxu0 %vm216_vm1, %v4007_v18  ;;  %4027 = vmatmul.msk.f32.gmra.mxu2 %vm216_vm1, %v4009_v1 }
 0x187   : > { %3991 = vmatmul.msk.f32.gmra.mxu1 %vm216_vm1, %v4041_v19  ;;  %1098 = vst.msk [vmem:[#allocation2] sm:$0xff] %vm1097_vm2, %v1050_v24  ;;  %4061 = vmatmul.msk.f32.gmra.mxu3 %vm216_vm1, %v4043_v2  ;;  %v1281_v25 = vpop.permute.xlu1 %1280 }
 0x189   : > { %v4995_v5 = vpop.f32.mrf.mxu2 }
 0x18a   : > { %v4997_v27 = vpop.f32.mrf.mxu3 }
 0x18b   : > { %1792 = vrot.lane.b32.xlu1 %v1722_v52, %s4285_s10  ;;  %1071 = vrot.lane.b32.xlu2 %v1018_v11, %s4285_s10  ;;  %v5001_v6 = vpop.f32.mrf.mxu0  ;;  %v4064_v11 = vld [vmem:[%s4377_s20 + $0x21] sm:$0xff] }
 0x18c   : > { %v5003_v7 = vpop.f32.mrf.mxu1  ;;  %1302 = vrot.lane.b32.xlu0 %v1233_v53, %s4285_s10  ;;  %v4098_v53 = vld [vmem:[%s4377_s20 + $0x22] sm:$0xff] }
 0x18d   : > { %v5008_v13 = vpop.permute.xlu2 %1532 }
 0x18e   : > { %v1248_v44 = vld [vmem:[#allocation2] sm:$0xff]  ;;  %v5011_v26 = vpop.permute.xlu0 %1772  ;;  %3958 = vmatmul.msk.f32.gmra.mxu0 %vm216_vm1, %v4008_v20  ;;  %4028 = vmatmul.msk.f32.gmra.mxu2 %vm216_vm1, %v4010_v9 }
 0x18f   : > { %3992 = vmatmul.msk.f32.gmra.mxu1 %vm216_vm1, %v4042_v21  ;;  %v1328_v28 = vadd.f32 %v1281_v25, %v1248_v44  ;;  %4062 = vmatmul.msk.f32.gmra.mxu3 %vm216_vm1, %v4044_v12  ;;  %v5092_v25 = vld [vmem:[%s4377_s20 + $0x4a] sm:$0xff] }
 0x191   : > { %1344 = vst.msk [vmem:[#allocation2] sm:$0xff] %vm1097_vm2, %v1328_v28  ;;  %v5017_v32 = vpop.f32.mrf.mxu2 }
 0x192   : > { %v5019_v29 = vpop.f32.mrf.mxu3 }
 0x193   : > { %1548 = vrot.lane.b32.xlu1 %v4937_v56, %s4285_s10  ;;  %1794 = vrot.lane.b32.xlu2 %v4939_v57, %s4285_s10  ;;  %v1938_v34 = vpop.f32.mrf.mxu0 }
 0x194   : > { %v2088_v36 = vpop.f32.mrf.mxu1  ;;  %1986 = vst.msk [vmem:[#allocation3] sm:$0xff] %vm216_vm1, %v1938_v34  ;;  %1073 = vrot.lane.b32.xlu0 %v4943_v14, %s4285_s10  ;;  %v5109_v34 = vld [vmem:[%s5752_s2] ss:$0 sm:$0xff] }
 0x195   : > { %v5036_v45 = vpop.permute.xlu1 %1774  ;;  %v1058_v47 = vpop.permute.xlu2 %1057 }
 0x196   : > { %1102 = vst.msk [vmem:[#allocation2 + $0x20] sm:$0xff] %vm1097_vm2, %v1058_v47  ;;  %v1052_v39 = vpop.permute.xlu0 %1051  ;;  %4081 = vmatmul.msk.f32.vlgmr.msrb.gmra.mxu0 %vm216_vm1, %v4063_v41  ;;  %4149 = vmatmul.msk.f32.vlgmr.msrb.gmra.mxu2 %vm216_vm1, %v5031_v42 }
 0x197   : > { %4115 = vmatmul.msk.f32.vlgmr.msrb.gmra.mxu1 %vm216_vm1, %v4097_v38  ;;  %1099 = vst.msk [vmem:[#allocation2 + $0x8] sm:$0xff] %vm1097_vm2, %v1052_v39  ;;  %4183 = vmatmul.msk.f32.vlgmr.msrb.gmra.mxu3 %vm216_vm1, %v5034_v43 }
 0x198   : > { %v1494_v46 = vld [vmem:[#allocation2] sm:$0xff] }
 0x199   : > { %v1574_v31 = vadd.f32 %v4950_v58, %v1494_v46  ;;  %v2273_v49 = vpop.f32.mrf.mxu2 }
 0x19a   : > { %v5048_v50 = vpop.f32.mrf.mxu3 }
 0x19b   : > { %1590 = vst.msk [vmem:[#allocation2] sm:$0xff] %vm1097_vm2, %v1574_v31  ;;  %v2136_v51 = vld [vmem:[#allocation3] sm:$0xff]  ;;  %1304 = vrot.lane.b32.xlu1 %v4945_v15, %s4285_s10  ;;  %1550 = vrot.lane.b32.xlu2 %v4956_v33, %s4285_s10  ;;  %v1941_v10 = vpop.f32.mrf.mxu0 }
 0x19c   : > { %v2091_v52 = vpop.f32.mrf.mxu1  ;;  %v2152_v54 = vadd.f32 %v2136_v51, %v2088_v36  ;;  %1987 = vst.msk [vmem:[#allocation3 + $0x8] sm:$0xff] %vm216_vm1, %v1941_v10  ;;  %1796 = vrot.lane.b32.xlu0 %v4958_v16, %s4285_s10 }
 0x19d   : > { %v1054_v56 = vpop.permute.xlu1 %1053  ;;  %v1252_v57 = vld [vmem:[#allocation2 + $0x20] sm:$0xff]  ;;  %v1289_v14 = vpop.permute.xlu2 %1288 }
 0x19e   : > { %2168 = vst.msk [vmem:[#allocation3] sm:$0xff] %vm216_vm1, %v2152_v54  ;;  %v1249_v15 = vld [vmem:[#allocation2 + $0x8] sm:$0xff]  ;;  %v1332_v18 = vadd.f32 %v1289_v14, %v1252_v57  ;;  %v1529_v19 = vpop.permute.xlu0 %1528  ;;  %4082 = vmatmul.msk.f32.gmra.mxu0 %vm216_vm1, %v4064_v11  ;;  %4150 = vmatmul.msk.f32.gmra.mxu2 %vm216_vm1, %v4820_v60 }
 0x19f   : > { %4116 = vmatmul.msk.f32.gmra.mxu1 %vm216_vm1, %v4098_v53  ;;  %v1329_v58 = vadd.f32 %v4969_v61, %v1249_v15  ;;  %1100 = vst.msk [vmem:[#allocation2 + $0x10] sm:$0xff] %vm1097_vm2, %v1054_v56  ;;  %4184 = vmatmul.msk.f32.gmra.mxu3 %vm216_vm1, %v5065_v55 }
 0x1a0   : > { %1348 = vst.msk [vmem:[#allocation2 + $0x20] sm:$0xff] %vm1097_vm2, %v1332_v18 }
 0x1a1   : > { %1345 = vst.msk [vmem:[#allocation2 + $0x8] sm:$0xff] %vm1097_vm2, %v1329_v58  ;;  %v2276_v16 = vpop.f32.mrf.mxu2 }
 0x1a2   : > { %v1740_v33 = vld [vmem:[#allocation2] sm:$0xff]  ;;  %v5080_v20 = vpop.f32.mrf.mxu3 }
 0x1a3   : > { %v1820_v21 = vadd.f32 %v5011_v26, %v1740_v33  ;;  %v2137_v61 = vld [vmem:[#allocation3 + $0x8] sm:$0xff]  ;;  %1306 = vrot.lane.b32.xlu2 %v4964_v59, %s4285_s10  ;;  %1075 = vrot.lane.b32.xlu1 %v4962_v17, %s4285_s10  ;;  %v1944_v1 = vpop.f32.mrf.mxu0 }
 0x1a4   : > { %v2094_v2 = vpop.f32.mrf.mxu1  ;;  %v2153_v24 = vadd.f32 %v2137_v61, %v2091_v52  ;;  %1988 = vst.msk [vmem:[#allocation3 + $0x10] sm:$0xff] %vm216_vm1, %v1944_v1  ;;  %1552 = vrot.lane.b32.xlu0 %v4975_v62, %s4285_s10 }
 0x1a5   : > { %1836 = vst.msk [vmem:[#allocation2] sm:$0xff] %vm1097_vm2, %v1820_v21  ;;  %v2321_v9 = vld [vmem:[#allocation3] sm:$0xff]  ;;  %v1531_v12 = vpop.permute.xlu1 %1530  ;;  %v1060_v44 = vpop.permute.xlu2 %1059 }
 0x1a6   : > { %v2337_v59 = vadd.f32 %v2321_v9, %v2273_v49  ;;  %2169 = vst.msk [vmem:[#allocation3 + $0x8] sm:$0xff] %vm216_vm1, %v2153_v24  ;;  %v1285_v17 = vpop.permute.xlu0 %1284  ;;  %v1250_v26 = vld [vmem:[#allocation2 + $0x10] sm:$0xff]  ;;  %4083 = vmatmul.msk.f32.gmra.mxu0 %vm216_vm1, %v5031_v42  ;;  %4151 = vmatmul.msk.f32.gmra.mxu2 %vm216_vm1, %v4834_v0 }
 0x1a7   : > { %4117 = vmatmul.msk.f32.gmra.mxu1 %vm216_vm1, %v5034_v43  ;;  %1103 = vst.msk [vmem:[#allocation2 + $0x28] sm:$0xff] %vm1097_vm2, %v1060_v44  ;;  %v1330_v62 = vadd.f32 %v1285_v17, %v1250_v26  ;;  %4185 = vmatmul.msk.f32.gmra.mxu3 %vm216_vm1, %v5092_v25 }
 0x1a8   : > { %2353 = vst.msk [vmem:[#allocation3] sm:$0xff] %vm216_vm1, %v2337_v59  ;;  %v1495_v28 = vld [vmem:[#allocation2 + $0x8] sm:$0xff] }
 0x1a9   : > { %v1575_v36 = vadd.f32 %v1529_v19, %v1495_v28  ;;  %1346 = vst.msk [vmem:[#allocation2 + $0x10] sm:$0xff] %vm1097_vm2, %v1330_v62  ;;  %v2279_v38 = vpop.f32.mrf.mxu2  ;;  %v5162_v19 = vld [vmem:[%s4377_s20 + $0x62] sm:$0xff] }
 0x1aa   : > { %v5112_v41 = vpop.f32.mrf.mxu3 }
 0x1ab   : > { %1591 = vst.msk [vmem:[#allocation2 + $0x8] sm:$0xff] %vm1097_vm2, %v1575_v36  ;;  %v2138_v42 = vld [vmem:[#allocation3 + $0x10] sm:$0xff]  ;;  %1798 = vrot.lane.b32.xlu1 %v4977_v63, %s4285_s10  ;;  %1077 = vrot.lane.b32.xlu2 %v4981_v22, %s4285_s10  ;;  %v1947_v43 = vpop.f32.mrf.mxu0 }
 0x1ac   : > { %v2097_v47 = vpop.f32.mrf.mxu1  ;;  %v3503_v39 = vld [vmem:[#allocation2] sm:$0xff]  ;;  %v2154_v46 = vadd.f32 %v2138_v42, %v2094_v2  ;;  %1989 = vst.msk [vmem:[#allocation3 + $0x18] sm:$0xff] %vm216_vm1, %v1947_v43  ;;  %1308 = vrot.lane.b32.xlu0 %v4983_v23, %s4285_s10  ;;  %v5128_v63 = vld [vmem:[%s4377_s20 + $0x52] sm:$0xff] }
 0x1ad   : > { %v3539_v22 = vadd.f32 %v5109_v34, %v3503_v39  ;;  %v2322_v31 = vld [vmem:[#allocation3 + $0x8] sm:$0xff]  ;;  %v1056_v49 = vpop.permute.xlu1 %1055  ;;  %v5131_v51 = vpop.permute.xlu2 %1782 }
 0x1ae   : > { %v2338_v10 = vadd.f32 %v2322_v31, %v2276_v16  ;;  %2170 = vst.msk [vmem:[#allocation3 + $0x10] sm:$0xff] %vm216_vm1, %v2154_v46  ;;  %v5134_v52 = vpop.permute.xlu0 %1778  ;;  %4084 = vmatmul.msk.f32.gmra.mxu0 %vm216_vm1, %v4820_v60  ;;  %4152 = vmatmul.msk.f32.gmra.mxu2 %vm216_vm1, %v4848_v4  ;;  %v1498_v16 = vld [vmem:[#allocation2 + $0x20] sm:$0xff] }
 0x1af   : > { %4118 = vmatmul.msk.f32.gmra.mxu1 %vm216_vm1, %v5065_v55  ;;  %3572 = vst.msk [vmem:[%s5122_s27] sm:$0xff] %vm3571_vm3, %v3539_v22  ;;  %v2503_v23 = vld [vmem:[#allocation3] sm:$0xff]  ;;  %4186 = vmatmul.msk.f32.gmra.mxu3 %vm216_vm1, %v5128_v63 }
 0x1b0   : > { %v2519_v11 = vadd.f32 %v2503_v23, %v5048_v50  ;;  %2354 = vst.msk [vmem:[#allocation3 + $0x8] sm:$0xff] %vm216_vm1, %v2338_v10  ;;  %v1496_v53 = vld [vmem:[#allocation2 + $0x10] sm:$0xff] }
 0x1b1   : > { %v1576_v54 = vadd.f32 %v1531_v12, %v1496_v53  ;;  %1101 = vst.msk [vmem:[#allocation2 + $0x18] sm:$0xff] %vm1097_vm2, %v1056_v49  ;;  %v2282_v55 = vpop.f32.mrf.mxu2 }
 0x1b2   : > { %2535 = vst.msk [vmem:[#allocation3] sm:$0xff] %vm216_vm1, %v2519_v11  ;;  %v1741_v60 = vld [vmem:[#allocation2 + $0x8] sm:$0xff]  ;;  %v5150_v56 = vpop.f32.mrf.mxu3 }
 0x1b3   : > { %v1821_v57 = vadd.f32 %v5036_v45, %v1741_v60  ;;  %1592 = vst.msk [vmem:[#allocation2 + $0x10] sm:$0xff] %vm1097_vm2, %v1576_v54  ;;  %v2139_v14 = vld [vmem:[#allocation3 + $0x18] sm:$0xff]  ;;  %1554 = vrot.lane.b32.xlu1 %v4995_v5, %s4285_s10  ;;  %1800 = vrot.lane.b32.xlu2 %v4997_v27, %s4285_s10  ;;  %v1950_v50 = vpop.f32.mrf.mxu0 }
 0x1b4   : > { %v2100_v15 = vpop.f32.mrf.mxu1  ;;  %v2155_v18 = vadd.f32 %v2139_v14, %v2097_v47  ;;  %1990 = vst.msk [vmem:[#allocation3 + $0x20] sm:$0xff] %vm216_vm1, %v1950_v50  ;;  %1079 = vrot.lane.b32.xlu0 %v5001_v6, %s4285_s10 }
 0x1b5   : > { %1837 = vst.msk [vmem:[#allocation2 + $0x8] sm:$0xff] %vm1097_vm2, %v1821_v57  ;;  %v2323_v45 = vld [vmem:[#allocation3 + $0x10] sm:$0xff]  ;;  %v1287_v58 = vpop.permute.xlu1 %1286  ;;  %v5165_v33 = vpop.permute.xlu2 %1538 }
 0x1b6   : > { %v2339_v5 = vadd.f32 %v2323_v45, %v2279_v38  ;;  %2171 = vst.msk [vmem:[#allocation3 + $0x18] sm:$0xff] %vm216_vm1, %v2155_v18  ;;  %v1535_v27 = vpop.permute.xlu0 %1534  ;;  %4085 = vmatmul.msk.f32.gmra.mxu0 %vm216_vm1, %v4834_v0  ;;  %4153 = vmatmul.msk.f32.gmra.mxu2 %vm216_vm1, %v4865_v8  ;;  %v1253_v38 = vld [vmem:[#allocation2 + $0x28] sm:$0xff] }
 0x1b7   : > { %4119 = vmatmul.msk.f32.gmra.mxu1 %vm216_vm1, %v5092_v25  ;;  %v2504_v6 = vld [vmem:[#allocation3 + $0x8] sm:$0xff]  ;;  %v1578_v21 = vadd.f32 %v1535_v27, %v1498_v16  ;;  %4187 = vmatmul.msk.f32.gmra.mxu3 %vm216_vm1, %v5162_v19 }
 0x1b8   : > { %v2520_v61 = vadd.f32 %v2504_v6, %v5080_v20  ;;  %2355 = vst.msk [vmem:[#allocation3 + $0x10] sm:$0xff] %vm216_vm1, %v2339_v5  ;;  %v1251_v1 = vld [vmem:[#allocation2 + $0x18] sm:$0xff]  ;;  %v4070_v5 = vld [vmem:[%s4377_s20 + $0x69] sm:$0xff] }
 0x1b9   : > { %v1331_v2 = vadd.f32 %v1287_v58, %v1251_v1  ;;  %1594 = vst.msk [vmem:[#allocation2 + $0x20] sm:$0xff] %vm1097_vm2, %v1578_v21  ;;  %v2285_v24 = vpop.f32.mrf.mxu2 }
 0x1ba   : > { %2536 = vst.msk [vmem:[#allocation3 + $0x8] sm:$0xff] %vm216_vm1, %v2520_v61  ;;  %v1742_v0 = vld [vmem:[#allocation2 + $0x10] sm:$0xff]  ;;  %v5180_v25 = vpop.f32.mrf.mxu3 }
 0x1bb   : > { %v1822_v9 = vadd.f32 %v4988_v3, %v1742_v0  ;;  %v2140_v12 = vld [vmem:[#allocation3 + $0x20] sm:$0xff]  ;;  %1347 = vst.msk [vmem:[#allocation2 + $0x18] sm:$0xff] %vm1097_vm2, %v1331_v2  ;;  %1310 = vrot.lane.b32.xlu1 %v5003_v7, %s4285_s10  ;;  %1556 = vrot.lane.b32.xlu2 %v5017_v32, %s4285_s10  ;;  %v1953_v20 = vpop.f32.mrf.mxu0  ;;  %v5192_v3 = vld [vmem:[%s4377_s20 + $0x6a] sm:$0xff] }
 0x1bc   : > { %v2103_v44 = vpop.f32.mrf.mxu1  ;;  %v3504_v59 = vld [vmem:[#allocation2 + $0x8] sm:$0xff]  ;;  %v2156_v17 = vadd.f32 %v2140_v12, %v2100_v15  ;;  %1991 = vst.msk [vmem:[#allocation3 + $0x28] sm:$0xff] %vm216_vm1, %v1953_v20  ;;  %1802 = vrot.lane.b32.xlu0 %v5019_v29, %s4285_s10 }
 0x1bd   : > { %v3540_v26 = vadd.f32 %v5109_v34, %v3504_v59  ;;  %1838 = vst.msk [vmem:[#allocation2 + $0x10] sm:$0xff] %vm1097_vm2, %v1822_v9  ;;  %v2324_v7 = vld [vmem:[#allocation3 + $0x18] sm:$0xff]  ;;  %v1781_v62 = vpop.permute.xlu1 %1780  ;;  %v5196_v28 = vpop.permute.xlu2 %1294 }
 0x1be   : > { %v2340_v32 = vadd.f32 %v2324_v7, %v2282_v55  ;;  %2172 = vst.msk [vmem:[#allocation3 + $0x20] sm:$0xff] %vm216_vm1, %v2156_v17  ;;  %v1291_v36 = vpop.permute.xlu0 %1290  ;;  %4086 = vmatmul.msk.f32.gmra.mxu0 %vm216_vm1, %v4848_v4  ;;  %4154 = vmatmul.msk.f32.gmra.mxu2 %vm216_vm1, %v4853_v35 }
 0x1bf   : > { %4120 = vmatmul.msk.f32.gmra.mxu1 %vm216_vm1, %v5128_v63  ;;  %3573 = vst.msk [vmem:[%s5122_s27 + $0x8] sm:$0xff] %vm3571_vm3, %v3540_v26  ;;  %v2505_v29 = vld [vmem:[#allocation3 + $0x10] sm:$0xff]  ;;  %v1333_v42 = vadd.f32 %v1291_v36, %v1253_v38  ;;  %4188 = vmatmul.msk.f32.gmra.mxu3 %vm216_vm1, %v5192_v3 }
 0x1c0   : > { %v2521_v43 = vadd.f32 %v2505_v29, %v5112_v41  ;;  %2356 = vst.msk [vmem:[#allocation3 + $0x18] sm:$0xff] %vm216_vm1, %v2340_v32  ;;  %v1744_v47 = vld [vmem:[#allocation2 + $0x20] sm:$0xff] }
 0x1c1   : > { %v1824_v39 = vadd.f32 %v1781_v62, %v1744_v47  ;;  %1349 = vst.msk [vmem:[#allocation2 + $0x28] sm:$0xff] %vm1097_vm2, %v1333_v42  ;;  %v2288_v46 = vpop.f32.mrf.mxu2 }
 0x1c2   : > { %2537 = vst.msk [vmem:[#allocation3 + $0x10] sm:$0xff] %vm216_vm1, %v2521_v43  ;;  %v1497_v4 = vld [vmem:[#allocation2 + $0x18] sm:$0xff]  ;;  %v5213_v63 = vpop.f32.mrf.mxu3 }
 0x1c3   : > { %v1577_v22 = vadd.f32 %v5008_v13, %v1497_v4  ;;  %v2141_v35 = vld [vmem:[#allocation3 + $0x28] sm:$0xff]  ;;  %1840 = vst.msk [vmem:[#allocation2 + $0x20] sm:$0xff] %vm1097_vm2, %v1824_v39  ;;  %v1956_v31 = vpop.f32.mrf.mxu0 }
 0x1c4   : > { %v2106_v41 = vpop.f32.mrf.mxu1  ;;  %v3505_v49 = vld [vmem:[#allocation2 + $0x10] sm:$0xff]  ;;  %v2157_v10 = vadd.f32 %v2141_v35, %v2103_v44  ;;  %1992 = vst.msk [vmem:[#allocation3 + $0x30] sm:$0xff] %vm216_vm1, %v1956_v31  ;;  %v4106_v44 = vld [vmem:[%s4377_s20 + $0x82] sm:$0xff] }
 0x1c5   : > { %v3543_v23 = vadd.f32 %v5109_v34, %v3505_v49  ;;  %1593 = vst.msk [vmem:[#allocation2 + $0x18] sm:$0xff] %vm1097_vm2, %v1577_v22  ;;  %v2325_v11 = vld [vmem:[#allocation3 + $0x20] sm:$0xff]  ;;  %v1537_v53 = vpop.permute.xlu1 %1536  ;;  %v1066_v54 = vpop.permute.xlu2 %1065 }
 0x1c6   : > { %v2341_v60 = vadd.f32 %v2325_v11, %v2285_v24  ;;  %2173 = vst.msk [vmem:[#allocation3 + $0x28] sm:$0xff] %vm216_vm1, %v2157_v10  ;;  %v1062_v13 = vpop.permute.xlu0 %1061  ;;  %4087 = vmatmul.msk.f32.gmra.mxu0 %vm216_vm1, %v4865_v8  ;;  %4155 = vmatmul.msk.f32.gmra.mxu2 %vm216_vm1, %v4870_v37 }
 0x1c7   : > { %4121 = vmatmul.msk.f32.gmra.mxu1 %vm216_vm1, %v5162_v19  ;;  %3576 = vst.msk [vmem:[%s5122_s27 + $0x20] sm:$0xff] %vm3571_vm3, %v3543_v23  ;;  %v2506_v55 = vld [vmem:[#allocation3 + $0x18] sm:$0xff] }
 0x1c8   : > { %v2522_v57 = vadd.f32 %v2506_v55, %v5150_v56  ;;  %2357 = vst.msk [vmem:[#allocation3 + $0x20] sm:$0xff] %vm216_vm1, %v2341_v60  ;;  %v1499_v14 = vld [vmem:[#allocation2 + $0x28] sm:$0xff]  ;;  %v4105_v19 = vld [vmem:[%s4377_s20 + $0x7a] sm:$0xff] }
 0x1c9   : > { %v1579_v50 = vadd.f32 %v1537_v53, %v1499_v14  ;;  %1106 = vst.msk [vmem:[#allocation2 + $0x40] sm:$0xff] %vm1097_vm2, %v1066_v54  ;;  %v2291_v8 = vpop.f32.mrf.mxu2  ;;  %4189 = vmatmul.msk.f32.gmra.mxu3 %vm216_vm1, %v4105_v19 }
 0x1ca   : > { %2538 = vst.msk [vmem:[#allocation3 + $0x18] sm:$0xff] %vm216_vm1, %v2522_v57  ;;  %v3507_v15 = vld [vmem:[#allocation2 + $0x20] sm:$0xff]  ;;  %v5233_v18 = vpop.f32.mrf.mxu3 }
 0x1cb   : > { %v3547_v45 = vadd.f32 %v5109_v34, %v3507_v15  ;;  %v2142_v37 = vld [vmem:[#allocation3 + $0x30] sm:$0xff]  ;;  %1595 = vst.msk [vmem:[#allocation2 + $0x28] sm:$0xff] %vm1097_vm2, %v1579_v50  ;;  %v1959_v56 = vpop.f32.mrf.mxu0 }
 0x1cc   : > { %v2109_v58 = vpop.f32.mrf.mxu1  ;;  %v1743_v27 = vld [vmem:[#allocation2 + $0x18] sm:$0xff]  ;;  %v2158_v16 = vadd.f32 %v2142_v37, %v2106_v41  ;;  %1104 = vst.msk [vmem:[#allocation2 + $0x30] sm:$0xff] %vm1097_vm2, %v1062_v13  ;;  %v4072_v41 = vld [vmem:[%s4377_s20 + $0x81] sm:$0xff] }
 0x1cd   : > { %v1823_v6 = vadd.f32 %v5134_v52, %v1743_v27  ;;  %3580 = vst.msk [vmem:[%s5122_s27 + $0x40] sm:$0xff] %vm3571_vm3, %v3547_v45  ;;  %v2326_v21 = vld [vmem:[#allocation3 + $0x28] sm:$0xff]  ;;  %v1293_v61 = vpop.permute.xlu1 %1292  ;;  %v5244_v1 = vpop.permute.xlu2 %1788 }
 0x1ce   : > { %v2342_v2 = vadd.f32 %v2326_v21, %v2288_v46  ;;  %2174 = vst.msk [vmem:[#allocation3 + $0x30] sm:$0xff] %vm216_vm1, %v2158_v16  ;;  %v5247_v0 = vpop.permute.xlu0 %1784  ;;  %4088 = vmatmul.msk.f32.gmra.mxu0 %vm216_vm1, %v4070_v5  ;;  %4156 = vmatmul.msk.f32.gmra.mxu2 %vm216_vm1, %v4883_v30  ;;  %v4071_v30 = vld [vmem:[%s4377_s20 + $0x79] sm:$0xff]  ;;  %v5318_v5 = vld [vmem:[%s4377_s20 + $0xa9] sm:$0xff] }
 0x1cf   : > { %4122 = vmatmul.msk.f32.gmra.mxu1 %vm216_vm1, %v5192_v3  ;;  %1839 = vst.msk [vmem:[#allocation2 + $0x18] sm:$0xff] %vm1097_vm2, %v1823_v6  ;;  %v2507_v52 = vld [vmem:[#allocation3 + $0x20] sm:$0xff] }
 0x1d0   : > { %v2523_v24 = vadd.f32 %v2507_v52, %v5180_v25  ;;  %2358 = vst.msk [vmem:[#allocation3 + $0x28] sm:$0xff] %vm216_vm1, %v2342_v2  ;;  %v1256_v55 = vld [vmem:[#allocation2 + $0x40] sm:$0xff] }
 0x1d1   : > { %1993 = vst.msk [vmem:[#allocation3 + $0x38] sm:$0xff] %vm216_vm1, %v1959_v56  ;;  %v5259_v12 = vpop.f32.mrf.mxu2  ;;  %4190 = vmatmul.msk.f32.gmra.mxu3 %vm216_vm1, %v4106_v44  ;;  %v4073_v56 = vld [vmem:[%s4377_s20 + $0x91] sm:$0xff] }
 0x1d2   : > { %2539 = vst.msk [vmem:[#allocation3 + $0x20] sm:$0xff] %vm216_vm1, %v2523_v24  ;;  %v1745_v9 = vld [vmem:[#allocation2 + $0x28] sm:$0xff]  ;;  %v5261_v20 = vpop.f32.mrf.mxu3 }
 0x1d3   : > { %v1825_v59 = vadd.f32 %v5131_v51, %v1745_v9  ;;  %v1254_v17 = vld [vmem:[#allocation2 + $0x30] sm:$0xff]  ;;  %v1962_v3 = vpop.f32.mrf.mxu0 }
 0x1d4   : > { %v2112_v26 = vpop.f32.mrf.mxu1  ;;  %v1334_v25 = vadd.f32 %v1293_v61, %v1254_v17  ;;  %1994 = vst.msk [vmem:[#allocation3 + $0x40] sm:$0xff] %vm216_vm1, %v1962_v3 }
 0x1d5   : > { %1841 = vst.msk [vmem:[#allocation2 + $0x28] sm:$0xff] %vm1097_vm2, %v1825_v59  ;;  %v2327_v7 = vld [vmem:[#allocation3 + $0x30] sm:$0xff]  ;;  %v1064_v62 = vpop.permute.xlu1 %1063  ;;  %v5269_v32 = vpop.permute.xlu2 %1544 }
 0x1d6   : > { %v3506_v36 = vld [vmem:[#allocation2 + $0x18] sm:$0xff]  ;;  %v2343_v38 = vadd.f32 %v2327_v7, %v2291_v8  ;;  %1350 = vst.msk [vmem:[#allocation2 + $0x30] sm:$0xff] %vm1097_vm2, %v1334_v25  ;;  %v5272_v51 = vpop.permute.xlu0 %1540  ;;  %4089 = vmatmul.msk.f32.gmra.mxu0 %vm216_vm1, %v4071_v30  ;;  %4157 = vmatmul.msk.f32.gmra.mxu2 %vm216_vm1, %v4896_v40  ;;  %v4109_v25 = vld [vmem:[%s4377_s20 + $0xaa] sm:$0xff] }
 0x1d7   : > { %4123 = vmatmul.msk.f32.gmra.mxu1 %vm216_vm1, %v4105_v19  ;;  %v3544_v29 = vadd.f32 %v5109_v34, %v3506_v36  ;;  %v2508_v42 = vld [vmem:[#allocation3 + $0x28] sm:$0xff]  ;;  %1105 = vst.msk [vmem:[#allocation2 + $0x38] sm:$0xff] %vm1097_vm2, %v1064_v62  ;;  %v4107_v40 = vld [vmem:[%s4377_s20 + $0x92] sm:$0xff] }
 0x1d8   : > { %v2524_v43 = vadd.f32 %v2508_v42, %v5213_v63  ;;  %2359 = vst.msk [vmem:[#allocation3 + $0x30] sm:$0xff] %vm216_vm1, %v2343_v38  ;;  %v2143_v47 = vld [vmem:[#allocation3 + $0x38] sm:$0xff] }
 0x1d9   : > { %3577 = vst.msk [vmem:[%s5122_s27 + $0x28] sm:$0xff] %vm3571_vm3, %v3544_v29  ;;  %v2159_v39 = vadd.f32 %v2143_v47, %v2109_v58  ;;  %v2297_v4 = vpop.f32.mrf.mxu2  ;;  %4191 = vmatmul.msk.f32.gmra.mxu3 %vm216_vm1, %v4107_v40  ;;  %v4074_v30 = vld [vmem:[%s4377_s20 + $0x99] sm:$0xff]  ;;  %v5340_v36 = vld [vmem:[%s4377_s20 + $0xb1] sm:$0xff] }
 0x1da   : > { %2540 = vst.msk [vmem:[#allocation3 + $0x28] sm:$0xff] %vm216_vm1, %v2524_v43  ;;  %v5285_v46 = vpop.f32.mrf.mxu3 }
 0x1db   : > { %2175 = vst.msk [vmem:[#allocation3 + $0x38] sm:$0xff] %vm216_vm1, %v2159_v39  ;;  %v2144_v22 = vld [vmem:[#allocation3 + $0x40] sm:$0xff]  ;;  %v1965_v35 = vpop.f32.mrf.mxu0 }
 0x1dc   : > { %v2115_v31 = vpop.f32.mrf.mxu1  ;;  %v3508_v63 = vld [vmem:[#allocation2 + $0x28] sm:$0xff]  ;;  %v2160_v49 = vadd.f32 %v2144_v22, %v2112_v26  ;;  %1995 = vst.msk [vmem:[#allocation3 + $0x48] sm:$0xff] %vm216_vm1, %v1965_v35 }
 0x1dd   : > { %v3548_v10 = vadd.f32 %v5109_v34, %v3508_v63  ;;  %v1500_v23 = vld [vmem:[#allocation2 + $0x30] sm:$0xff]  ;;  %v5293_v11 = vpop.permute.xlu1 %1786  ;;  %v5295_v53 = vpop.permute.xlu2 %1300 }
 0x1de   : > { %v1580_v54 = vadd.f32 %v5165_v33, %v1500_v23  ;;  %2176 = vst.msk [vmem:[#allocation3 + $0x40] sm:$0xff] %vm216_vm1, %v2160_v49  ;;  %v1255_v60 = vld [vmem:[#allocation2 + $0x38] sm:$0xff]  ;;  %v1297_v13 = vpop.permute.xlu0 %1296  ;;  %4090 = vmatmul.msk.f32.gmra.mxu0 %vm216_vm1, %v4072_v41  ;;  %4158 = vmatmul.msk.f32.gmra.mxu2 %vm216_vm1, %v4909_v48 }
 0x1df   : > { %4124 = vmatmul.msk.f32.gmra.mxu1 %vm216_vm1, %v4106_v44  ;;  %3581 = vst.msk [vmem:[%s5122_s27 + $0x48] sm:$0xff] %vm3571_vm3, %v3548_v10  ;;  %v2509_v57 = vld [vmem:[#allocation3 + $0x30] sm:$0xff]  ;;  %v1335_v14 = vadd.f32 %v5196_v28, %v1255_v60  ;;  %v1336_v50 = vadd.f32 %v1297_v13, %v1256_v55  ;;  %v5367_v55 = vld [vmem:[%s4377_s20 + $0xc1] sm:$0xff] }
 0x1e0   : > { %v2525_v33 = vadd.f32 %v2509_v57, %v5233_v18  ;;  %1596 = vst.msk [vmem:[#allocation2 + $0x30] sm:$0xff] %vm1097_vm2, %v1580_v54  ;;  %v4108_v18 = vld [vmem:[%s4377_s20 + $0x9a] sm:$0xff]  ;;  %v4110_v54 = vld [vmem:[%s4377_s20 + $0xb2] sm:$0xff] }
 0x1e1   : > { %1351 = vst.msk [vmem:[#allocation2 + $0x38] sm:$0xff] %vm1097_vm2, %v1335_v14  ;;  %v2300_v8 = vpop.f32.mrf.mxu2  ;;  %4192 = vmatmul.msk.f32.gmra.mxu3 %vm216_vm1, %v4108_v18 }
 0x1e2   : > { %2541 = vst.msk [vmem:[#allocation3 + $0x30] sm:$0xff] %vm216_vm1, %v2525_v33  ;;  %v2328_v15 = vld [vmem:[#allocation3 + $0x38] sm:$0xff]  ;;  %v5310_v19 = vpop.f32.mrf.mxu3 }
 0x1e3   : > { %v2344_v28 = vadd.f32 %v2328_v15, %v5259_v12  ;;  %v2145_v45 = vld [vmem:[#allocation3 + $0x48] sm:$0xff]  ;;  %1352 = vst.msk [vmem:[#allocation2 + $0x40] sm:$0xff] %vm1097_vm2, %v1336_v50  ;;  %v1968_v37 = vpop.f32.mrf.mxu0 }
 0x1e4   : > { %v2118_v48 = vpop.f32.mrf.mxu1  ;;  %v2161_v58 = vadd.f32 %v2145_v45, %v2115_v31  ;;  %1996 = vst.msk [vmem:[#allocation3 + $0x50] sm:$0xff] %vm216_vm1, %v1968_v37 }
 0x1e5   : > { %2360 = vst.msk [vmem:[#allocation3 + $0x38] sm:$0xff] %vm216_vm1, %v2344_v28  ;;  %v2329_v27 = vld [vmem:[#allocation3 + $0x40] sm:$0xff]  ;;  %v1543_v16 = vpop.permute.xlu1 %1542  ;;  %v1072_v6 = vpop.permute.xlu2 %1071 }
 0x1e6   : > { %v2345_v21 = vadd.f32 %v2329_v27, %v2297_v4  ;;  %2177 = vst.msk [vmem:[#allocation3 + $0x48] sm:$0xff] %vm216_vm1, %v2161_v58  ;;  %v1068_v61 = vpop.permute.xlu0 %1067  ;;  %4091 = vmatmul.msk.f32.gmra.mxu0 %vm216_vm1, %v4073_v56  ;;  %4159 = vmatmul.msk.f32.gmra.mxu2 %vm216_vm1, %v5318_v5  ;;  %v4111_v58 = vld [vmem:[%s4377_s20 + $0xc2] sm:$0xff] }
 0x1e7   : > { %4125 = vmatmul.msk.f32.gmra.mxu1 %vm216_vm1, %v4107_v40  ;;  %v1746_v2 = vld [vmem:[#allocation2 + $0x30] sm:$0xff]  ;;  %1109 = vst.msk [vmem:[#allocation2 + $0x58] sm:$0xff] %vm1097_vm2, %v1072_v6 }
 0x1e8   : > { %v1826_v52 = vadd.f32 %v5247_v0, %v1746_v2  ;;  %v1501_v24 = vld [vmem:[#allocation2 + $0x38] sm:$0xff]  ;;  %2361 = vst.msk [vmem:[#allocation3 + $0x40] sm:$0xff] %vm216_vm1, %v2345_v21 }
 0x1e9   : > { %v1581_v9 = vadd.f32 %v5272_v51, %v1501_v24  ;;  %1107 = vst.msk [vmem:[#allocation2 + $0x48] sm:$0xff] %vm1097_vm2, %v1068_v61  ;;  %v2303_v44 = vpop.f32.mrf.mxu2  ;;  %4193 = vmatmul.msk.f32.gmra.mxu3 %vm216_vm1, %v4109_v25 }
 0x1ea   : > { %1842 = vst.msk [vmem:[#allocation2 + $0x30] sm:$0xff] %vm1097_vm2, %v1826_v52  ;;  %v1502_v12 = vld [vmem:[#allocation2 + $0x40] sm:$0xff]  ;;  %v5333_v59 = vpop.f32.mrf.mxu3 }
 0x1eb   : > { %1597 = vst.msk [vmem:[#allocation2 + $0x38] sm:$0xff] %vm1097_vm2, %v1581_v9  ;;  %v2146_v17 = vld [vmem:[#allocation3 + $0x50] sm:$0xff]  ;;  %v1582_v3 = vadd.f32 %v1543_v16, %v1502_v12  ;;  %v1971_v26 = vpop.f32.mrf.mxu0 }
 0x1ec   : > { %v2121_v0 = vpop.f32.mrf.mxu1  ;;  %v2510_v7 = vld [vmem:[#allocation3 + $0x38] sm:$0xff]  ;;  %v2162_v62 = vadd.f32 %v2146_v17, %v2118_v48  ;;  %1997 = vst.msk [vmem:[#allocation3 + $0x58] sm:$0xff] %vm216_vm1, %v1971_v26 }
 0x1ed   : > { %v2526_v38 = vadd.f32 %v2510_v7, %v5261_v20  ;;  %v2330_v51 = vld [vmem:[#allocation3 + $0x48] sm:$0xff]  ;;  %1598 = vst.msk [vmem:[#allocation2 + $0x40] sm:$0xff] %vm1097_vm2, %v1582_v3  ;;  %v1299_v29 = vpop.permute.xlu1 %1298  ;;  %v5345_v42 = vpop.permute.xlu2 %1794 }
 0x1ee   : > { %v2346_v43 = vadd.f32 %v2330_v51, %v2300_v8  ;;  %2178 = vst.msk [vmem:[#allocation3 + $0x50] sm:$0xff] %vm216_vm1, %v2162_v62  ;;  %v5348_v47 = vpop.permute.xlu0 %1790  ;;  %4092 = vmatmul.msk.f32.gmra.mxu0 %vm216_vm1, %v4074_v30  ;;  %4160 = vmatmul.msk.f32.gmra.mxu2 %vm216_vm1, %v5340_v36  ;;  %v1259_v9 = vld [vmem:[#allocation2 + $0x58] sm:$0xff] }
 0x1ef   : > { %4126 = vmatmul.msk.f32.gmra.mxu1 %vm216_vm1, %v4108_v18  ;;  %2542 = vst.msk [vmem:[#allocation3 + $0x38] sm:$0xff] %vm216_vm1, %v2526_v38  ;;  %v2511_v39 = vld [vmem:[#allocation3 + $0x40] sm:$0xff] }
 0x1f0   : > { %v2527_v20 = vadd.f32 %v2511_v39, %v5285_v46  ;;  %2362 = vst.msk [vmem:[#allocation3 + $0x48] sm:$0xff] %vm216_vm1, %v2346_v43  ;;  %v1257_v4 = vld [vmem:[#allocation2 + $0x48] sm:$0xff] }
 0x1f1   : > { %v3509_v22 = vld [vmem:[#allocation2 + $0x30] sm:$0xff]  ;;  %v1337_v35 = vadd.f32 %v1299_v29, %v1257_v4  ;;  %v2306_v40 = vpop.f32.mrf.mxu2  ;;  %4194 = vmatmul.msk.f32.gmra.mxu3 %vm216_vm1, %v4110_v54  ;;  %v4145_v29 = vld [vmem:[%s4377_s20 + $0xd9] sm:$0xff] }
 0x1f2   : > { %v3551_v31 = vadd.f32 %v5109_v34, %v3509_v22  ;;  %2543 = vst.msk [vmem:[#allocation3 + $0x40] sm:$0xff] %vm216_vm1, %v2527_v20  ;;  %v1747_v41 = vld [vmem:[#allocation2 + $0x38] sm:$0xff]  ;;  %v5359_v63 = vpop.f32.mrf.mxu3 }
 0x1f3   : > { %v1827_v49 = vadd.f32 %v5293_v11, %v1747_v41  ;;  %v2147_v10 = vld [vmem:[#allocation3 + $0x58] sm:$0xff]  ;;  %1353 = vst.msk [vmem:[#allocation2 + $0x48] sm:$0xff] %vm1097_vm2, %v1337_v35  ;;  %v1974_v46 = vpop.f32.mrf.mxu0 }
 0x1f4   : > { %v2124_v23 = vpop.f32.mrf.mxu1  ;;  %3584 = vst.msk [vmem:[%s5122_s27 + $0x60] sm:$0xff] %vm3571_vm3, %v3551_v31  ;;  %v1748_v60 = vld [vmem:[#allocation2 + $0x40] sm:$0xff]  ;;  %v2163_v13 = vadd.f32 %v2147_v10, %v2121_v0 }
 0x1f5   : > { %1843 = vst.msk [vmem:[#allocation2 + $0x38] sm:$0xff] %vm1097_vm2, %v1827_v49  ;;  %v1828_v57 = vadd.f32 %v5244_v1, %v1748_v60  ;;  %v2331_v14 = vld [vmem:[#allocation3 + $0x50] sm:$0xff]  ;;  %v1070_v11 = vpop.permute.xlu1 %1069  ;;  %v5372_v50 = vpop.permute.xlu2 %1550 }
 0x1f6   : > { %v2347_v33 = vadd.f32 %v2331_v14, %v2303_v44  ;;  %2179 = vst.msk [vmem:[#allocation3 + $0x58] sm:$0xff] %vm216_vm1, %v2163_v13  ;;  %v5375_v15 = vpop.permute.xlu0 %1546  ;;  %4093 = vmatmul.msk.f32.gmra.mxu0 %vm216_vm1, %v5318_v5  ;;  %4161 = vmatmul.msk.f32.gmra.mxu2 %vm216_vm1, %v5367_v55  ;;  %v5396_v5 = vld [vmem:[%s4377_s20 + $0xc9] sm:$0xff] }
 0x1f7   : > { %4127 = vmatmul.msk.f32.gmra.mxu1 %vm216_vm1, %v4109_v25  ;;  %v2512_v8 = vld [vmem:[#allocation3 + $0x48] sm:$0xff]  ;;  %1844 = vst.msk [vmem:[#allocation2 + $0x40] sm:$0xff] %vm1097_vm2, %v1828_v57 }
 0x1f8   : > { %v2528_v1 = vadd.f32 %v2512_v8, %v5310_v19  ;;  %2363 = vst.msk [vmem:[#allocation3 + $0x50] sm:$0xff] %vm216_vm1, %v2347_v33 }
 0x1f9   : > { %1998 = vst.msk [vmem:[#allocation3 + $0x60] sm:$0xff] %vm216_vm1, %v1974_v46  ;;  %v5387_v45 = vpop.f32.mrf.mxu2  ;;  %4195 = vmatmul.msk.f32.gmra.mxu3 %vm216_vm1, %v4111_v58 }
 0x1fa   : > { %2544 = vst.msk [vmem:[#allocation3 + $0x48] sm:$0xff] %vm216_vm1, %v2528_v1  ;;  %v1503_v28 = vld [vmem:[#allocation2 + $0x48] sm:$0xff]  ;;  %v5389_v37 = vpop.f32.mrf.mxu3 }
 0x1fb   : > { %v1583_v48 = vadd.f32 %v5269_v32, %v1503_v28  ;;  %1108 = vst.msk [vmem:[#allocation2 + $0x50] sm:$0xff] %vm1097_vm2, %v1070_v11  ;;  %v1977_v56 = vpop.f32.mrf.mxu0 }
 0x1fc   : > { %v2127_v18 = vpop.f32.mrf.mxu1  ;;  %v3510_v19 = vld [vmem:[#allocation2 + $0x38] sm:$0xff]  ;;  %1999 = vst.msk [vmem:[#allocation3 + $0x68] sm:$0xff] %vm216_vm1, %v1977_v56 }
 0x1fd   : > { %v3552_v27 = vadd.f32 %v5109_v34, %v3510_v19  ;;  %1599 = vst.msk [vmem:[#allocation2 + $0x48] sm:$0xff] %vm1097_vm2, %v1583_v48  ;;  %v2332_v16 = vld [vmem:[#allocation3 + $0x58] sm:$0xff]  ;;  %v5401_v6 = vpop.permute.xlu1 %1792  ;;  %v5403_v32 = vpop.permute.xlu2 %1306 }
 0x1fe   : > { %v3511_v21 = vld [vmem:[#allocation2 + $0x40] sm:$0xff]  ;;  %v2348_v61 = vadd.f32 %v2332_v16, %v2306_v40  ;;  %v1303_v2 = vpop.permute.xlu0 %1302  ;;  %4094 = vmatmul.msk.f32.gmra.mxu0 %vm216_vm1, %v5340_v36  ;;  %4162 = vmatmul.msk.f32.gmra.mxu2 %vm216_vm1, %v5396_v5  ;;  %v4112_v36 = vld [vmem:[%s4377_s20 + $0xca] sm:$0xff] }
 0x1ff   : > { %4128 = vmatmul.msk.f32.gmra.mxu1 %vm216_vm1, %v4110_v54  ;;  %3585 = vst.msk [vmem:[%s5122_s27 + $0x68] sm:$0xff] %vm3571_vm3, %v3552_v27  ;;  %v3555_v52 = vadd.f32 %v5109_v34, %v3511_v21  ;;  %v2513_v24 = vld [vmem:[#allocation3 + $0x50] sm:$0xff]  ;;  %v1339_v17 = vadd.f32 %v1303_v2, %v1259_v9  ;;  %v4179_v21 = vld [vmem:[%s4377_s20 + $0xda] sm:$0xff] }
 0x200   : > { %v2529_v12 = vadd.f32 %v2513_v24, %v5333_v59  ;;  %2364 = vst.msk [vmem:[#allocation3 + $0x58] sm:$0xff] %vm216_vm1, %v2348_v61  ;;  %v2148_v44 = vld [vmem:[#allocation3 + $0x60] sm:$0xff] }
 0x201   : > { %3588 = vst.msk [vmem:[%s5122_s27 + $0x80] sm:$0xff] %vm3571_vm3, %v3555_v52  ;;  %v2164_v3 = vadd.f32 %v2148_v44, %v2124_v23  ;;  %v2312_v0 = vpop.f32.mrf.mxu2  ;;  %4196 = vmatmul.msk.f32.gmra.mxu3 %vm216_vm1, %v4112_v36 }
 0x202   : > { %2545 = vst.msk [vmem:[#allocation3 + $0x50] sm:$0xff] %vm216_vm1, %v2529_v12  ;;  %v1258_v26 = vld [vmem:[#allocation2 + $0x50] sm:$0xff]  ;;  %v5418_v30 = vpop.f32.mrf.mxu3 }
 0x203   : > { %2180 = vst.msk [vmem:[#allocation3 + $0x60] sm:$0xff] %vm216_vm1, %v2164_v3  ;;  %v1338_v25 = vadd.f32 %v5295_v53, %v1258_v26  ;;  %v2149_v7 = vld [vmem:[#allocation3 + $0x68] sm:$0xff]  ;;  %v1980_v59 = vpop.f32.mrf.mxu0 }
 0x204   : > { %v2130_v62 = vpop.f32.mrf.mxu1  ;;  %v1749_v38 = vld [vmem:[#allocation2 + $0x48] sm:$0xff]  ;;  %v2165_v51 = vadd.f32 %v2149_v7, %v2127_v18  ;;  %1355 = vst.msk [vmem:[#allocation2 + $0x58] sm:$0xff] %vm1097_vm2, %v1339_v17 }
 0x205   : > { %v1829_v43 = vadd.f32 %v5348_v47, %v1749_v38  ;;  %1354 = vst.msk [vmem:[#allocation2 + $0x50] sm:$0xff] %vm1097_vm2, %v1338_v25  ;;  %v1549_v39 = vpop.permute.xlu1 %1548  ;;  %v1078_v20 = vpop.permute.xlu2 %1077  ;;  %v4180_v7 = vld [vmem:[%s4377_s20 + $0xe2] sm:$0xff] }
 0x206   : > { %2181 = vst.msk [vmem:[#allocation3 + $0x68] sm:$0xff] %vm216_vm1, %v2165_v51  ;;  %v1074_v53 = vpop.permute.xlu0 %1073  ;;  %4095 = vmatmul.msk.f32.gmra.mxu0 %vm216_vm1, %v5367_v55  ;;  %4163 = vmatmul.msk.f32.gmra.mxu2 %vm216_vm1, %v4145_v29 }
 0x207   : > { %4129 = vmatmul.msk.f32.gmra.mxu1 %vm216_vm1, %v4111_v58  ;;  %1845 = vst.msk [vmem:[#allocation2 + $0x48] sm:$0xff] %vm1097_vm2, %v1829_v43  ;;  %v2514_v4 = vld [vmem:[#allocation3 + $0x58] sm:$0xff] }
 0x208   : > { %v2530_v47 = vadd.f32 %v2514_v4, %v5359_v63  ;;  %2000 = vst.msk [vmem:[#allocation3 + $0x70] sm:$0xff] %vm216_vm1, %v1980_v59  ;;  %v4146_v63 = vld [vmem:[%s4377_s20 + $0xe1] sm:$0xff] }
 0x209   : > { %1112 = vst.msk [vmem:[#allocation2 + $0x70] sm:$0xff] %vm1097_vm2, %v1078_v20  ;;  %v2315_v35 = vpop.f32.mrf.mxu2  ;;  %4197 = vmatmul.msk.f32.gmra.mxu3 %vm216_vm1, %v4179_v21 }
 0x20a   : > { %2546 = vst.msk [vmem:[#allocation3 + $0x58] sm:$0xff] %vm216_vm1, %v2530_v47  ;;  %v2333_v22 = vld [vmem:[#allocation3 + $0x60] sm:$0xff]  ;;  %v5438_v31 = vpop.f32.mrf.mxu3 }
 0x20b   : > { %v2349_v41 = vadd.f32 %v2333_v22, %v5387_v45  ;;  %v1505_v40 = vld [vmem:[#allocation2 + $0x58] sm:$0xff]  ;;  %1110 = vst.msk [vmem:[#allocation2 + $0x60] sm:$0xff] %vm1097_vm2, %v1074_v53  ;;  %v1983_v49 = vpop.f32.mrf.mxu0 }
 0x20c   : > { %v2133_v10 = vpop.f32.mrf.mxu1  ;;  %v1504_v46 = vld [vmem:[#allocation2 + $0x50] sm:$0xff]  ;;  %v1585_v23 = vadd.f32 %v1549_v39, %v1505_v40  ;;  %2001 = vst.msk [vmem:[#allocation3 + $0x78] sm:$0xff] %vm216_vm1, %v1983_v49 }
 0x20d   : > { %v1584_v54 = vadd.f32 %v5375_v15, %v1504_v46  ;;  %2365 = vst.msk [vmem:[#allocation3 + $0x60] sm:$0xff] %vm216_vm1, %v2349_v41  ;;  %v2334_v60 = vld [vmem:[#allocation3 + $0x68] sm:$0xff]  ;;  %v1305_v13 = vpop.permute.xlu1 %1304 }
 0x20e   : > { %v3512_v55 = vld [vmem:[#allocation2 + $0x48] sm:$0xff]  ;;  %v2350_v57 = vadd.f32 %v2334_v60, %v2312_v0  ;;  %1601 = vst.msk [vmem:[#allocation2 + $0x58] sm:$0xff] %vm1097_vm2, %v1585_v23  ;;  %v5447_v14 = vpop.permute.xlu0 %1796  ;;  %4096 = vmatmul.msk.f32.gmra.mxu0 %vm216_vm1, %v5396_v5  ;;  %4164 = vmatmul.msk.f32.gmra.mxu2 %vm216_vm1, %v4146_v63 }
 0x20f   : > { %4130 = vmatmul.msk.f32.gmra.mxu1 %vm216_vm1, %v4112_v36  ;;  %v3556_v11 = vadd.f32 %v5109_v34, %v3512_v55  ;;  %1600 = vst.msk [vmem:[#allocation2 + $0x50] sm:$0xff] %vm1097_vm2, %v1584_v54  ;;  %v2150_v33 = vld [vmem:[#allocation3 + $0x70] sm:$0xff] }
 0x210   : > { %2366 = vst.msk [vmem:[#allocation3 + $0x68] sm:$0xff] %vm216_vm1, %v2350_v57  ;;  %v2166_v15 = vadd.f32 %v2150_v33, %v2130_v62  ;;  %v1262_v36 = vld [vmem:[#allocation2 + $0x70] sm:$0xff]  ;;  %v1801_v57 = vpop.permute.xlu2 %1800 }
 0x211   : > { %3589 = vst.msk [vmem:[%s5122_s27 + $0x88] sm:$0xff] %vm3571_vm3, %v3556_v11  ;;  %v2318_v1 = vpop.f32.mrf.mxu2  ;;  %4198 = vmatmul.msk.f32.gmra.mxu3 %vm216_vm1, %v4180_v7 }
 0x212   : > { %2182 = vst.msk [vmem:[#allocation3 + $0x70] sm:$0xff] %vm216_vm1, %v2166_v15  ;;  %v1260_v8 = vld [vmem:[#allocation2 + $0x60] sm:$0xff]  ;;  %v5459_v28 = vpop.f32.mrf.mxu3 }
 0x213   : > { %v2151_v45 = vld [vmem:[#allocation3 + $0x78] sm:$0xff]  ;;  %v1340_v48 = vadd.f32 %v1305_v13, %v1260_v8  ;;  %v2637_v56 = vpop.f32.mrf.mxu0 }
 0x214   : > { %v2851_v18 = vpop.f32.mrf.mxu1  ;;  %v2515_v58 = vld [vmem:[#allocation3 + $0x60] sm:$0xff]  ;;  %v2167_v19 = vadd.f32 %v2151_v45, %v2133_v10  ;;  %2701 = vrot.lane.b32.xlu1 %v2637_v56, %s4285_s10 }
 0x215   : > { %2931 = vrot.lane.b32.xlu2 %v2851_v18, %s4285_s10  ;;  %v2531_v5 = vadd.f32 %v2515_v58, %v5389_v37  ;;  %v1751_v27 = vld [vmem:[#allocation2 + $0x58] sm:$0xff]  ;;  %1356 = vst.msk [vmem:[#allocation2 + $0x60] sm:$0xff] %vm1097_vm2, %v1340_v48  ;;  %v1076_v16 = vpop.permute.xlu1 %1075 }
 0x216   : > { %v1750_v61 = vld [vmem:[#allocation2 + $0x50] sm:$0xff]  ;;  %v1831_v2 = vadd.f32 %v5345_v42, %v1751_v27  ;;  %2183 = vst.msk [vmem:[#allocation3 + $0x78] sm:$0xff] %vm216_vm1, %v2167_v19  ;;  %v5468_v52 = vpop.permute.xlu0 %1552 }
 0x217   : > { %2547 = vst.msk [vmem:[#allocation3 + $0x60] sm:$0xff] %vm216_vm1, %v2531_v5  ;;  %v1830_v24 = vadd.f32 %v5401_v6, %v1750_v61  ;;  %v2516_v9 = vld [vmem:[#allocation3 + $0x68] sm:$0xff] }
 0x218   : > { %v2532_v37 = vadd.f32 %v2516_v9, %v5418_v30  ;;  %1847 = vst.msk [vmem:[#allocation2 + $0x58] sm:$0xff] %vm1097_vm2, %v1831_v2 }
 0x219   : > { %1846 = vst.msk [vmem:[#allocation2 + $0x50] sm:$0xff] %vm1097_vm2, %v1830_v24  ;;  %v2335_v12 = vld [vmem:[#allocation3 + $0x70] sm:$0xff]  ;;  %v3097_v44 = vpop.f32.mrf.mxu2 }
 0x21a   : > { %2548 = vst.msk [vmem:[#allocation3 + $0x68] sm:$0xff] %vm216_vm1, %v2532_v37  ;;  %v2351_v42 = vadd.f32 %v2335_v12, %v2315_v35  ;;  %v3343_v17 = vpop.f32.mrf.mxu3  ;;  %3177 = vrot.lane.b32.xlu0 %v3097_v44, %s4285_s10 }
 0x21b   : > { %1111 = vst.msk [vmem:[#allocation2 + $0x68] sm:$0xff] %vm1097_vm2, %v1076_v16  ;;  %v2640_v3 = vpop.f32.mrf.mxu0  ;;  %v1557_v16 = vpop.permute.xlu2 %1556 }
 0x21c   : > { %v2854_v6 = vpop.f32.mrf.mxu1  ;;  %2367 = vst.msk [vmem:[#allocation3 + $0x70] sm:$0xff] %vm216_vm1, %v2351_v42  ;;  %v1506_v26 = vld [vmem:[#allocation2 + $0x60] sm:$0xff]  ;;  %3423 = vrot.lane.b32.xlu1 %v3343_v17, %s4285_s10 }
 0x21d   : > { %2703 = vrot.lane.b32.xlu2 %v2640_v3, %s4285_s10  ;;  %v1586_v0 = vadd.f32 %v5372_v50, %v1506_v26  ;;  %v2336_v30 = vld [vmem:[#allocation3 + $0x78] sm:$0xff]  ;;  %v5483_v25 = vpop.permute.xlu1 %1798 }
 0x21e   : > { %v2352_v59 = vadd.f32 %v2336_v30, %v2318_v1  ;;  %v1309_v62 = vpop.permute.xlu0 %1308  ;;  %v5517_v1 = vld [vmem:[%s5752_s2] ss:$0 sm:$0xff] }
 0x21f   : > { %v3514_v38 = vld [vmem:[#allocation2 + $0x58] sm:$0xff]  ;;  %1602 = vst.msk [vmem:[#allocation2 + $0x60] sm:$0xff] %vm1097_vm2, %v1586_v0  ;;  %v1342_v51 = vadd.f32 %v1309_v62, %v1262_v36 }
 0x220   : > { %v3513_v29 = vld [vmem:[#allocation2 + $0x50] sm:$0xff]  ;;  %v3560_v43 = vadd.f32 %v5109_v34, %v3514_v38  ;;  %2368 = vst.msk [vmem:[#allocation3 + $0x78] sm:$0xff] %vm216_vm1, %v2352_v59 }
 0x221   : > { %v3559_v50 = vadd.f32 %v5109_v34, %v3513_v29  ;;  %1358 = vst.msk [vmem:[#allocation2 + $0x70] sm:$0xff] %vm1097_vm2, %v1342_v51  ;;  %v3100_v20 = vpop.f32.mrf.mxu2 }
 0x222   : > { %3593 = vst.msk [vmem:[%s5122_s27 + $0xa8] sm:$0xff] %vm3571_vm3, %v3560_v43  ;;  %v1261_v39 = vld [vmem:[#allocation2 + $0x68] sm:$0xff]  ;;  %v3346_v53 = vpop.f32.mrf.mxu3  ;;  %2933 = vrot.lane.b32.xlu0 %v2854_v6, %s4285_s10 }
 0x223   : > { %3592 = vst.msk [vmem:[%s5122_s27 + $0xa0] sm:$0xff] %vm3571_vm3, %v3559_v50  ;;  %v2517_v4 = vld [vmem:[#allocation3 + $0x70] sm:$0xff]  ;;  %v1341_v47 = vadd.f32 %v5403_v32, %v1261_v39  ;;  %v2643_v22 = vpop.f32.mrf.mxu0 }
 0x224   : > { %v2857_v35 = vpop.f32.mrf.mxu1  ;;  %v2533_v41 = vadd.f32 %v2517_v4, %v5438_v31  ;;  %3179 = vrot.lane.b32.xlu1 %v3100_v20, %s4285_s10 }
 0x225   : > { %3425 = vrot.lane.b32.xlu2 %v3346_v53, %s4285_s10  ;;  %1357 = vst.msk [vmem:[#allocation2 + $0x68] sm:$0xff] %vm1097_vm2, %v1341_v47  ;;  %v1555_v34 = vpop.permute.xlu1 %1554 }
 0x226   : > { %2549 = vst.msk [vmem:[#allocation3 + $0x70] sm:$0xff] %vm216_vm1, %v2533_v41  ;;  %v1752_v40 = vld [vmem:[#allocation2 + $0x60] sm:$0xff]  ;;  %v1080_v49 = vpop.permute.xlu0 %1079 }
 0x227   : > { %v1832_v10 = vadd.f32 %v5447_v14, %v1752_v40  ;;  %v2518_v32 = vld [vmem:[#allocation3 + $0x78] sm:$0xff]  ;;  %1113 = vst.msk [vmem:[#allocation2 + $0x78] sm:$0xff] %vm1097_vm2, %v1080_v49 }
 0x228   : > { %v2534_v46 = vadd.f32 %v2518_v32, %v5459_v28  ;;  %v1508_v23 = vld [vmem:[#allocation2 + $0x70] sm:$0xff] }
 0x229   : > { %1848 = vst.msk [vmem:[#allocation2 + $0x60] sm:$0xff] %vm1097_vm2, %v1832_v10  ;;  %v1588_v31 = vadd.f32 %v1555_v34, %v1508_v23  ;;  %v3103_v63 = vpop.f32.mrf.mxu2 }
 0x22a   : > { %2550 = vst.msk [vmem:[#allocation3 + $0x78] sm:$0xff] %vm216_vm1, %v2534_v46  ;;  %2705 = vrot.lane.b32.xlu0 %v2643_v22, %s4285_s10  ;;  %v3349_v15 = vpop.f32.mrf.mxu3 }
 0x22b   : > { %1604 = vst.msk [vmem:[#allocation2 + $0x70] sm:$0xff] %vm1097_vm2, %v1588_v31  ;;  %v2646_v54 = vpop.f32.mrf.mxu0 }
 0x22c   : > { %v2860_v60 = vpop.f32.mrf.mxu1  ;;  %v1507_v13 = vld [vmem:[#allocation2 + $0x68] sm:$0xff]  ;;  %2935 = vrot.lane.b32.xlu1 %v2857_v35, %s4285_s10 }
 0x22d   : > { %3181 = vrot.lane.b32.xlu2 %v3103_v63, %s4285_s10  ;;  %v1587_v55 = vadd.f32 %v5468_v52, %v1507_v13  ;;  %v1311_v14 = vpop.permute.xlu1 %1310 }
 0x22e   : > { %v1263_v11 = vld [vmem:[#allocation2 + $0x78] sm:$0xff]  ;;  %v1803_v17 = vpop.permute.xlu0 %1802 }
 0x22f   : > { %1603 = vst.msk [vmem:[#allocation2 + $0x68] sm:$0xff] %vm1097_vm2, %v1587_v55  ;;  %v1343_v33 = vadd.f32 %v1311_v14, %v1263_v11 }
 0x230   : > { %v3515_v8 = vld [vmem:[#allocation2 + $0x60] sm:$0xff] }
 0x231   : > { %v3563_v28 = vadd.f32 %v5517_v1, %v3515_v8  ;;  %1359 = vst.msk [vmem:[#allocation2 + $0x78] sm:$0xff] %vm1097_vm2, %v1343_v33  ;;  %v3106_v48 = vpop.f32.mrf.mxu2 }
 0x232   : > { %v1754_v45 = vld [vmem:[#allocation2 + $0x70] sm:$0xff]  ;;  %3427 = vrot.lane.b32.xlu0 %v3349_v15, %s4285_s10  ;;  %v3352_v27 = vpop.f32.mrf.mxu3 }
 0x233   : > { %3596 = vst.msk [vmem:[%s5122_s27 + $0xc0] sm:$0xff] %vm3571_vm3, %v3563_v28  ;;  %v1834_v56 = vadd.f32 %v1801_v57, %v1754_v45  ;;  %v2649_v18 = vpop.f32.mrf.mxu0 }
 0x234   : > { %v2863_v58 = vpop.f32.mrf.mxu1  ;;  %2707 = vrot.lane.b32.xlu1 %v2646_v54, %s4285_s10 }
 0x235   : > { %2937 = vrot.lane.b32.xlu2 %v2860_v60, %s4285_s10  ;;  %1850 = vst.msk [vmem:[#allocation2 + $0x70] sm:$0xff] %vm1097_vm2, %v1834_v56 }
 0x236   : > { %v1753_v19 = vld [vmem:[#allocation2 + $0x68] sm:$0xff] }
 0x237   : > { %v1833_v5 = vadd.f32 %v5483_v25, %v1753_v19 }
 0x238   : > { %v1509_v21 = vld [vmem:[#allocation2 + $0x78] sm:$0xff] }
 0x239   : > { %1849 = vst.msk [vmem:[#allocation2 + $0x68] sm:$0xff] %vm1097_vm2, %v1833_v5  ;;  %v1589_v61 = vadd.f32 %v1557_v16, %v1509_v21  ;;  %v3109_v2 = vpop.f32.mrf.mxu2 }
 0x23a   : > { %3183 = vrot.lane.b32.xlu0 %v3106_v48, %s4285_s10  ;;  %v3355_v44 = vpop.f32.mrf.mxu3 }
 0x23b   : > { %1605 = vst.msk [vmem:[#allocation2 + $0x78] sm:$0xff] %vm1097_vm2, %v1589_v61  ;;  %v2652_v52 = vpop.f32.mrf.mxu0 }
 0x23c   : > { %v2866_v24 = vpop.f32.mrf.mxu1  ;;  %v3517_v9 = vld [vmem:[#allocation2 + $0x70] sm:$0xff]  ;;  %3429 = vrot.lane.b32.xlu1 %v3352_v27, %s4285_s10 }
 0x23d   : > { %2709 = vrot.lane.b32.xlu2 %v2649_v18, %s4285_s10  ;;  %v3567_v37 = vadd.f32 %v5517_v1, %v3517_v9 }
 0x23f   : > { %3600 = vst.msk [vmem:[%s5122_s27 + $0xe0] sm:$0xff] %vm3571_vm3, %v3567_v37 }
 0x240   : > { %v3516_v12 = vld [vmem:[#allocation2 + $0x68] sm:$0xff] }
 0x241   : > { %v3564_v42 = vadd.f32 %v5517_v1, %v3516_v12  ;;  %v3112_v6 = vpop.f32.mrf.mxu2 }
 0x242   : > { %v1755_v3 = vld [vmem:[#allocation2 + $0x78] sm:$0xff]  ;;  %2939 = vrot.lane.b32.xlu0 %v2863_v58, %s4285_s10  ;;  %v3358_v38 = vpop.f32.mrf.mxu3 }
 0x243   : > { %3597 = vst.msk [vmem:[%s5122_s27 + $0xc8] sm:$0xff] %vm3571_vm3, %v3564_v42  ;;  %v1835_v26 = vadd.f32 %v1803_v17, %v1755_v3  ;;  %v2655_v0 = vpop.f32.mrf.mxu0 }
 0x244   : > { %v2869_v30 = vpop.f32.mrf.mxu1  ;;  %3185 = vrot.lane.b32.xlu1 %v3109_v2, %s4285_s10 }
 0x245   : > { %3431 = vrot.lane.b32.xlu2 %v3355_v44, %s4285_s10  ;;  %1851 = vst.msk [vmem:[#allocation2 + $0x78] sm:$0xff] %vm1097_vm2, %v1835_v26 }
 0x249   : > { %v3115_v25 = vpop.f32.mrf.mxu2 }
 0x24a   : > { %2711 = vrot.lane.b32.xlu0 %v2652_v52, %s4285_s10 }
 0x24b   : > { %v2658_v7 = vpop.f32.mrf.mxu0 }
 0x24c   : > { %v2872_v59 = vpop.f32.mrf.mxu1  ;;  %v3518_v62 = vld [vmem:[#allocation2 + $0x78] sm:$0xff]  ;;  %2941 = vrot.lane.b32.xlu1 %v2866_v24, %s4285_s10  ;;  %v5555_v53 = vpop.f32.mrf.mxu3 }
 0x24d   : > { %3187 = vrot.lane.b32.xlu2 %v3112_v6, %s4285_s10  ;;  %v3568_v36 = vadd.f32 %v5517_v1, %v3518_v62 }
 0x24f   : > { %3601 = vst.msk [vmem:[%s5122_s27 + $0xe8] sm:$0xff] %vm3571_vm3, %v3568_v36 }
 0x251   : > { %v3118_v51 = vpop.f32.mrf.mxu2 }
 0x252   : > { %3433 = vrot.lane.b32.xlu0 %v3358_v38, %s4285_s10 }
 0x253   : > { %v2661_v29 = vpop.f32.mrf.mxu0 }
 0x254   : > { %v2875_v43 = vpop.f32.mrf.mxu1  ;;  %2713 = vrot.lane.b32.xlu1 %v2655_v0, %s4285_s10  ;;  %v5560_v35 = vpop.f32.mrf.mxu3 }
 0x255   : > { %2943 = vrot.lane.b32.xlu2 %v2869_v30, %s4285_s10 }
 0x259   : > { %v3121_v50 = vpop.f32.mrf.mxu2 }
 0x25a   : > { %3189 = vrot.lane.b32.xlu0 %v3115_v25, %s4285_s10 }
 0x25b   : > { %v2664_v39 = vpop.f32.mrf.mxu0 }
 0x25c   : > { %3191 = vrot.lane.b32.xlu1 %v3118_v51, %s4285_s10  ;;  %v2878_v20 = vpop.f32.mrf.mxu1  ;;  %v5566_v32 = vpop.f32.mrf.mxu3 }
 0x25d   : > { %2715 = vrot.lane.b32.xlu2 %v2658_v7, %s4285_s10 }
 0x261   : > { %v3124_v4 = vpop.f32.mrf.mxu2 }
 0x262   : > { %2945 = vrot.lane.b32.xlu0 %v2872_v59, %s4285_s10 }
 0x263   : > { %v2667_v47 = vpop.f32.mrf.mxu0 }
 0x264   : > { %2947 = vrot.lane.b32.xlu1 %v2875_v43, %s4285_s10  ;;  %v2881_v22 = vpop.f32.mrf.mxu1  ;;  %v5574_v54 = vpop.f32.mrf.mxu3 }
 0x265   : > { %3193 = vrot.lane.b32.xlu2 %v3121_v50, %s4285_s10 }
 0x269   : > { %v3127_v41 = vpop.f32.mrf.mxu2 }
 0x26a   : > { %2717 = vrot.lane.b32.xlu0 %v2661_v29, %s4285_s10 }
 0x26b   : > { %v2670_v40 = vpop.f32.mrf.mxu0 }
 0x26c   : > { %2719 = vrot.lane.b32.xlu1 %v2664_v39, %s4285_s10  ;;  %v2884_v49 = vpop.f32.mrf.mxu1  ;;  %v3373_v33 = vpop.f32.mrf.mxu3 }
 0x26d   : > { %2949 = vrot.lane.b32.xlu2 %v2878_v20, %s4285_s10 }
 0x26f   : > { %v2932_v34 = vpop.permute.xlu2 %2931 }
 0x271   : > { %v3130_v10 = vpop.f32.mrf.mxu2 }
 0x272   : > { %3195 = vrot.lane.b32.xlu0 %v3124_v4, %s4285_s10 }
 0x273   : > { %v2673_v23 = vpop.f32.mrf.mxu0 }
 0x274   : > { %3197 = vrot.lane.b32.xlu1 %v3127_v41, %s4285_s10  ;;  %v2887_v31 = vpop.f32.mrf.mxu1  ;;  %v3376_v19 = vpop.f32.mrf.mxu3 }
 0x275   : > { %2721 = vrot.lane.b32.xlu2 %v2667_v47, %s4285_s10 }
 0x277   : > { %v2704_v46 = vpop.permute.xlu2 %2703 }
 0x278   : > { %2750 = vst.msk [vmem:[#allocation3 + $0x8] sm:$0xff] %vm1097_vm2, %v2704_v46 }
 0x279   : > { %v3133_v63 = vpop.f32.mrf.mxu2 }
 0x27a   : > { %2951 = vrot.lane.b32.xlu0 %v2881_v22, %s4285_s10 }
 0x27b   : > { %v2676_v13 = vpop.f32.mrf.mxu0 }
 0x27c   : > { %2953 = vrot.lane.b32.xlu1 %v2884_v49, %s4285_s10  ;;  %v2890_v55 = vpop.f32.mrf.mxu1  ;;  %v3379_v37 = vpop.f32.mrf.mxu3 }
 0x27d   : > { %3199 = vrot.lane.b32.xlu2 %v3130_v10, %s4285_s10 }
 0x27f   : > { %v5576_v60 = vpop.permute.xlu2 %3425  ;;  %v2900_v27 = vld [vmem:[#allocation3 + $0x8] sm:$0xff] }
 0x281   : > { %v3136_v11 = vpop.f32.mrf.mxu2 }
 0x282   : > { %2723 = vrot.lane.b32.xlu0 %v2670_v40, %s4285_s10 }
 0x283   : > { %v2679_v56 = vpop.f32.mrf.mxu0 }
 0x284   : > { %2725 = vrot.lane.b32.xlu1 %v2673_v23, %s4285_s10  ;;  %v2893_v18 = vpop.f32.mrf.mxu1  ;;  %v3382_v25 = vpop.f32.mrf.mxu3 }
 0x285   : > { %2955 = vrot.lane.b32.xlu2 %v2887_v31, %s4285_s10 }
 0x286   : > { %v2702_v57 = vpop.permute.xlu1 %2701 }
 0x287   : > { %v5581_v14 = vpop.permute.xlu2 %3181  ;;  %2749 = vst.msk [vmem:[#allocation3] sm:$0xff] %vm1097_vm2, %v2702_v57 }
 0x289   : > { %v3139_v58 = vpop.f32.mrf.mxu2 }
 0x28a   : > { %3201 = vrot.lane.b32.xlu0 %v3133_v63, %s4285_s10 }
 0x28b   : > { %v2682_v24 = vpop.f32.mrf.mxu0 }
 0x28c   : > { %3203 = vrot.lane.b32.xlu1 %v3136_v11, %s4285_s10  ;;  %v3178_v15 = vpop.permute.xlu0 %3177  ;;  %v2896_v9 = vpop.f32.mrf.mxu1 }
 0x28d   : > { %2727 = vrot.lane.b32.xlu2 %v2676_v13, %s4285_s10  ;;  %v3385_v22 = vpop.f32.mrf.mxu3 }
 0x28e   : > { %v2899_v8 = vld [vmem:[#allocation3] sm:$0xff]  ;;  %v3424_v28 = vpop.permute.xlu1 %3423 }
 0x28f   : > { %v2938_v45 = vpop.permute.xlu2 %2937  ;;  %v2979_v48 = vadd.f32 %v2932_v34, %v2899_v8 }
 0x291   : > { %2995 = vst.msk [vmem:[#allocation3] sm:$0xff] %vm1097_vm2, %v2979_v48  ;;  %v3142_v36 = vpop.f32.mrf.mxu2 }
 0x292   : > { %2957 = vrot.lane.b32.xlu0 %v2890_v55, %s4285_s10 }
 0x294   : > { %2959 = vrot.lane.b32.xlu1 %v2893_v18, %s4285_s10  ;;  %v2934_v5 = vpop.permute.xlu0 %2933 }
 0x295   : > { %3205 = vrot.lane.b32.xlu2 %v3139_v58, %s4285_s10  ;;  %v2980_v16 = vadd.f32 %v2934_v5, %v2900_v27 }
 0x296   : > { %v3180_v21 = vpop.permute.xlu1 %3179 }
 0x297   : > { %v2710_v61 = vpop.permute.xlu2 %2709  ;;  %2996 = vst.msk [vmem:[#allocation3 + $0x8] sm:$0xff] %vm1097_vm2, %v2980_v16 }
 0x298   : > { %2753 = vst.msk [vmem:[#allocation3 + $0x20] sm:$0xff] %vm1097_vm2, %v2710_v61  ;;  %v3145_v2 = vld [vmem:[#allocation3] sm:$0xff] }
 0x299   : > { %v3225_v52 = vadd.f32 %v3178_v15, %v3145_v2 }
 0x29a   : > { %2729 = vrot.lane.b32.xlu0 %v2679_v56, %s4285_s10 }
 0x29b   : > { %3241 = vst.msk [vmem:[#allocation3] sm:$0xff] %vm1097_vm2, %v3225_v52 }
 0x29c   : > { %2731 = vrot.lane.b32.xlu1 %v2682_v24, %s4285_s10  ;;  %v2706_v12 = vpop.permute.xlu0 %2705 }
 0x29d   : > { %2961 = vrot.lane.b32.xlu2 %v2896_v9, %s4285_s10  ;;  %2751 = vst.msk [vmem:[#allocation3 + $0x10] sm:$0xff] %vm1097_vm2, %v2706_v12 }
 0x29e   : > { %v2936_v42 = vpop.permute.xlu1 %2935  ;;  %v3146_v17 = vld [vmem:[#allocation3 + $0x8] sm:$0xff] }
 0x29f   : > { %v5598_v44 = vpop.permute.xlu2 %3431  ;;  %v3226_v3 = vadd.f32 %v3180_v21, %v3146_v17  ;;  %v2903_v49 = vld [vmem:[#allocation3 + $0x20] sm:$0xff] }
 0x2a1   : > { %3242 = vst.msk [vmem:[#allocation3 + $0x8] sm:$0xff] %vm1097_vm2, %v3226_v3 }
 0x2a2   : > { %v3391_v6 = vld [vmem:[#allocation3] sm:$0xff]  ;;  %3439 = vrot.lane.b32.xlu0 %v5566_v32, %s4285_s10 }
 0x2a3   : > { %v3471_v26 = vadd.f32 %v3424_v28, %v3391_v6 }
 0x2a4   : > { %3435 = vrot.lane.b32.xlu1 %v5555_v53, %s4285_s10  ;;  %v2901_v0 = vld [vmem:[#allocation3 + $0x10] sm:$0xff]  ;;  %v3428_v30 = vpop.permute.xlu0 %3427 }
 0x2a5   : > { %3437 = vrot.lane.b32.xlu2 %v5560_v35, %s4285_s10  ;;  %3487 = vst.msk [vmem:[#allocation3] sm:$0xff] %vm1097_vm2, %v3471_v26  ;;  %v2981_v7 = vadd.f32 %v2936_v42, %v2901_v0 }
 0x2a6   : > { %v2708_v59 = vpop.permute.xlu1 %2707 }
 0x2a7   : > { %v5608_v62 = vpop.permute.xlu2 %3187  ;;  %2752 = vst.msk [vmem:[#allocation3 + $0x18] sm:$0xff] %vm1097_vm2, %v2708_v59 }
 0x2a8   : > { %2997 = vst.msk [vmem:[#allocation3 + $0x10] sm:$0xff] %vm1097_vm2, %v2981_v7  ;;  %v3392_v38 = vld [vmem:[#allocation3 + $0x8] sm:$0xff] }
 0x2a9   : > { %v3472_v51 = vadd.f32 %v5576_v60, %v3392_v38 }
 0x2aa   : > { %3207 = vrot.lane.b32.xlu0 %v3142_v36, %s4285_s10 }
 0x2ab   : > { %3488 = vst.msk [vmem:[#allocation3 + $0x8] sm:$0xff] %vm1097_vm2, %v3472_v51 }
 0x2ac   : > { %v3519_v29 = vld [vmem:[#allocation3] sm:$0xff]  ;;  %3441 = vrot.lane.b32.xlu1 %v5574_v54, %s4285_s10  ;;  %v3184_v50 = vpop.permute.xlu0 %3183  ;;  %v3388_v54 = vpop.f32.mrf.mxu3 }
 0x2ad   : > { %3443 = vrot.lane.b32.xlu2 %v3373_v33, %s4285_s10  ;;  %v3541_v43 = vadd.f32 %v5517_v1, %v3519_v29 }
 0x2ae   : > { %v2902_v39 = vld [vmem:[#allocation3 + $0x18] sm:$0xff]  ;;  %v3430_v20 = vpop.permute.xlu1 %3429 }
 0x2af   : > { %v2944_v53 = vpop.permute.xlu2 %2943  ;;  %3574 = vst.msk [vmem:[%s5122_s27 + $0x10] sm:$0xff] %vm3571_vm3, %v3541_v43  ;;  %v3147_v4 = vld [vmem:[#allocation3 + $0x10] sm:$0xff]  ;;  %v2982_v47 = vadd.f32 %v2938_v45, %v2902_v39 }
 0x2b0   : > { %v3227_v35 = vadd.f32 %v5581_v14, %v3147_v4 }
 0x2b1   : > { %2998 = vst.msk [vmem:[#allocation3 + $0x18] sm:$0xff] %vm1097_vm2, %v2982_v47 }
 0x2b2   : > { %3243 = vst.msk [vmem:[#allocation3 + $0x10] sm:$0xff] %vm1097_vm2, %v3227_v35  ;;  %v3520_v41 = vld [vmem:[#allocation3 + $0x8] sm:$0xff]  ;;  %3445 = vrot.lane.b32.xlu0 %v3376_v19, %s4285_s10 }
 0x2b3   : > { %v3542_v34 = vadd.f32 %v5517_v1, %v3520_v41 }
 0x2b4   : > { %3447 = vrot.lane.b32.xlu1 %v3379_v37, %s4285_s10  ;;  %v2940_v40 = vpop.permute.xlu0 %2939 }
 0x2b5   : > { %3449 = vrot.lane.b32.xlu2 %v3382_v25, %s4285_s10  ;;  %3575 = vst.msk [vmem:[%s5122_s27 + $0x18] sm:$0xff] %vm3571_vm3, %v3542_v34  ;;  %v2983_v10 = vadd.f32 %v2940_v40, %v2903_v49 }
 0x2b6   : > { %v3186_v32 = vpop.permute.xlu1 %3185 }
 0x2b7   : > { %v2716_v46 = vpop.permute.xlu2 %2715  ;;  %2999 = vst.msk [vmem:[#allocation3 + $0x20] sm:$0xff] %vm1097_vm2, %v2983_v10 }
 0x2b8   : > { %2756 = vst.msk [vmem:[#allocation3 + $0x38] sm:$0xff] %vm1097_vm2, %v2716_v46  ;;  %v3148_v23 = vld [vmem:[#allocation3 + $0x18] sm:$0xff] }
 0x2b9   : > { %v3393_v31 = vld [vmem:[#allocation3 + $0x10] sm:$0xff]  ;;  %v3228_v63 = vadd.f32 %v3184_v50, %v3148_v23 }
 0x2ba   : > { %v3473_v60 = vadd.f32 %v3428_v30, %v3393_v31  ;;  %3451 = vrot.lane.b32.xlu0 %v3385_v22, %s4285_s10 }
 0x2bb   : > { %3244 = vst.msk [vmem:[#allocation3 + $0x18] sm:$0xff] %vm1097_vm2, %v3228_v63 }
 0x2bc   : > { %3489 = vst.msk [vmem:[#allocation3 + $0x10] sm:$0xff] %vm1097_vm2, %v3473_v60  ;;  %3453 = vrot.lane.b32.xlu1 %v3388_v54, %s4285_s10  ;;  %v2712_v13 = vpop.permute.xlu0 %2711 }
 0x2bd   : > { %2754 = vst.msk [vmem:[#allocation3 + $0x28] sm:$0xff] %vm1097_vm2, %v2712_v13 }
 0x2be   : > { %v2942_v55 = vpop.permute.xlu1 %2941  ;;  %v3149_v14 = vld [vmem:[#allocation3 + $0x20] sm:$0xff] }
 0x2bf   : > { %v5637_v57 = vpop.permute.xlu2 %3193  ;;  %v3229_v11 = vadd.f32 %v3186_v32, %v3149_v14  ;;  %v2906_v17 = vld [vmem:[#allocation3 + $0x38] sm:$0xff] }
 0x2c1   : > { %3245 = vst.msk [vmem:[#allocation3 + $0x20] sm:$0xff] %vm1097_vm2, %v3229_v11 }
 0x2c2   : > { %v3394_v33 = vld [vmem:[#allocation3 + $0x18] sm:$0xff] }
 0x2c3   : > { %v3521_v15 = vld [vmem:[#allocation3 + $0x10] sm:$0xff]  ;;  %v3474_v8 = vadd.f32 %v3430_v20, %v3394_v33 }
 0x2c4   : > { %v3545_v28 = vadd.f32 %v5517_v1, %v3521_v15  ;;  %v2904_v45 = vld [vmem:[#allocation3 + $0x28] sm:$0xff]  ;;  %v3434_v48 = vpop.permute.xlu0 %3433 }
 0x2c5   : > { %3490 = vst.msk [vmem:[#allocation3 + $0x18] sm:$0xff] %vm1097_vm2, %v3474_v8  ;;  %v2984_v56 = vadd.f32 %v2942_v55, %v2904_v45 }
 0x2c6   : > { %3578 = vst.msk [vmem:[%s5122_s27 + $0x30] sm:$0xff] %vm3571_vm3, %v3545_v28  ;;  %v2714_v18 = vpop.permute.xlu1 %2713 }
 0x2c7   : > { %v2950_v58 = vpop.permute.xlu2 %2949  ;;  %2755 = vst.msk [vmem:[#allocation3 + $0x30] sm:$0xff] %vm1097_vm2, %v2714_v18 }
 0x2c8   : > { %3000 = vst.msk [vmem:[#allocation3 + $0x28] sm:$0xff] %vm1097_vm2, %v2984_v56  ;;  %v3395_v19 = vld [vmem:[#allocation3 + $0x20] sm:$0xff] }
 0x2c9   : > { %v3475_v5 = vadd.f32 %v5598_v44, %v3395_v19 }
 0x2cb   : > { %3491 = vst.msk [vmem:[#allocation3 + $0x20] sm:$0xff] %vm1097_vm2, %v3475_v5 }
 0x2cc   : > { %v3522_v27 = vld [vmem:[#allocation3 + $0x18] sm:$0xff]  ;;  %v3190_v21 = vpop.permute.xlu0 %3189 }
 0x2cd   : > { %v3546_v16 = vadd.f32 %v5517_v1, %v3522_v27 }
 0x2ce   : > { %v2905_v61 = vld [vmem:[#allocation3 + $0x30] sm:$0xff]  ;;  %v3192_v2 = vpop.permute.xlu1 %3191 }
 0x2cf   : > { %v2722_v52 = vpop.permute.xlu2 %2721  ;;  %3579 = vst.msk [vmem:[%s5122_s27 + $0x38] sm:$0xff] %vm3571_vm3, %v3546_v16  ;;  %v3150_v24 = vld [vmem:[#allocation3 + $0x28] sm:$0xff]  ;;  %v2985_v9 = vadd.f32 %v2944_v53, %v2905_v61 }
 0x2d0   : > { %v3230_v37 = vadd.f32 %v5608_v62, %v3150_v24  ;;  %2759 = vst.msk [vmem:[#allocation3 + $0x50] sm:$0xff] %vm1097_vm2, %v2722_v52 }
 0x2d1   : > { %3001 = vst.msk [vmem:[#allocation3 + $0x30] sm:$0xff] %vm1097_vm2, %v2985_v9 }
 0x2d2   : > { %3246 = vst.msk [vmem:[#allocation3 + $0x28] sm:$0xff] %vm1097_vm2, %v3230_v37  ;;  %v3523_v12 = vld [vmem:[#allocation3 + $0x20] sm:$0xff] }
 0x2d3   : > { %v3549_v42 = vadd.f32 %v5517_v1, %v3523_v12 }
 0x2d4   : > { %v2946_v44 = vpop.permute.xlu0 %2945 }
 0x2d5   : > { %3582 = vst.msk [vmem:[%s5122_s27 + $0x50] sm:$0xff] %vm3571_vm3, %v3549_v42  ;;  %v2986_v3 = vadd.f32 %v2946_v44, %v2906_v17 }
 0x2d6   : > { %v2948_v6 = vpop.permute.xlu1 %2947 }
 0x2d7   : > { %v5658_v26 = vpop.permute.xlu2 %3199  ;;  %3002 = vst.msk [vmem:[#allocation3 + $0x38] sm:$0xff] %vm1097_vm2, %v2986_v3  ;;  %v2909_v41 = vld [vmem:[#allocation3 + $0x50] sm:$0xff] }
 0x2d8   : > { %v3151_v0 = vld [vmem:[#allocation3 + $0x30] sm:$0xff] }
 0x2d9   : > { %v3396_v30 = vld [vmem:[#allocation3 + $0x28] sm:$0xff]  ;;  %v3231_v25 = vadd.f32 %v3190_v21, %v3151_v0 }
 0x2da   : > { %v3476_v7 = vadd.f32 %v3434_v48, %v3396_v30 }
 0x2db   : > { %3247 = vst.msk [vmem:[#allocation3 + $0x30] sm:$0xff] %vm1097_vm2, %v3231_v25 }
 0x2dc   : > { %3492 = vst.msk [vmem:[#allocation3 + $0x28] sm:$0xff] %vm1097_vm2, %v3476_v7  ;;  %v2718_v59 = vpop.permute.xlu0 %2717 }
 0x2dd   : > { %2757 = vst.msk [vmem:[#allocation3 + $0x40] sm:$0xff] %vm1097_vm2, %v2718_v59 }
 0x2de   : > { %v2720_v62 = vpop.permute.xlu1 %2719  ;;  %v3152_v38 = vld [vmem:[#allocation3 + $0x38] sm:$0xff] }
 0x2df   : > { %v2956_v36 = vpop.permute.xlu2 %2955  ;;  %2758 = vst.msk [vmem:[#allocation3 + $0x48] sm:$0xff] %vm1097_vm2, %v2720_v62  ;;  %v3232_v51 = vadd.f32 %v3192_v2, %v3152_v38 }
 0x2e1   : > { %3248 = vst.msk [vmem:[#allocation3 + $0x38] sm:$0xff] %vm1097_vm2, %v3232_v51 }
 0x2e2   : > { %v3397_v7 = vld [vmem:[#allocation3 + $0x30] sm:$0xff] }
 0x2e3   : > { %v3524_v29 = vld [vmem:[#allocation3 + $0x28] sm:$0xff] }
 0x2e4   : > { %v3550_v43 = vadd.f32 %v5517_v1, %v3524_v29  ;;  %v2907_v50 = vld [vmem:[#allocation3 + $0x40] sm:$0xff]  ;;  %v3196_v39 = vpop.permute.xlu0 %3195 }
 0x2e5   : > { %v2987_v20 = vadd.f32 %v2948_v6, %v2907_v50 }
 0x2e6   : > { %3583 = vst.msk [vmem:[%s5122_s27 + $0x58] sm:$0xff] %vm3571_vm3, %v3550_v43  ;;  %v2908_v53 = vld [vmem:[#allocation3 + $0x48] sm:$0xff]  ;;  %v3198_v4 = vpop.permute.xlu1 %3197 }
 0x2e7   : > { %v2728_v47 = vpop.permute.xlu2 %2727  ;;  %v2988_v22 = vadd.f32 %v2950_v58, %v2908_v53  ;;  %3003 = vst.msk [vmem:[#allocation3 + $0x40] sm:$0xff] %vm1097_vm2, %v2987_v20 }
 0x2e8   : > { %2762 = vst.msk [vmem:[#allocation3 + $0x68] sm:$0xff] %vm1097_vm2, %v2728_v47  ;;  %v3398_v15 = vld [vmem:[#allocation3 + $0x38] sm:$0xff] }
 0x2e9   : > { %3004 = vst.msk [vmem:[#allocation3 + $0x48] sm:$0xff] %vm1097_vm2, %v2988_v22 }
 0x2ec   : > { %v2952_v35 = vpop.permute.xlu0 %2951 }
 0x2ed   : > { %v2989_v34 = vadd.f32 %v2952_v35, %v2909_v41 }
 0x2ee   : > { %v2954_v40 = vpop.permute.xlu1 %2953  ;;  %v3153_v10 = vld [vmem:[#allocation3 + $0x40] sm:$0xff] }
 0x2ef   : > { %v5672_v49 = vpop.permute.xlu2 %3205  ;;  %3005 = vst.msk [vmem:[#allocation3 + $0x50] sm:$0xff] %vm1097_vm2, %v2989_v34  ;;  %v3233_v46 = vadd.f32 %v5637_v57, %v3153_v10  ;;  %v2912_v56 = vld [vmem:[#allocation3 + $0x68] sm:$0xff] }
 0x2f0   : > { %v3154_v32 = vld [vmem:[#allocation3 + $0x48] sm:$0xff] }
 0x2f1   : > { %v3234_v23 = vadd.f32 %v3196_v39, %v3154_v32  ;;  %3249 = vst.msk [vmem:[#allocation3 + $0x40] sm:$0xff] %vm1097_vm2, %v3233_v46 }
 0x2f3   : > { %3250 = vst.msk [vmem:[#allocation3 + $0x48] sm:$0xff] %vm1097_vm2, %v3234_v23 }
 0x2f4   : > { %v2724_v31 = vpop.permute.xlu0 %2723 }
 0x2f5   : > { %2760 = vst.msk [vmem:[#allocation3 + $0x58] sm:$0xff] %vm1097_vm2, %v2724_v31 }
 0x2f6   : > { %v2726_v63 = vpop.permute.xlu1 %2725  ;;  %v3155_v60 = vld [vmem:[#allocation3 + $0x50] sm:$0xff] }
 0x2f7   : > { %v2962_v54 = vpop.permute.xlu2 %2961  ;;  %2761 = vst.msk [vmem:[#allocation3 + $0x60] sm:$0xff] %vm1097_vm2, %v2726_v63  ;;  %v3235_v13 = vadd.f32 %v3198_v4, %v3155_v60 }
 0x2f8   : > { %v3399_v6 = vld [vmem:[#allocation3 + $0x40] sm:$0xff] }
 0x2f9   : > { %3251 = vst.msk [vmem:[#allocation3 + $0x50] sm:$0xff] %vm1097_vm2, %v3235_v13 }
 0x2fa   : > { %v3400_v50 = vld [vmem:[#allocation3 + $0x48] sm:$0xff] }
 0x2fc   : > { %v2910_v55 = vld [vmem:[#allocation3 + $0x58] sm:$0xff]  ;;  %v3202_v14 = vpop.permute.xlu0 %3201 }
 0x2fd   : > { %v2990_v11 = vadd.f32 %v2954_v40, %v2910_v55 }
 0x2fe   : > { %v2911_v57 = vld [vmem:[#allocation3 + $0x60] sm:$0xff]  ;;  %v3204_v33 = vpop.permute.xlu1 %3203 }
 0x2ff   : > { %v3438_v8 = vpop.permute.xlu2 %3437  ;;  %v2991_v28 = vadd.f32 %v2956_v36, %v2911_v57  ;;  %3006 = vst.msk [vmem:[#allocation3 + $0x58] sm:$0xff] %vm1097_vm2, %v2990_v11 }
 0x300   : > { %v3478_v45 = vadd.f32 %v3438_v8, %v3398_v15  ;;  %v3401_v19 = vld [vmem:[#allocation3 + $0x50] sm:$0xff] }
 0x301   : > { %3007 = vst.msk [vmem:[#allocation3 + $0x60] sm:$0xff] %vm1097_vm2, %v2991_v28 }
 0x302   : > { %3494 = vst.msk [vmem:[#allocation3 + $0x38] sm:$0xff] %vm1097_vm2, %v3478_v45 }
 0x304   : > { %v2958_v48 = vpop.permute.xlu0 %2957 }
 0x305   : > { %v2992_v18 = vadd.f32 %v2958_v48, %v2912_v56 }
 0x306   : > { %v2960_v58 = vpop.permute.xlu1 %2959  ;;  %v3156_v16 = vld [vmem:[#allocation3 + $0x58] sm:$0xff] }
 0x307   : > { %v3444_v5 = vpop.permute.xlu2 %3443  ;;  %3008 = vst.msk [vmem:[#allocation3 + $0x68] sm:$0xff] %vm1097_vm2, %v2992_v18  ;;  %v3236_v61 = vadd.f32 %v5658_v26, %v3156_v16 }
 0x308   : > { %v3481_v27 = vadd.f32 %v3444_v5, %v3401_v19  ;;  %v3157_v21 = vld [vmem:[#allocation3 + $0x60] sm:$0xff] }
 0x309   : > { %v3237_v2 = vadd.f32 %v3202_v14, %v3157_v21  ;;  %v3526_v52 = vld [vmem:[#allocation3 + $0x38] sm:$0xff]  ;;  %3252 = vst.msk [vmem:[#allocation3 + $0x58] sm:$0xff] %vm1097_vm2, %v3236_v61 }
 0x30a   : > { %3497 = vst.msk [vmem:[#allocation3 + $0x50] sm:$0xff] %vm1097_vm2, %v3481_v27  ;;  %v3554_v24 = vadd.f32 %v5517_v1, %v3526_v52 }
 0x30b   : > { %3253 = vst.msk [vmem:[#allocation3 + $0x60] sm:$0xff] %vm1097_vm2, %v3237_v2 }
 0x30c   : > { %3587 = vst.msk [vmem:[%s5122_s27 + $0x78] sm:$0xff] %vm3571_vm3, %v3554_v24  ;;  %v2730_v9 = vpop.permute.xlu0 %2729 }
 0x30d   : > { %2763 = vst.msk [vmem:[#allocation3 + $0x70] sm:$0xff] %vm1097_vm2, %v2730_v9 }
 0x30e   : > { %v2732_v37 = vpop.permute.xlu1 %2731  ;;  %v3158_v12 = vld [vmem:[#allocation3 + $0x68] sm:$0xff] }
 0x30f   : > { %2764 = vst.msk [vmem:[#allocation3 + $0x78] sm:$0xff] %vm1097_vm2, %v2732_v37  ;;  %v3238_v44 = vadd.f32 %v3204_v33, %v3158_v12  ;;  %v3450_v51 = vpop.permute.xlu2 %3449 }
 0x311   : > { %v3529_v42 = vld [vmem:[#allocation3 + $0x50] sm:$0xff]  ;;  %3254 = vst.msk [vmem:[#allocation3 + $0x68] sm:$0xff] %vm1097_vm2, %v3238_v44 }
 0x312   : > { %v3561_v17 = vadd.f32 %v5517_v1, %v3529_v42  ;;  %v3403_v31 = vld [vmem:[#allocation3 + $0x60] sm:$0xff] }
 0x314   : > { %3594 = vst.msk [vmem:[%s5122_s27 + $0xb0] sm:$0xff] %vm3571_vm3, %v3561_v17  ;;  %v2913_v3 = vld [vmem:[#allocation3 + $0x70] sm:$0xff]  ;;  %v3440_v26 = vpop.permute.xlu0 %3439 }
 0x315   : > { %v2993_v0 = vadd.f32 %v2960_v58, %v2913_v3  ;;  %v3479_v25 = vadd.f32 %v3440_v26, %v3399_v6 }
 0x316   : > { %v2914_v30 = vld [vmem:[#allocation3 + $0x78] sm:$0xff]  ;;  %v3436_v59 = vpop.permute.xlu1 %3435 }
 0x317   : > { %v2994_v62 = vadd.f32 %v2962_v54, %v2914_v30  ;;  %v3477_v36 = vadd.f32 %v3436_v59, %v3397_v7  ;;  %3009 = vst.msk [vmem:[#allocation3 + $0x70] sm:$0xff] %vm1097_vm2, %v2993_v0 }
 0x318   : > { %v3404_v38 = vld [vmem:[#allocation3 + $0x68] sm:$0xff]  ;;  %3495 = vst.msk [vmem:[#allocation3 + $0x40] sm:$0xff] %vm1097_vm2, %v3479_v25 }
 0x319   : > { %3010 = vst.msk [vmem:[#allocation3 + $0x78] sm:$0xff] %vm1097_vm2, %v2994_v62  ;;  %v3484_v29 = vadd.f32 %v3450_v51, %v3404_v38 }
 0x31a   : > { %3493 = vst.msk [vmem:[#allocation3 + $0x30] sm:$0xff] %vm1097_vm2, %v3477_v36 }
 0x31b   : > { %3500 = vst.msk [vmem:[#allocation3 + $0x68] sm:$0xff] %vm1097_vm2, %v3484_v29 }
 0x31c   : > { %v3208_v43 = vpop.permute.xlu0 %3207 }
 0x31e   : > { %v3442_v39 = vpop.permute.xlu1 %3441  ;;  %v3159_v53 = vld [vmem:[#allocation3 + $0x70] sm:$0xff] }
 0x31f   : > { %v3480_v20 = vadd.f32 %v3442_v39, %v3400_v50  ;;  %v3239_v47 = vadd.f32 %v5672_v49, %v3159_v53  ;;  %v3527_v22 = vld [vmem:[#allocation3 + $0x40] sm:$0xff]  ;;  %v3402_v49 = vld [vmem:[#allocation3 + $0x58] sm:$0xff] }
 0x320   : > { %v3160_v4 = vld [vmem:[#allocation3 + $0x78] sm:$0xff]  ;;  %v3557_v41 = vadd.f32 %v5517_v1, %v3527_v22 }
 0x321   : > { %v3240_v35 = vadd.f32 %v3208_v43, %v3160_v4  ;;  %3496 = vst.msk [vmem:[#allocation3 + $0x48] sm:$0xff] %vm1097_vm2, %v3480_v20  ;;  %v3525_v34 = vld [vmem:[#allocation3 + $0x30] sm:$0xff] }
 0x322   : > { %3255 = vst.msk [vmem:[#allocation3 + $0x70] sm:$0xff] %vm1097_vm2, %v3239_v47  ;;  %v3532_v40 = vld [vmem:[#allocation3 + $0x68] sm:$0xff]  ;;  %v3553_v10 = vadd.f32 %v5517_v1, %v3525_v34 }
 0x323   : > { %3256 = vst.msk [vmem:[#allocation3 + $0x78] sm:$0xff] %vm1097_vm2, %v3240_v35  ;;  %v3566_v32 = vadd.f32 %v5517_v1, %v3532_v40 }
 0x324   : > { %3590 = vst.msk [vmem:[%s5122_s27 + $0x90] sm:$0xff] %vm3571_vm3, %v3557_v41  ;;  %v3446_v46 = vpop.permute.xlu0 %3445 }
 0x325   : > { %3586 = vst.msk [vmem:[%s5122_s27 + $0x70] sm:$0xff] %vm3571_vm3, %v3553_v10  ;;  %v3482_v23 = vadd.f32 %v3446_v46, %v3402_v49 }
 0x326   : > { %3599 = vst.msk [vmem:[%s5122_s27 + $0xd8] sm:$0xff] %vm3571_vm3, %v3566_v32  ;;  %v3448_v63 = vpop.permute.xlu1 %3447 }
 0x327   : > { %v3483_v54 = vadd.f32 %v3448_v63, %v3403_v31  ;;  %3498 = vst.msk [vmem:[#allocation3 + $0x58] sm:$0xff] %vm1097_vm2, %v3482_v23 }
 0x328   : > { %v3528_v60 = vld [vmem:[#allocation3 + $0x48] sm:$0xff] }
 0x329   : > { %v3558_v13 = vadd.f32 %v5517_v1, %v3528_v60  ;;  %3499 = vst.msk [vmem:[#allocation3 + $0x60] sm:$0xff] %vm1097_vm2, %v3483_v54  ;;  %v3405_v55 = vld [vmem:[#allocation3 + $0x70] sm:$0xff] }
 0x32a   : > { %v3406_v33 = vld [vmem:[#allocation3 + $0x78] sm:$0xff] }
 0x32b   : > { %3591 = vst.msk [vmem:[%s5122_s27 + $0x98] sm:$0xff] %vm3571_vm3, %v3558_v13 }
 0x32c   : > { %v3452_v14 = vpop.permute.xlu0 %3451 }
 0x32d   : > { %v3485_v11 = vadd.f32 %v3452_v14, %v3405_v55 }
 0x32e   : > { %v3454_v57 = vpop.permute.xlu1 %3453  ;;  %v3530_v15 = vld [vmem:[#allocation3 + $0x58] sm:$0xff] }
 0x32f   : > { %v3486_v8 = vadd.f32 %v3454_v57, %v3406_v33  ;;  %v3562_v28 = vadd.f32 %v5517_v1, %v3530_v15  ;;  %3501 = vst.msk [vmem:[#allocation3 + $0x70] sm:$0xff] %vm1097_vm2, %v3485_v11 }
 0x330   : > { %v3531_v45 = vld [vmem:[#allocation3 + $0x60] sm:$0xff] }
 0x331   : > { %v3565_v48 = vadd.f32 %v5517_v1, %v3531_v45  ;;  %3502 = vst.msk [vmem:[#allocation3 + $0x78] sm:$0xff] %vm1097_vm2, %v3486_v8 }
 0x332   : > { %3595 = vst.msk [vmem:[%s5122_s27 + $0xb8] sm:$0xff] %vm3571_vm3, %v3562_v28 }
 0x333   : > { %3598 = vst.msk [vmem:[%s5122_s27 + $0xd0] sm:$0xff] %vm3571_vm3, %v3565_v48 }
 0x336   : > { %v3533_v56 = vld [vmem:[#allocation3 + $0x70] sm:$0xff] }
 0x337   : > { %v3569_v18 = vadd.f32 %v5517_v1, %v3533_v56 }
 0x338   : > { %v3534_v58 = vld [vmem:[#allocation3 + $0x78] sm:$0xff] }
 0x339   : > { %v3570_v19 = vadd.f32 %v5517_v1, %v3534_v58  ;;  %3602 = vst.msk [vmem:[%s5122_s27 + $0xf0] sm:$0xff] %vm3571_vm3, %v3569_v18 }
 0x33b   : > { %3603 = vst.msk [vmem:[%s5122_s27 + $0xf8] sm:$0xff] %vm3571_vm3, %v3570_v19 }
 0x33c PF: > { %s13_s16 = sadd.s32 1, %s4283_s16   ;;  %s5755_s12 = smov %s4275_s14 }
 0x33d   : > { %p10_p7 = scmp.ge.s32.totalorder %s13_s16, 14   ;;  %s5756_s13 = smov %s4279_s15 }
 0x33e   : > { %s5757_s14 = smov %s5760_s17  ;;  %s5758_s15 = smov %s5764_s18 }
 0x33f   :  { %12 = sbr.rel (!%p10_p7) target bundleno = 3 (0x3), region = 80 }

</bundles_post_ra>
